<compile_context>
chip_gen: v5e
topology: v5e:2x2
jax: 0.10.0
libtpu: 0.0.40
codegen_flags: <defaults>
</compile_context>

<pallas_src>
import functools

import jax
import jax.numpy as jnp
import numpy as np
from jax import lax
from jax.experimental import pallas as pl
from jax.experimental.pallas import tpu as pltpu

_EPS = 1e-5   # torch.nn.InstanceNorm2d default (affine=False, biased variance)


# -----------------------------------------------------------------------------
# In-kernel math helpers (VPU / EUP / XLU friendly ops only)
# -----------------------------------------------------------------------------
def _erf(z):
    """Abramowitz & Stegun 7.1.26 erf approximation, |err| < 1.5e-7."""
    za = jnp.abs(z)
    t = 1.0 / (1.0 + 0.3275911 * za)
    poly = ((((1.061405429 * t - 1.453152027) * t + 1.421413741) * t
             - 0.284496736) * t + 0.254829592) * t
    e = 1.0 - poly * jnp.exp(-za * za)
    return jnp.where(z >= 0, e, -e)


def _gelu(x):
    """Exact (erf) GELU, matching torch.nn.GELU() default."""
    return 0.5 * x * (1.0 + _erf(x * 0.7071067811865476))


def _instance_norm_gelu(y, eps):
    """Single-pass InstanceNorm2d (affine=False, biased var) + GELU on (C, L)."""
    inv_l = 1.0 / y.shape[1]
    mean = jnp.sum(y, axis=1, keepdims=True) * inv_l
    meansq = jnp.sum(y * y, axis=1, keepdims=True) * inv_l
    var = meansq - mean * mean
    return _gelu((y - mean) * lax.rsqrt(var + eps))


def _tap_masks(H, W, L):
    """9 boundary masks (1, L) in {0,1} f32 for a 3x3 / pad=1 conv on flat L=H*W."""
    li = lax.broadcasted_iota(jnp.int32, (1, L), 1).astype(jnp.float32)
    h = jnp.floor((li + 0.5) * (1.0 / W))        # exact row index (float, no int div)
    w = li - h * W                               # exact column index
    masks = []
    for dy in (-1, 0, 1):
        for dx in (-1, 0, 1):
            hs, ws = h + dy, w + dx
            valid = (hs >= 0.0) & (hs <= H - 1.0) & (ws >= 0.0) & (ws <= W - 1.0)
            masks.append(jnp.where(valid, 1.0, 0.0).astype(jnp.float32))
    return masks


def _conv3x3_taps(x_cl, w_ref, masks, W, L):
    """3x3 conv (pad=1, stride=1) on channels-last-on-sublane layout.

    x_cl:  (Cin, L) f32 activations, L = H*W on the lane axis.
    w_ref: (9, Cout, Cin) ref, tap-major weights (tap = ky*3 + kx).
    Returns (Cout, L) f32 = sum_tap  W_tap @ shift_tap(x).
    """
    acc = None
    for tap in range(9):
        dy, dx = tap // 3 - 1, tap % 3 - 1
        s = dy * W + dx                               # flat-L source offset
        if s == 0:
            xt = x_cl                                 # center tap: no shift, no mask
        else:
            shifted = pltpu.roll(x_cl, shift=(-s) % L, axis=1)   # rolled[l] = x[l + s]
            xt = shifted * masks[tap]                 # zero out-of-image taps
        part = jnp.dot(w_ref[tap], xt, preferred_element_type=jnp.float32)
        acc = part if acc is None else acc + part
    return acc


# -----------------------------------------------------------------------------
# Fully fused BasicBlock kernels (one grid step == one batch element)
# -----------------------------------------------------------------------------
def _basic_block_proj_kernel(x_ref, w1_ref, w2_ref, wsc_ref, o_ref, *, H, W, eps):
    L = H * W
    x = x_ref[0].astype(jnp.float32)                               # (Cin, L)
    masks = _tap_masks(H, W, L)                                    # shared by both convs
    y = _instance_norm_gelu(_conv3x3_taps(x, w1_ref, masks, W, L), eps)   # conv1
    y = _instance_norm_gelu(_conv3x3_taps(y, w2_ref, masks, W, L), eps)   # conv2
    sc = jnp.dot(wsc_ref[...], x, preferred_element_type=jnp.float32)     # 1x1 shortcut
    sc = _instance_norm_gelu(sc, eps)
    o_ref[0] = (y + sc).astype(o_ref.dtype)


def _basic_block_id_kernel(x_ref, w1_ref, w2_ref, o_ref, *, H, W, eps):
    L = H * W
    x = x_ref[0].astype(jnp.float32)                               # (C, L)
    masks = _tap_masks(H, W, L)
    y = _instance_norm_gelu(_conv3x3_taps(x, w1_ref, masks, W, L), eps)
    y = _instance_norm_gelu(_conv3x3_taps(y, w2_ref, masks, W, L), eps)
    o_ref[0] = (y + x).astype(o_ref.dtype)                         # identity shortcut


# -----------------------------------------------------------------------------
# Wrapper
# -----------------------------------------------------------------------------
def _compiler_params(Cin, Cout, L):
    f32 = 4
    blocks = 2 * (Cin * L + Cout * L) * f32                     # double-buffered in/out
    weights = (9 * Cout * Cin + 9 * Cout * Cout + Cout * Cin) * f32 * 2
    temps = (6 * Cout + 3 * Cin) * L * f32                      # y1/y2/acc/tap/shortcut temps
    need = blocks + weights + temps + (8 << 20)                 # compiler scratch headroom
    limit = int(min(max(need, 24 << 20), 60 << 20))             # stay under v7x's 64 MiB VMEM
    return pltpu.CompilerParams(dimension_semantics=("parallel",),
                                vmem_limit_bytes=limit)


def basic_block_forward(x_nchw, params, *, stride=1):
    """BasicBlock forward (norm=InstanceNorm2d, act=GELU, preact=False, bias=False)."""
    if stride != 1:
        # TODO(synk): stride != 1 unsupported (the original module's identity shortcut
        # shape-mismatches for stride != 1 anyway).
        raise NotImplementedError("stride != 1 is not supported")
    B, Cin, H, W = x_nchw.shape
    L = H * W
    w1 = params["w1"]            # (3, 3, Cin,  Cout)  HWIO
    w2 = params["w2"]            # (3, 3, Cout, Cout)  HWIO
    wsc = params.get("wsc")      # (Cin, Cout) or None (identity shortcut)
    Cout = w1.shape[-1]

    # Channels-on-sublane layout: NCHW -> (B, C, H*W) is a free reshape (no transpose).
    x = x_nchw.reshape(B, Cin, L).astype(jnp.float32)

    # HWIO (ky, kx, ci, co) -> tap-major (tap, co, ci), tap = ky*3 + kx.
    w1_t = jnp.transpose(w1, (0, 1, 3, 2)).reshape(9, Cout, Cin).astype(jnp.float32)
    w2_t = jnp.transpose(w2, (0, 1, 3, 2)).reshape(9, Cout, Cout).astype(jnp.float32)

    in_specs = [
        pl.BlockSpec((1, Cin, L), lambda b: (b, 0, 0)),
        pl.BlockSpec((9, Cout, Cin), lambda b: (0, 0, 0)),
        pl.BlockSpec((9, Cout, Cout), lambda b: (0, 0, 0)),
    ]
    args = [x, w1_t, w2_t]
    if wsc is not None:
        kern = functools.partial(_basic_block_proj_kernel, H=H, W=W, eps=_EPS)
        in_specs.append(pl.BlockSpec((Cout, Cin), lambda b: (0, 0)))
        args.append(jnp.transpose(wsc).astype(jnp.float32))     # (Cout, Cin)
    else:
        assert Cin == Cout, "identity shortcut requires in_ch == out_ch"
        kern = functools.partial(_basic_block_id_kernel, H=H, W=W, eps=_EPS)

    out = pl.pallas_call(
        kern,
        out_shape=jax.ShapeDtypeStruct((B, Cout, L), jnp.float32),
        grid=(B,),
        in_specs=in_specs,
        out_specs=pl.BlockSpec((1, Cout, L), lambda b: (b, 0, 0)),
        compiler_params=_compiler_params(Cin, Cout, L),
    )(*args)
    return out.reshape(B, Cout, H, W)                            # free reshape back to NCHW


# -----------------------------------------------------------------------------
# Pure-JAX (XLA) reference for correctness check
# -----------------------------------------------------------------------------
def reference_forward(x_nchw, params):
    def cna(x, w_hwio, padding):
        y = lax.conv_general_dilated(
            x, w_hwio, (1, 1), [(padding, padding), (padding, padding)],
            dimension_numbers=("NCHW", "HWIO", "NCHW"),
            precision=lax.Precision.HIGHEST)
        mean = jnp.mean(y, axis=(2, 3), keepdims=True)
        var = jnp.mean((y - mean) ** 2, axis=(2, 3), keepdims=True)
        y = (y - mean) * lax.rsqrt(var + _EPS)
        return jax.nn.gelu(y, approximate=False)

    y = cna(x_nchw, params["w1"], 1)
    y = cna(y, params["w2"], 1)
    wsc = params.get("wsc")
    sc = x_nchw if wsc is None else cna(x_nchw, wsc[None, None, :, :], 0)
    return y + sc


# -----------------------------------------------------------------------------
if __name__ == "__main__":
    forward = jax.jit(basic_block_forward)

    # Config 1: projection shortcut (in_ch != out_ch, stride=1)
    B, in_ch, out_ch, H, W = 2, 4, 32, 16, 16
    key = jax.random.PRNGKey(0)
    k1, k2, k3, k4, k5, k6, k7 = jax.random.split(key, 7)
    params = {
        "w1": jax.random.normal(k1, (3, 3, in_ch, out_ch), jnp.float32) * 0.2,
        "w2": jax.random.normal(k2, (3, 3, out_ch, out_ch), jnp.float32) * 0.1,
        "wsc": jax.random.normal(k3, (in_ch, out_ch), jnp.float32) * 0.3,
    }
    x = jax.random.normal(k4, (B, in_ch, H, W), jnp.float32)

    out = jax.block_until_ready(forward(x, params))
    assert out.shape == (B, out_ch, H, W), out.shape
    ref = jax.block_until_ready(reference_forward(x, params))
    np.testing.assert_allclose(np.asarray(out), np.asarray(ref),
                               rtol=3e-3, atol=3e-3)

    # Config 2: identity shortcut (in_ch == out_ch, stride=1)
    params_id = {
        "w1": jax.random.normal(k5, (3, 3, out_ch, out_ch), jnp.float32) * 0.1,
        "w2": jax.random.normal(k6, (3, 3, out_ch, out_ch), jnp.float32) * 0.1,
    }
    x2 = jax.random.normal(k7, (B, out_ch, H, W), jnp.float32)
    out2 = jax.block_until_ready(forward(x2, params_id))
    assert out2.shape == (B, out_ch, H, W), out2.shape
    ref2 = jax.block_until_ready(reference_forward(x2, params_id))
    np.testing.assert_allclose(np.asarray(out2), np.asarray(ref2),
                               rtol=3e-3, atol=3e-3)

    print("KERNEL_OK")
</pallas_src>

<mosaic_0001>
module attributes {stable_mosaic.version = 11 : i64} {
  func.func @_basic_block_proj_kernel(%arg0: i32, %arg1: memref<1x4x256xf32, #tpu.memory_space<vmem>>, %arg2: memref<9x32x4xf32, #tpu.memory_space<vmem>>, %arg3: memref<9x32x32xf32, #tpu.memory_space<vmem>>, %arg4: memref<32x4xf32, #tpu.memory_space<vmem>>, %arg5: memref<1x32x256xf32, #tpu.memory_space<vmem>>) attributes {dimension_semantics = [#tpu.dimension_semantics<parallel>], iteration_bounds = array<i64: 2>, scalar_prefetch = 0 : i64, scratch_operands = 0 : i64, tpu.core_type = #tpu.core_type<tc>, window_params = [{transform_indices = @transform_0, window_bounds = array<i64: 1, 4, 256>}, {pipeline_mode = #tpu.pipeline_mode<synchronous>, transform_indices = @transform_1, window_bounds = array<i64: 9, 32, 4>}, {pipeline_mode = #tpu.pipeline_mode<synchronous>, transform_indices = @transform_2, window_bounds = array<i64: 9, 32, 32>}, {pipeline_mode = #tpu.pipeline_mode<synchronous>, transform_indices = @transform_3, window_bounds = array<i64: 32, 4>}, {transform_indices = @transform_4, window_bounds = array<i64: 1, 32, 256>}]} {
    %c0 = arith.constant 0 : index
    %c0_0 = arith.constant 0 : index
    %c0_1 = arith.constant 0 : index
    %0 = vector.load %arg1[%c0, %c0_0, %c0_1] : memref<1x4x256xf32, #tpu.memory_space<vmem>>, vector<1x4x256xf32>
    %1 = vector.shape_cast %0 : vector<1x4x256xf32> to vector<4x256xf32>
    %2 = tpu.iota {dimensions = array<i32: 1>} : vector<1x256xi32>
    %3 = arith.sitofp %2 : vector<1x256xi32> to vector<1x256xf32>
    %cst = arith.constant 5.000000e-01 : f32
    %4 = vector.broadcast %cst : f32 to vector<1x256xf32>
    %5 = arith.addf %3, %4 : vector<1x256xf32>
    %cst_2 = arith.constant 6.250000e-02 : f32
    %6 = vector.broadcast %cst_2 : f32 to vector<1x256xf32>
    %7 = arith.mulf %5, %6 : vector<1x256xf32>
    %8 = math.floor %7 : vector<1x256xf32>
    %cst_3 = arith.constant 1.600000e+01 : f32
    %9 = vector.broadcast %cst_3 : f32 to vector<1x256xf32>
    %10 = arith.mulf %8, %9 : vector<1x256xf32>
    %11 = arith.subf %3, %10 : vector<1x256xf32>
    %cst_4 = arith.constant -1.000000e+00 : f32
    %12 = vector.broadcast %cst_4 : f32 to vector<1x256xf32>
    %13 = arith.addf %8, %12 : vector<1x256xf32>
    %cst_5 = arith.constant -1.000000e+00 : f32
    %14 = vector.broadcast %cst_5 : f32 to vector<1x256xf32>
    %15 = arith.addf %11, %14 : vector<1x256xf32>
    %cst_6 = arith.constant 0.000000e+00 : f32
    %16 = vector.broadcast %cst_6 : f32 to vector<1x256xf32>
    %17 = arith.cmpf oge, %13, %16 : vector<1x256xf32>
    %cst_7 = arith.constant 1.500000e+01 : f32
    %18 = vector.broadcast %cst_7 : f32 to vector<1x256xf32>
    %19 = arith.cmpf ole, %13, %18 : vector<1x256xf32>
    %20 = arith.andi %17, %19 : vector<1x256xi1>
    %cst_8 = arith.constant 0.000000e+00 : f32
    %21 = vector.broadcast %cst_8 : f32 to vector<1x256xf32>
    %22 = arith.cmpf oge, %15, %21 : vector<1x256xf32>
    %23 = arith.andi %20, %22 : vector<1x256xi1>
    %cst_9 = arith.constant 1.500000e+01 : f32
    %24 = vector.broadcast %cst_9 : f32 to vector<1x256xf32>
    %25 = arith.cmpf ole, %15, %24 : vector<1x256xf32>
    %26 = arith.andi %23, %25 : vector<1x256xi1>
    %cst_10 = arith.constant 1.000000e+00 : f32
    %cst_11 = arith.constant 0.000000e+00 : f32
    %27 = vector.broadcast %cst_10 : f32 to vector<1x256xf32>
    %28 = vector.broadcast %cst_11 : f32 to vector<1x256xf32>
    %29 = arith.select %26, %27, %28 : vector<1x256xi1>, vector<1x256xf32>
    %cst_12 = arith.constant -1.000000e+00 : f32
    %30 = vector.broadcast %cst_12 : f32 to vector<1x256xf32>
    %31 = arith.addf %8, %30 : vector<1x256xf32>
    %cst_13 = arith.constant 0.000000e+00 : f32
    %32 = vector.broadcast %cst_13 : f32 to vector<1x256xf32>
    %33 = arith.addf %11, %32 : vector<1x256xf32>
    %cst_14 = arith.constant 0.000000e+00 : f32
    %34 = vector.broadcast %cst_14 : f32 to vector<1x256xf32>
    %35 = arith.cmpf oge, %31, %34 : vector<1x256xf32>
    %cst_15 = arith.constant 1.500000e+01 : f32
    %36 = vector.broadcast %cst_15 : f32 to vector<1x256xf32>
    %37 = arith.cmpf ole, %31, %36 : vector<1x256xf32>
    %38 = arith.andi %35, %37 : vector<1x256xi1>
    %cst_16 = arith.constant 0.000000e+00 : f32
    %39 = vector.broadcast %cst_16 : f32 to vector<1x256xf32>
    %40 = arith.cmpf oge, %33, %39 : vector<1x256xf32>
    %41 = arith.andi %38, %40 : vector<1x256xi1>
    %cst_17 = arith.constant 1.500000e+01 : f32
    %42 = vector.broadcast %cst_17 : f32 to vector<1x256xf32>
    %43 = arith.cmpf ole, %33, %42 : vector<1x256xf32>
    %44 = arith.andi %41, %43 : vector<1x256xi1>
    %cst_18 = arith.constant 1.000000e+00 : f32
    %cst_19 = arith.constant 0.000000e+00 : f32
    %45 = vector.broadcast %cst_18 : f32 to vector<1x256xf32>
    %46 = vector.broadcast %cst_19 : f32 to vector<1x256xf32>
    %47 = arith.select %44, %45, %46 : vector<1x256xi1>, vector<1x256xf32>
    %cst_20 = arith.constant -1.000000e+00 : f32
    %48 = vector.broadcast %cst_20 : f32 to vector<1x256xf32>
    %49 = arith.addf %8, %48 : vector<1x256xf32>
    %cst_21 = arith.constant 1.000000e+00 : f32
    %50 = vector.broadcast %cst_21 : f32 to vector<1x256xf32>
    %51 = arith.addf %11, %50 : vector<1x256xf32>
    %cst_22 = arith.constant 0.000000e+00 : f32
    %52 = vector.broadcast %cst_22 : f32 to vector<1x256xf32>
    %53 = arith.cmpf oge, %49, %52 : vector<1x256xf32>
    %cst_23 = arith.constant 1.500000e+01 : f32
    %54 = vector.broadcast %cst_23 : f32 to vector<1x256xf32>
    %55 = arith.cmpf ole, %49, %54 : vector<1x256xf32>
    %56 = arith.andi %53, %55 : vector<1x256xi1>
    %cst_24 = arith.constant 0.000000e+00 : f32
    %57 = vector.broadcast %cst_24 : f32 to vector<1x256xf32>
    %58 = arith.cmpf oge, %51, %57 : vector<1x256xf32>
    %59 = arith.andi %56, %58 : vector<1x256xi1>
    %cst_25 = arith.constant 1.500000e+01 : f32
    %60 = vector.broadcast %cst_25 : f32 to vector<1x256xf32>
    %61 = arith.cmpf ole, %51, %60 : vector<1x256xf32>
    %62 = arith.andi %59, %61 : vector<1x256xi1>
    %cst_26 = arith.constant 1.000000e+00 : f32
    %cst_27 = arith.constant 0.000000e+00 : f32
    %63 = vector.broadcast %cst_26 : f32 to vector<1x256xf32>
    %64 = vector.broadcast %cst_27 : f32 to vector<1x256xf32>
    %65 = arith.select %62, %63, %64 : vector<1x256xi1>, vector<1x256xf32>
    %cst_28 = arith.constant 0.000000e+00 : f32
    %66 = vector.broadcast %cst_28 : f32 to vector<1x256xf32>
    %67 = arith.addf %8, %66 : vector<1x256xf32>
    %cst_29 = arith.constant -1.000000e+00 : f32
    %68 = vector.broadcast %cst_29 : f32 to vector<1x256xf32>
    %69 = arith.addf %11, %68 : vector<1x256xf32>
    %cst_30 = arith.constant 0.000000e+00 : f32
    %70 = vector.broadcast %cst_30 : f32 to vector<1x256xf32>
    %71 = arith.cmpf oge, %67, %70 : vector<1x256xf32>
    %cst_31 = arith.constant 1.500000e+01 : f32
    %72 = vector.broadcast %cst_31 : f32 to vector<1x256xf32>
    %73 = arith.cmpf ole, %67, %72 : vector<1x256xf32>
    %74 = arith.andi %71, %73 : vector<1x256xi1>
    %cst_32 = arith.constant 0.000000e+00 : f32
    %75 = vector.broadcast %cst_32 : f32 to vector<1x256xf32>
    %76 = arith.cmpf oge, %69, %75 : vector<1x256xf32>
    %77 = arith.andi %74, %76 : vector<1x256xi1>
    %cst_33 = arith.constant 1.500000e+01 : f32
    %78 = vector.broadcast %cst_33 : f32 to vector<1x256xf32>
    %79 = arith.cmpf ole, %69, %78 : vector<1x256xf32>
    %80 = arith.andi %77, %79 : vector<1x256xi1>
    %cst_34 = arith.constant 1.000000e+00 : f32
    %cst_35 = arith.constant 0.000000e+00 : f32
    %81 = vector.broadcast %cst_34 : f32 to vector<1x256xf32>
    %82 = vector.broadcast %cst_35 : f32 to vector<1x256xf32>
    %83 = arith.select %80, %81, %82 : vector<1x256xi1>, vector<1x256xf32>
    %cst_36 = arith.constant 0.000000e+00 : f32
    %84 = vector.broadcast %cst_36 : f32 to vector<1x256xf32>
    %85 = arith.addf %8, %84 : vector<1x256xf32>
    %cst_37 = arith.constant 1.000000e+00 : f32
    %86 = vector.broadcast %cst_37 : f32 to vector<1x256xf32>
    %87 = arith.addf %11, %86 : vector<1x256xf32>
    %cst_38 = arith.constant 0.000000e+00 : f32
    %88 = vector.broadcast %cst_38 : f32 to vector<1x256xf32>
    %89 = arith.cmpf oge, %85, %88 : vector<1x256xf32>
    %cst_39 = arith.constant 1.500000e+01 : f32
    %90 = vector.broadcast %cst_39 : f32 to vector<1x256xf32>
    %91 = arith.cmpf ole, %85, %90 : vector<1x256xf32>
    %92 = arith.andi %89, %91 : vector<1x256xi1>
    %cst_40 = arith.constant 0.000000e+00 : f32
    %93 = vector.broadcast %cst_40 : f32 to vector<1x256xf32>
    %94 = arith.cmpf oge, %87, %93 : vector<1x256xf32>
    %95 = arith.andi %92, %94 : vector<1x256xi1>
    %cst_41 = arith.constant 1.500000e+01 : f32
    %96 = vector.broadcast %cst_41 : f32 to vector<1x256xf32>
    %97 = arith.cmpf ole, %87, %96 : vector<1x256xf32>
    %98 = arith.andi %95, %97 : vector<1x256xi1>
    %cst_42 = arith.constant 1.000000e+00 : f32
    %cst_43 = arith.constant 0.000000e+00 : f32
    %99 = vector.broadcast %cst_42 : f32 to vector<1x256xf32>
    %100 = vector.broadcast %cst_43 : f32 to vector<1x256xf32>
    %101 = arith.select %98, %99, %100 : vector<1x256xi1>, vector<1x256xf32>
    %cst_44 = arith.constant 1.000000e+00 : f32
    %102 = vector.broadcast %cst_44 : f32 to vector<1x256xf32>
    %103 = arith.addf %8, %102 : vector<1x256xf32>
    %cst_45 = arith.constant -1.000000e+00 : f32
    %104 = vector.broadcast %cst_45 : f32 to vector<1x256xf32>
    %105 = arith.addf %11, %104 : vector<1x256xf32>
    %cst_46 = arith.constant 0.000000e+00 : f32
    %106 = vector.broadcast %cst_46 : f32 to vector<1x256xf32>
    %107 = arith.cmpf oge, %103, %106 : vector<1x256xf32>
    %cst_47 = arith.constant 1.500000e+01 : f32
    %108 = vector.broadcast %cst_47 : f32 to vector<1x256xf32>
    %109 = arith.cmpf ole, %103, %108 : vector<1x256xf32>
    %110 = arith.andi %107, %109 : vector<1x256xi1>
    %cst_48 = arith.constant 0.000000e+00 : f32
    %111 = vector.broadcast %cst_48 : f32 to vector<1x256xf32>
    %112 = arith.cmpf oge, %105, %111 : vector<1x256xf32>
    %113 = arith.andi %110, %112 : vector<1x256xi1>
    %cst_49 = arith.constant 1.500000e+01 : f32
    %114 = vector.broadcast %cst_49 : f32 to vector<1x256xf32>
    %115 = arith.cmpf ole, %105, %114 : vector<1x256xf32>
    %116 = arith.andi %113, %115 : vector<1x256xi1>
    %cst_50 = arith.constant 1.000000e+00 : f32
    %cst_51 = arith.constant 0.000000e+00 : f32
    %117 = vector.broadcast %cst_50 : f32 to vector<1x256xf32>
    %118 = vector.broadcast %cst_51 : f32 to vector<1x256xf32>
    %119 = arith.select %116, %117, %118 : vector<1x256xi1>, vector<1x256xf32>
    %cst_52 = arith.constant 1.000000e+00 : f32
    %120 = vector.broadcast %cst_52 : f32 to vector<1x256xf32>
    %121 = arith.addf %8, %120 : vector<1x256xf32>
    %cst_53 = arith.constant 0.000000e+00 : f32
    %122 = vector.broadcast %cst_53 : f32 to vector<1x256xf32>
    %123 = arith.addf %11, %122 : vector<1x256xf32>
    %cst_54 = arith.constant 0.000000e+00 : f32
    %124 = vector.broadcast %cst_54 : f32 to vector<1x256xf32>
    %125 = arith.cmpf oge, %121, %124 : vector<1x256xf32>
    %cst_55 = arith.constant 1.500000e+01 : f32
    %126 = vector.broadcast %cst_55 : f32 to vector<1x256xf32>
    %127 = arith.cmpf ole, %121, %126 : vector<1x256xf32>
    %128 = arith.andi %125, %127 : vector<1x256xi1>
    %cst_56 = arith.constant 0.000000e+00 : f32
    %129 = vector.broadcast %cst_56 : f32 to vector<1x256xf32>
    %130 = arith.cmpf oge, %123, %129 : vector<1x256xf32>
    %131 = arith.andi %128, %130 : vector<1x256xi1>
    %cst_57 = arith.constant 1.500000e+01 : f32
    %132 = vector.broadcast %cst_57 : f32 to vector<1x256xf32>
    %133 = arith.cmpf ole, %123, %132 : vector<1x256xf32>
    %134 = arith.andi %131, %133 : vector<1x256xi1>
    %cst_58 = arith.constant 1.000000e+00 : f32
    %cst_59 = arith.constant 0.000000e+00 : f32
    %135 = vector.broadcast %cst_58 : f32 to vector<1x256xf32>
    %136 = vector.broadcast %cst_59 : f32 to vector<1x256xf32>
    %137 = arith.select %134, %135, %136 : vector<1x256xi1>, vector<1x256xf32>
    %cst_60 = arith.constant 1.000000e+00 : f32
    %138 = vector.broadcast %cst_60 : f32 to vector<1x256xf32>
    %139 = arith.addf %8, %138 : vector<1x256xf32>
    %cst_61 = arith.constant 1.000000e+00 : f32
    %140 = vector.broadcast %cst_61 : f32 to vector<1x256xf32>
    %141 = arith.addf %11, %140 : vector<1x256xf32>
    %cst_62 = arith.constant 0.000000e+00 : f32
    %142 = vector.broadcast %cst_62 : f32 to vector<1x256xf32>
    %143 = arith.cmpf oge, %139, %142 : vector<1x256xf32>
    %cst_63 = arith.constant 1.500000e+01 : f32
    %144 = vector.broadcast %cst_63 : f32 to vector<1x256xf32>
    %145 = arith.cmpf ole, %139, %144 : vector<1x256xf32>
    %146 = arith.andi %143, %145 : vector<1x256xi1>
    %cst_64 = arith.constant 0.000000e+00 : f32
    %147 = vector.broadcast %cst_64 : f32 to vector<1x256xf32>
    %148 = arith.cmpf oge, %141, %147 : vector<1x256xf32>
    %149 = arith.andi %146, %148 : vector<1x256xi1>
    %cst_65 = arith.constant 1.500000e+01 : f32
    %150 = vector.broadcast %cst_65 : f32 to vector<1x256xf32>
    %151 = arith.cmpf ole, %141, %150 : vector<1x256xf32>
    %152 = arith.andi %149, %151 : vector<1x256xi1>
    %cst_66 = arith.constant 1.000000e+00 : f32
    %cst_67 = arith.constant 0.000000e+00 : f32
    %153 = vector.broadcast %cst_66 : f32 to vector<1x256xf32>
    %154 = vector.broadcast %cst_67 : f32 to vector<1x256xf32>
    %155 = arith.select %152, %153, %154 : vector<1x256xi1>, vector<1x256xf32>
    %c17_i32 = arith.constant 17 : i32
    %156 = tpu.dynamic_rotate %1 by %c17_i32 dim 1 : vector<4x256xf32>, i32 -> vector<4x256xf32>
    %157 = vector.broadcast %29 : vector<1x256xf32> to vector<4x256xf32>
    %158 = arith.mulf %156, %157 : vector<4x256xf32>
    %c0_68 = arith.constant 0 : index
    %c0_69 = arith.constant 0 : index
    %c0_70 = arith.constant 0 : index
    %159 = vector.load %arg2[%c0_68, %c0_69, %c0_70] : memref<9x32x4xf32, #tpu.memory_space<vmem>>, vector<1x32x4xf32>
    %160 = vector.shape_cast %159 : vector<1x32x4xf32> to vector<32x4xf32>
    %cst_71 = arith.constant dense<0.000000e+00> : vector<32x256xf32>
    %161 = tpu.matmul %160, %158, %cst_71 {dimension_numbers = #tpu.dot_dimension_numbers<[1], [0], [0], [1], [0, 0, 1, 1], [], []>} : vector<32x4xf32>, vector<4x256xf32>, vector<32x256xf32> -> vector<32x256xf32>
    %c16_i32 = arith.constant 16 : i32
    %162 = tpu.dynamic_rotate %1 by %c16_i32 dim 1 : vector<4x256xf32>, i32 -> vector<4x256xf32>
    %163 = vector.broadcast %47 : vector<1x256xf32> to vector<4x256xf32>
    %164 = arith.mulf %162, %163 : vector<4x256xf32>
    %c1 = arith.constant 1 : index
    %c0_72 = arith.constant 0 : index
    %c0_73 = arith.constant 0 : index
    %165 = vector.load %arg2[%c1, %c0_72, %c0_73] : memref<9x32x4xf32, #tpu.memory_space<vmem>>, vector<1x32x4xf32>
    %166 = vector.shape_cast %165 : vector<1x32x4xf32> to vector<32x4xf32>
    %cst_74 = arith.constant dense<0.000000e+00> : vector<32x256xf32>
    %167 = tpu.matmul %166, %164, %cst_74 {dimension_numbers = #tpu.dot_dimension_numbers<[1], [0], [0], [1], [0, 0, 1, 1], [], []>} : vector<32x4xf32>, vector<4x256xf32>, vector<32x256xf32> -> vector<32x256xf32>
    %168 = arith.addf %161, %167 : vector<32x256xf32>
    %c15_i32 = arith.constant 15 : i32
    %169 = tpu.dynamic_rotate %1 by %c15_i32 dim 1 : vector<4x256xf32>, i32 -> vector<4x256xf32>
    %170 = vector.broadcast %65 : vector<1x256xf32> to vector<4x256xf32>
    %171 = arith.mulf %169, %170 : vector<4x256xf32>
    %c2 = arith.constant 2 : index
    %c0_75 = arith.constant 0 : index
    %c0_76 = arith.constant 0 : index
    %172 = vector.load %arg2[%c2, %c0_75, %c0_76] : memref<9x32x4xf32, #tpu.memory_space<vmem>>, vector<1x32x4xf32>
    %173 = vector.shape_cast %172 : vector<1x32x4xf32> to vector<32x4xf32>
    %cst_77 = arith.constant dense<0.000000e+00> : vector<32x256xf32>
    %174 = tpu.matmul %173, %171, %cst_77 {dimension_numbers = #tpu.dot_dimension_numbers<[1], [0], [0], [1], [0, 0, 1, 1], [], []>} : vector<32x4xf32>, vector<4x256xf32>, vector<32x256xf32> -> vector<32x256xf32>
    %175 = arith.addf %168, %174 : vector<32x256xf32>
    %c1_i32 = arith.constant 1 : i32
    %176 = tpu.dynamic_rotate %1 by %c1_i32 dim 1 : vector<4x256xf32>, i32 -> vector<4x256xf32>
    %177 = vector.broadcast %83 : vector<1x256xf32> to vector<4x256xf32>
    %178 = arith.mulf %176, %177 : vector<4x256xf32>
    %c3 = arith.constant 3 : index
    %c0_78 = arith.constant 0 : index
    %c0_79 = arith.constant 0 : index
    %179 = vector.load %arg2[%c3, %c0_78, %c0_79] : memref<9x32x4xf32, #tpu.memory_space<vmem>>, vector<1x32x4xf32>
    %180 = vector.shape_cast %179 : vector<1x32x4xf32> to vector<32x4xf32>
    %cst_80 = arith.constant dense<0.000000e+00> : vector<32x256xf32>
    %181 = tpu.matmul %180, %178, %cst_80 {dimension_numbers = #tpu.dot_dimension_numbers<[1], [0], [0], [1], [0, 0, 1, 1], [], []>} : vector<32x4xf32>, vector<4x256xf32>, vector<32x256xf32> -> vector<32x256xf32>
    %182 = arith.addf %175, %181 : vector<32x256xf32>
    %c4 = arith.constant 4 : index
    %c0_81 = arith.constant 0 : index
    %c0_82 = arith.constant 0 : index
    %183 = vector.load %arg2[%c4, %c0_81, %c0_82] : memref<9x32x4xf32, #tpu.memory_space<vmem>>, vector<1x32x4xf32>
    %184 = vector.shape_cast %183 : vector<1x32x4xf32> to vector<32x4xf32>
    %cst_83 = arith.constant dense<0.000000e+00> : vector<32x256xf32>
    %185 = tpu.matmul %184, %1, %cst_83 {dimension_numbers = #tpu.dot_dimension_numbers<[1], [0], [0], [1], [0, 0, 1, 1], [], []>} : vector<32x4xf32>, vector<4x256xf32>, vector<32x256xf32> -> vector<32x256xf32>
    %186 = arith.addf %182, %185 : vector<32x256xf32>
    %c255_i32 = arith.constant 255 : i32
    %187 = tpu.dynamic_rotate %1 by %c255_i32 dim 1 : vector<4x256xf32>, i32 -> vector<4x256xf32>
    %188 = vector.broadcast %101 : vector<1x256xf32> to vector<4x256xf32>
    %189 = arith.mulf %187, %188 : vector<4x256xf32>
    %c5 = arith.constant 5 : index
    %c0_84 = arith.constant 0 : index
    %c0_85 = arith.constant 0 : index
    %190 = vector.load %arg2[%c5, %c0_84, %c0_85] : memref<9x32x4xf32, #tpu.memory_space<vmem>>, vector<1x32x4xf32>
    %191 = vector.shape_cast %190 : vector<1x32x4xf32> to vector<32x4xf32>
    %cst_86 = arith.constant dense<0.000000e+00> : vector<32x256xf32>
    %192 = tpu.matmul %191, %189, %cst_86 {dimension_numbers = #tpu.dot_dimension_numbers<[1], [0], [0], [1], [0, 0, 1, 1], [], []>} : vector<32x4xf32>, vector<4x256xf32>, vector<32x256xf32> -> vector<32x256xf32>
    %193 = arith.addf %186, %192 : vector<32x256xf32>
    %c241_i32 = arith.constant 241 : i32
    %194 = tpu.dynamic_rotate %1 by %c241_i32 dim 1 : vector<4x256xf32>, i32 -> vector<4x256xf32>
    %195 = vector.broadcast %119 : vector<1x256xf32> to vector<4x256xf32>
    %196 = arith.mulf %194, %195 : vector<4x256xf32>
    %c6 = arith.constant 6 : index
    %c0_87 = arith.constant 0 : index
    %c0_88 = arith.constant 0 : index
    %197 = vector.load %arg2[%c6, %c0_87, %c0_88] : memref<9x32x4xf32, #tpu.memory_space<vmem>>, vector<1x32x4xf32>
    %198 = vector.shape_cast %197 : vector<1x32x4xf32> to vector<32x4xf32>
    %cst_89 = arith.constant dense<0.000000e+00> : vector<32x256xf32>
    %199 = tpu.matmul %198, %196, %cst_89 {dimension_numbers = #tpu.dot_dimension_numbers<[1], [0], [0], [1], [0, 0, 1, 1], [], []>} : vector<32x4xf32>, vector<4x256xf32>, vector<32x256xf32> -> vector<32x256xf32>
    %200 = arith.addf %193, %199 : vector<32x256xf32>
    %c240_i32 = arith.constant 240 : i32
    %201 = tpu.dynamic_rotate %1 by %c240_i32 dim 1 : vector<4x256xf32>, i32 -> vector<4x256xf32>
    %202 = vector.broadcast %137 : vector<1x256xf32> to vector<4x256xf32>
    %203 = arith.mulf %201, %202 : vector<4x256xf32>
    %c7 = arith.constant 7 : index
    %c0_90 = arith.constant 0 : index
    %c0_91 = arith.constant 0 : index
    %204 = vector.load %arg2[%c7, %c0_90, %c0_91] : memref<9x32x4xf32, #tpu.memory_space<vmem>>, vector<1x32x4xf32>
    %205 = vector.shape_cast %204 : vector<1x32x4xf32> to vector<32x4xf32>
    %cst_92 = arith.constant dense<0.000000e+00> : vector<32x256xf32>
    %206 = tpu.matmul %205, %203, %cst_92 {dimension_numbers = #tpu.dot_dimension_numbers<[1], [0], [0], [1], [0, 0, 1, 1], [], []>} : vector<32x4xf32>, vector<4x256xf32>, vector<32x256xf32> -> vector<32x256xf32>
    %207 = arith.addf %200, %206 : vector<32x256xf32>
    %c239_i32 = arith.constant 239 : i32
    %208 = tpu.dynamic_rotate %1 by %c239_i32 dim 1 : vector<4x256xf32>, i32 -> vector<4x256xf32>
    %209 = vector.broadcast %155 : vector<1x256xf32> to vector<4x256xf32>
    %210 = arith.mulf %208, %209 : vector<4x256xf32>
    %c8 = arith.constant 8 : index
    %c0_93 = arith.constant 0 : index
    %c0_94 = arith.constant 0 : index
    %211 = vector.load %arg2[%c8, %c0_93, %c0_94] : memref<9x32x4xf32, #tpu.memory_space<vmem>>, vector<1x32x4xf32>
    %212 = vector.shape_cast %211 : vector<1x32x4xf32> to vector<32x4xf32>
    %cst_95 = arith.constant dense<0.000000e+00> : vector<32x256xf32>
    %213 = tpu.matmul %212, %210, %cst_95 {dimension_numbers = #tpu.dot_dimension_numbers<[1], [0], [0], [1], [0, 0, 1, 1], [], []>} : vector<32x4xf32>, vector<4x256xf32>, vector<32x256xf32> -> vector<32x256xf32>
    %214 = arith.addf %207, %213 : vector<32x256xf32>
    %cst_96 = arith.constant dense<0.000000e+00> : vector<32xf32>
    %215 = vector.multi_reduction <add>, %214, %cst_96 [1] : vector<32x256xf32> to vector<32xf32>
    %216 = vector.shape_cast %215 : vector<32xf32> to vector<32x1xf32>
    %cst_97 = arith.constant 3.906250e-03 : f32
    %217 = vector.broadcast %cst_97 : f32 to vector<32x1xf32>
    %218 = arith.mulf %216, %217 : vector<32x1xf32>
    %219 = arith.mulf %214, %214 : vector<32x256xf32>
    %cst_98 = arith.constant dense<0.000000e+00> : vector<32xf32>
    %220 = vector.multi_reduction <add>, %219, %cst_98 [1] : vector<32x256xf32> to vector<32xf32>
    %221 = vector.shape_cast %220 : vector<32xf32> to vector<32x1xf32>
    %cst_99 = arith.constant 3.906250e-03 : f32
    %222 = vector.broadcast %cst_99 : f32 to vector<32x1xf32>
    %223 = arith.mulf %221, %222 : vector<32x1xf32>
    %224 = arith.mulf %218, %218 : vector<32x1xf32>
    %225 = arith.subf %223, %224 : vector<32x1xf32>
    %226 = vector.broadcast %218 : vector<32x1xf32> to vector<32x256xf32>
    %227 = arith.subf %214, %226 : vector<32x256xf32>
    %cst_100 = arith.constant 9.99999974E-6 : f32
    %228 = vector.broadcast %cst_100 : f32 to vector<32x1xf32>
    %229 = arith.addf %225, %228 : vector<32x1xf32>
    %230 = math.rsqrt %229 : vector<32x1xf32>
    %231 = vector.broadcast %230 : vector<32x1xf32> to vector<32x256xf32>
    %232 = arith.mulf %227, %231 : vector<32x256xf32>
    %cst_101 = arith.constant 5.000000e-01 : f32
    %233 = vector.broadcast %cst_101 : f32 to vector<32x256xf32>
    %234 = arith.mulf %233, %232 : vector<32x256xf32>
    %cst_102 = arith.constant 0.707106769 : f32
    %235 = vector.broadcast %cst_102 : f32 to vector<32x256xf32>
    %236 = arith.mulf %232, %235 : vector<32x256xf32>
    %237 = math.absf %236 : vector<32x256xf32>
    %cst_103 = arith.constant 0.327591091 : f32
    %238 = vector.broadcast %cst_103 : f32 to vector<32x256xf32>
    %239 = arith.mulf %238, %237 : vector<32x256xf32>
    %cst_104 = arith.constant 1.000000e+00 : f32
    %240 = vector.broadcast %cst_104 : f32 to vector<32x256xf32>
    %241 = arith.addf %240, %239 : vector<32x256xf32>
    %cst_105 = arith.constant 1.000000e+00 : f32
    %242 = vector.broadcast %cst_105 : f32 to vector<32x256xf32>
    %243 = arith.divf %242, %241 : vector<32x256xf32>
    %cst_106 = arith.constant 1.06140542 : f32
    %244 = vector.broadcast %cst_106 : f32 to vector<32x256xf32>
    %245 = arith.mulf %244, %243 : vector<32x256xf32>
    %cst_107 = arith.constant 1.45315206 : f32
    %246 = vector.broadcast %cst_107 : f32 to vector<32x256xf32>
    %247 = arith.subf %245, %246 : vector<32x256xf32>
    %248 = arith.mulf %247, %243 : vector<32x256xf32>
    %cst_108 = arith.constant 1.42141378 : f32
    %249 = vector.broadcast %cst_108 : f32 to vector<32x256xf32>
    %250 = arith.addf %248, %249 : vector<32x256xf32>
    %251 = arith.mulf %250, %243 : vector<32x256xf32>
    %cst_109 = arith.constant 0.284496725 : f32
    %252 = vector.broadcast %cst_109 : f32 to vector<32x256xf32>
    %253 = arith.subf %251, %252 : vector<32x256xf32>
    %254 = arith.mulf %253, %243 : vector<32x256xf32>
    %cst_110 = arith.constant 0.254829586 : f32
    %255 = vector.broadcast %cst_110 : f32 to vector<32x256xf32>
    %256 = arith.addf %254, %255 : vector<32x256xf32>
    %257 = arith.mulf %256, %243 : vector<32x256xf32>
    %cst_111 = arith.constant 0.000000e+00 : f32
    %258 = vector.broadcast %cst_111 : f32 to vector<32x256xf32>
    %259 = arith.subf %258, %237 : vector<32x256xf32>
    %260 = arith.mulf %259, %237 : vector<32x256xf32>
    %261 = math.exp %260 : vector<32x256xf32>
    %262 = arith.mulf %257, %261 : vector<32x256xf32>
    %cst_112 = arith.constant 1.000000e+00 : f32
    %263 = vector.broadcast %cst_112 : f32 to vector<32x256xf32>
    %264 = arith.subf %263, %262 : vector<32x256xf32>
    %cst_113 = arith.constant 0.000000e+00 : f32
    %265 = vector.broadcast %cst_113 : f32 to vector<32x256xf32>
    %266 = arith.cmpf oge, %236, %265 : vector<32x256xf32>
    %cst_114 = arith.constant 0.000000e+00 : f32
    %267 = vector.broadcast %cst_114 : f32 to vector<32x256xf32>
    %268 = arith.subf %267, %264 : vector<32x256xf32>
    %269 = arith.select %266, %264, %268 : vector<32x256xi1>, vector<32x256xf32>
    %cst_115 = arith.constant 1.000000e+00 : f32
    %270 = vector.broadcast %cst_115 : f32 to vector<32x256xf32>
    %271 = arith.addf %270, %269 : vector<32x256xf32>
    %272 = arith.mulf %234, %271 : vector<32x256xf32>
    %c17_i32_116 = arith.constant 17 : i32
    %273 = tpu.dynamic_rotate %272 by %c17_i32_116 dim 1 : vector<32x256xf32>, i32 -> vector<32x256xf32>
    %274 = vector.broadcast %29 : vector<1x256xf32> to vector<32x256xf32>
    %275 = arith.mulf %273, %274 : vector<32x256xf32>
    %c0_117 = arith.constant 0 : index
    %c0_118 = arith.constant 0 : index
    %c0_119 = arith.constant 0 : index
    %276 = vector.load %arg3[%c0_117, %c0_118, %c0_119] : memref<9x32x32xf32, #tpu.memory_space<vmem>>, vector<1x32x32xf32>
    %277 = vector.shape_cast %276 : vector<1x32x32xf32> to vector<32x32xf32>
    %cst_120 = arith.constant dense<0.000000e+00> : vector<32x256xf32>
    %278 = tpu.matmul %277, %275, %cst_120 {dimension_numbers = #tpu.dot_dimension_numbers<[1], [0], [0], [1], [0, 0, 1, 1], [], []>} : vector<32x32xf32>, vector<32x256xf32>, vector<32x256xf32> -> vector<32x256xf32>
    %c16_i32_121 = arith.constant 16 : i32
    %279 = tpu.dynamic_rotate %272 by %c16_i32_121 dim 1 : vector<32x256xf32>, i32 -> vector<32x256xf32>
    %280 = vector.broadcast %47 : vector<1x256xf32> to vector<32x256xf32>
    %281 = arith.mulf %279, %280 : vector<32x256xf32>
    %c1_122 = arith.constant 1 : index
    %c0_123 = arith.constant 0 : index
    %c0_124 = arith.constant 0 : index
    %282 = vector.load %arg3[%c1_122, %c0_123, %c0_124] : memref<9x32x32xf32, #tpu.memory_space<vmem>>, vector<1x32x32xf32>
    %283 = vector.shape_cast %282 : vector<1x32x32xf32> to vector<32x32xf32>
    %cst_125 = arith.constant dense<0.000000e+00> : vector<32x256xf32>
    %284 = tpu.matmul %283, %281, %cst_125 {dimension_numbers = #tpu.dot_dimension_numbers<[1], [0], [0], [1], [0, 0, 1, 1], [], []>} : vector<32x32xf32>, vector<32x256xf32>, vector<32x256xf32> -> vector<32x256xf32>
    %285 = arith.addf %278, %284 : vector<32x256xf32>
    %c15_i32_126 = arith.constant 15 : i32
    %286 = tpu.dynamic_rotate %272 by %c15_i32_126 dim 1 : vector<32x256xf32>, i32 -> vector<32x256xf32>
    %287 = vector.broadcast %65 : vector<1x256xf32> to vector<32x256xf32>
    %288 = arith.mulf %286, %287 : vector<32x256xf32>
    %c2_127 = arith.constant 2 : index
    %c0_128 = arith.constant 0 : index
    %c0_129 = arith.constant 0 : index
    %289 = vector.load %arg3[%c2_127, %c0_128, %c0_129] : memref<9x32x32xf32, #tpu.memory_space<vmem>>, vector<1x32x32xf32>
    %290 = vector.shape_cast %289 : vector<1x32x32xf32> to vector<32x32xf32>
    %cst_130 = arith.constant dense<0.000000e+00> : vector<32x256xf32>
    %291 = tpu.matmul %290, %288, %cst_130 {dimension_numbers = #tpu.dot_dimension_numbers<[1], [0], [0], [1], [0, 0, 1, 1], [], []>} : vector<32x32xf32>, vector<32x256xf32>, vector<32x256xf32> -> vector<32x256xf32>
    %292 = arith.addf %285, %291 : vector<32x256xf32>
    %c1_i32_131 = arith.constant 1 : i32
    %293 = tpu.dynamic_rotate %272 by %c1_i32_131 dim 1 : vector<32x256xf32>, i32 -> vector<32x256xf32>
    %294 = vector.broadcast %83 : vector<1x256xf32> to vector<32x256xf32>
    %295 = arith.mulf %293, %294 : vector<32x256xf32>
    %c3_132 = arith.constant 3 : index
    %c0_133 = arith.constant 0 : index
    %c0_134 = arith.constant 0 : index
    %296 = vector.load %arg3[%c3_132, %c0_133, %c0_134] : memref<9x32x32xf32, #tpu.memory_space<vmem>>, vector<1x32x32xf32>
    %297 = vector.shape_cast %296 : vector<1x32x32xf32> to vector<32x32xf32>
    %cst_135 = arith.constant dense<0.000000e+00> : vector<32x256xf32>
    %298 = tpu.matmul %297, %295, %cst_135 {dimension_numbers = #tpu.dot_dimension_numbers<[1], [0], [0], [1], [0, 0, 1, 1], [], []>} : vector<32x32xf32>, vector<32x256xf32>, vector<32x256xf32> -> vector<32x256xf32>
    %299 = arith.addf %292, %298 : vector<32x256xf32>
    %c4_136 = arith.constant 4 : index
    %c0_137 = arith.constant 0 : index
    %c0_138 = arith.constant 0 : index
    %300 = vector.load %arg3[%c4_136, %c0_137, %c0_138] : memref<9x32x32xf32, #tpu.memory_space<vmem>>, vector<1x32x32xf32>
    %301 = vector.shape_cast %300 : vector<1x32x32xf32> to vector<32x32xf32>
    %cst_139 = arith.constant dense<0.000000e+00> : vector<32x256xf32>
    %302 = tpu.matmul %301, %272, %cst_139 {dimension_numbers = #tpu.dot_dimension_numbers<[1], [0], [0], [1], [0, 0, 1, 1], [], []>} : vector<32x32xf32>, vector<32x256xf32>, vector<32x256xf32> -> vector<32x256xf32>
    %303 = arith.addf %299, %302 : vector<32x256xf32>
    %c255_i32_140 = arith.constant 255 : i32
    %304 = tpu.dynamic_rotate %272 by %c255_i32_140 dim 1 : vector<32x256xf32>, i32 -> vector<32x256xf32>
    %305 = vector.broadcast %101 : vector<1x256xf32> to vector<32x256xf32>
    %306 = arith.mulf %304, %305 : vector<32x256xf32>
    %c5_141 = arith.constant 5 : index
    %c0_142 = arith.constant 0 : index
    %c0_143 = arith.constant 0 : index
    %307 = vector.load %arg3[%c5_141, %c0_142, %c0_143] : memref<9x32x32xf32, #tpu.memory_space<vmem>>, vector<1x32x32xf32>
    %308 = vector.shape_cast %307 : vector<1x32x32xf32> to vector<32x32xf32>
    %cst_144 = arith.constant dense<0.000000e+00> : vector<32x256xf32>
    %309 = tpu.matmul %308, %306, %cst_144 {dimension_numbers = #tpu.dot_dimension_numbers<[1], [0], [0], [1], [0, 0, 1, 1], [], []>} : vector<32x32xf32>, vector<32x256xf32>, vector<32x256xf32> -> vector<32x256xf32>
    %310 = arith.addf %303, %309 : vector<32x256xf32>
    %c241_i32_145 = arith.constant 241 : i32
    %311 = tpu.dynamic_rotate %272 by %c241_i32_145 dim 1 : vector<32x256xf32>, i32 -> vector<32x256xf32>
    %312 = vector.broadcast %119 : vector<1x256xf32> to vector<32x256xf32>
    %313 = arith.mulf %311, %312 : vector<32x256xf32>
    %c6_146 = arith.constant 6 : index
    %c0_147 = arith.constant 0 : index
    %c0_148 = arith.constant 0 : index
    %314 = vector.load %arg3[%c6_146, %c0_147, %c0_148] : memref<9x32x32xf32, #tpu.memory_space<vmem>>, vector<1x32x32xf32>
    %315 = vector.shape_cast %314 : vector<1x32x32xf32> to vector<32x32xf32>
    %cst_149 = arith.constant dense<0.000000e+00> : vector<32x256xf32>
    %316 = tpu.matmul %315, %313, %cst_149 {dimension_numbers = #tpu.dot_dimension_numbers<[1], [0], [0], [1], [0, 0, 1, 1], [], []>} : vector<32x32xf32>, vector<32x256xf32>, vector<32x256xf32> -> vector<32x256xf32>
    %317 = arith.addf %310, %316 : vector<32x256xf32>
    %c240_i32_150 = arith.constant 240 : i32
    %318 = tpu.dynamic_rotate %272 by %c240_i32_150 dim 1 : vector<32x256xf32>, i32 -> vector<32x256xf32>
    %319 = vector.broadcast %137 : vector<1x256xf32> to vector<32x256xf32>
    %320 = arith.mulf %318, %319 : vector<32x256xf32>
    %c7_151 = arith.constant 7 : index
    %c0_152 = arith.constant 0 : index
    %c0_153 = arith.constant 0 : index
    %321 = vector.load %arg3[%c7_151, %c0_152, %c0_153] : memref<9x32x32xf32, #tpu.memory_space<vmem>>, vector<1x32x32xf32>
    %322 = vector.shape_cast %321 : vector<1x32x32xf32> to vector<32x32xf32>
    %cst_154 = arith.constant dense<0.000000e+00> : vector<32x256xf32>
    %323 = tpu.matmul %322, %320, %cst_154 {dimension_numbers = #tpu.dot_dimension_numbers<[1], [0], [0], [1], [0, 0, 1, 1], [], []>} : vector<32x32xf32>, vector<32x256xf32>, vector<32x256xf32> -> vector<32x256xf32>
    %324 = arith.addf %317, %323 : vector<32x256xf32>
    %c239_i32_155 = arith.constant 239 : i32
    %325 = tpu.dynamic_rotate %272 by %c239_i32_155 dim 1 : vector<32x256xf32>, i32 -> vector<32x256xf32>
    %326 = vector.broadcast %155 : vector<1x256xf32> to vector<32x256xf32>
    %327 = arith.mulf %325, %326 : vector<32x256xf32>
    %c8_156 = arith.constant 8 : index
    %c0_157 = arith.constant 0 : index
    %c0_158 = arith.constant 0 : index
    %328 = vector.load %arg3[%c8_156, %c0_157, %c0_158] : memref<9x32x32xf32, #tpu.memory_space<vmem>>, vector<1x32x32xf32>
    %329 = vector.shape_cast %328 : vector<1x32x32xf32> to vector<32x32xf32>
    %cst_159 = arith.constant dense<0.000000e+00> : vector<32x256xf32>
    %330 = tpu.matmul %329, %327, %cst_159 {dimension_numbers = #tpu.dot_dimension_numbers<[1], [0], [0], [1], [0, 0, 1, 1], [], []>} : vector<32x32xf32>, vector<32x256xf32>, vector<32x256xf32> -> vector<32x256xf32>
    %331 = arith.addf %324, %330 : vector<32x256xf32>
    %cst_160 = arith.constant dense<0.000000e+00> : vector<32xf32>
    %332 = vector.multi_reduction <add>, %331, %cst_160 [1] : vector<32x256xf32> to vector<32xf32>
    %333 = vector.shape_cast %332 : vector<32xf32> to vector<32x1xf32>
    %cst_161 = arith.constant 3.906250e-03 : f32
    %334 = vector.broadcast %cst_161 : f32 to vector<32x1xf32>
    %335 = arith.mulf %333, %334 : vector<32x1xf32>
    %336 = arith.mulf %331, %331 : vector<32x256xf32>
    %cst_162 = arith.constant dense<0.000000e+00> : vector<32xf32>
    %337 = vector.multi_reduction <add>, %336, %cst_162 [1] : vector<32x256xf32> to vector<32xf32>
    %338 = vector.shape_cast %337 : vector<32xf32> to vector<32x1xf32>
    %cst_163 = arith.constant 3.906250e-03 : f32
    %339 = vector.broadcast %cst_163 : f32 to vector<32x1xf32>
    %340 = arith.mulf %338, %339 : vector<32x1xf32>
    %341 = arith.mulf %335, %335 : vector<32x1xf32>
    %342 = arith.subf %340, %341 : vector<32x1xf32>
    %343 = vector.broadcast %335 : vector<32x1xf32> to vector<32x256xf32>
    %344 = arith.subf %331, %343 : vector<32x256xf32>
    %cst_164 = arith.constant 9.99999974E-6 : f32
    %345 = vector.broadcast %cst_164 : f32 to vector<32x1xf32>
    %346 = arith.addf %342, %345 : vector<32x1xf32>
    %347 = math.rsqrt %346 : vector<32x1xf32>
    %348 = vector.broadcast %347 : vector<32x1xf32> to vector<32x256xf32>
    %349 = arith.mulf %344, %348 : vector<32x256xf32>
    %cst_165 = arith.constant 5.000000e-01 : f32
    %350 = vector.broadcast %cst_165 : f32 to vector<32x256xf32>
    %351 = arith.mulf %350, %349 : vector<32x256xf32>
    %cst_166 = arith.constant 0.707106769 : f32
    %352 = vector.broadcast %cst_166 : f32 to vector<32x256xf32>
    %353 = arith.mulf %349, %352 : vector<32x256xf32>
    %354 = math.absf %353 : vector<32x256xf32>
    %cst_167 = arith.constant 0.327591091 : f32
    %355 = vector.broadcast %cst_167 : f32 to vector<32x256xf32>
    %356 = arith.mulf %355, %354 : vector<32x256xf32>
    %cst_168 = arith.constant 1.000000e+00 : f32
    %357 = vector.broadcast %cst_168 : f32 to vector<32x256xf32>
    %358 = arith.addf %357, %356 : vector<32x256xf32>
    %cst_169 = arith.constant 1.000000e+00 : f32
    %359 = vector.broadcast %cst_169 : f32 to vector<32x256xf32>
    %360 = arith.divf %359, %358 : vector<32x256xf32>
    %cst_170 = arith.constant 1.06140542 : f32
    %361 = vector.broadcast %cst_170 : f32 to vector<32x256xf32>
    %362 = arith.mulf %361, %360 : vector<32x256xf32>
    %cst_171 = arith.constant 1.45315206 : f32
    %363 = vector.broadcast %cst_171 : f32 to vector<32x256xf32>
    %364 = arith.subf %362, %363 : vector<32x256xf32>
    %365 = arith.mulf %364, %360 : vector<32x256xf32>
    %cst_172 = arith.constant 1.42141378 : f32
    %366 = vector.broadcast %cst_172 : f32 to vector<32x256xf32>
    %367 = arith.addf %365, %366 : vector<32x256xf32>
    %368 = arith.mulf %367, %360 : vector<32x256xf32>
    %cst_173 = arith.constant 0.284496725 : f32
    %369 = vector.broadcast %cst_173 : f32 to vector<32x256xf32>
    %370 = arith.subf %368, %369 : vector<32x256xf32>
    %371 = arith.mulf %370, %360 : vector<32x256xf32>
    %cst_174 = arith.constant 0.254829586 : f32
    %372 = vector.broadcast %cst_174 : f32 to vector<32x256xf32>
    %373 = arith.addf %371, %372 : vector<32x256xf32>
    %374 = arith.mulf %373, %360 : vector<32x256xf32>
    %cst_175 = arith.constant 0.000000e+00 : f32
    %375 = vector.broadcast %cst_175 : f32 to vector<32x256xf32>
    %376 = arith.subf %375, %354 : vector<32x256xf32>
    %377 = arith.mulf %376, %354 : vector<32x256xf32>
    %378 = math.exp %377 : vector<32x256xf32>
    %379 = arith.mulf %374, %378 : vector<32x256xf32>
    %cst_176 = arith.constant 1.000000e+00 : f32
    %380 = vector.broadcast %cst_176 : f32 to vector<32x256xf32>
    %381 = arith.subf %380, %379 : vector<32x256xf32>
    %cst_177 = arith.constant 0.000000e+00 : f32
    %382 = vector.broadcast %cst_177 : f32 to vector<32x256xf32>
    %383 = arith.cmpf oge, %353, %382 : vector<32x256xf32>
    %cst_178 = arith.constant 0.000000e+00 : f32
    %384 = vector.broadcast %cst_178 : f32 to vector<32x256xf32>
    %385 = arith.subf %384, %381 : vector<32x256xf32>
    %386 = arith.select %383, %381, %385 : vector<32x256xi1>, vector<32x256xf32>
    %cst_179 = arith.constant 1.000000e+00 : f32
    %387 = vector.broadcast %cst_179 : f32 to vector<32x256xf32>
    %388 = arith.addf %387, %386 : vector<32x256xf32>
    %389 = arith.mulf %351, %388 : vector<32x256xf32>
    %c0_180 = arith.constant 0 : index
    %c0_181 = arith.constant 0 : index
    %390 = vector.load %arg4[%c0_180, %c0_181] : memref<32x4xf32, #tpu.memory_space<vmem>>, vector<32x4xf32>
    %cst_182 = arith.constant dense<0.000000e+00> : vector<32x256xf32>
    %391 = tpu.matmul %390, %1, %cst_182 {dimension_numbers = #tpu.dot_dimension_numbers<[1], [0], [0], [1], [0, 0, 1, 1], [], []>} : vector<32x4xf32>, vector<4x256xf32>, vector<32x256xf32> -> vector<32x256xf32>
    %cst_183 = arith.constant dense<0.000000e+00> : vector<32xf32>
    %392 = vector.multi_reduction <add>, %391, %cst_183 [1] : vector<32x256xf32> to vector<32xf32>
    %393 = vector.shape_cast %392 : vector<32xf32> to vector<32x1xf32>
    %cst_184 = arith.constant 3.906250e-03 : f32
    %394 = vector.broadcast %cst_184 : f32 to vector<32x1xf32>
    %395 = arith.mulf %393, %394 : vector<32x1xf32>
    %396 = arith.mulf %391, %391 : vector<32x256xf32>
    %cst_185 = arith.constant dense<0.000000e+00> : vector<32xf32>
    %397 = vector.multi_reduction <add>, %396, %cst_185 [1] : vector<32x256xf32> to vector<32xf32>
    %398 = vector.shape_cast %397 : vector<32xf32> to vector<32x1xf32>
    %cst_186 = arith.constant 3.906250e-03 : f32
    %399 = vector.broadcast %cst_186 : f32 to vector<32x1xf32>
    %400 = arith.mulf %398, %399 : vector<32x1xf32>
    %401 = arith.mulf %395, %395 : vector<32x1xf32>
    %402 = arith.subf %400, %401 : vector<32x1xf32>
    %403 = vector.broadcast %395 : vector<32x1xf32> to vector<32x256xf32>
    %404 = arith.subf %391, %403 : vector<32x256xf32>
    %cst_187 = arith.constant 9.99999974E-6 : f32
    %405 = vector.broadcast %cst_187 : f32 to vector<32x1xf32>
    %406 = arith.addf %402, %405 : vector<32x1xf32>
    %407 = math.rsqrt %406 : vector<32x1xf32>
    %408 = vector.broadcast %407 : vector<32x1xf32> to vector<32x256xf32>
    %409 = arith.mulf %404, %408 : vector<32x256xf32>
    %cst_188 = arith.constant 5.000000e-01 : f32
    %410 = vector.broadcast %cst_188 : f32 to vector<32x256xf32>
    %411 = arith.mulf %410, %409 : vector<32x256xf32>
    %cst_189 = arith.constant 0.707106769 : f32
    %412 = vector.broadcast %cst_189 : f32 to vector<32x256xf32>
    %413 = arith.mulf %409, %412 : vector<32x256xf32>
    %414 = math.absf %413 : vector<32x256xf32>
    %cst_190 = arith.constant 0.327591091 : f32
    %415 = vector.broadcast %cst_190 : f32 to vector<32x256xf32>
    %416 = arith.mulf %415, %414 : vector<32x256xf32>
    %cst_191 = arith.constant 1.000000e+00 : f32
    %417 = vector.broadcast %cst_191 : f32 to vector<32x256xf32>
    %418 = arith.addf %417, %416 : vector<32x256xf32>
    %cst_192 = arith.constant 1.000000e+00 : f32
    %419 = vector.broadcast %cst_192 : f32 to vector<32x256xf32>
    %420 = arith.divf %419, %418 : vector<32x256xf32>
    %cst_193 = arith.constant 1.06140542 : f32
    %421 = vector.broadcast %cst_193 : f32 to vector<32x256xf32>
    %422 = arith.mulf %421, %420 : vector<32x256xf32>
    %cst_194 = arith.constant 1.45315206 : f32
    %423 = vector.broadcast %cst_194 : f32 to vector<32x256xf32>
    %424 = arith.subf %422, %423 : vector<32x256xf32>
    %425 = arith.mulf %424, %420 : vector<32x256xf32>
    %cst_195 = arith.constant 1.42141378 : f32
    %426 = vector.broadcast %cst_195 : f32 to vector<32x256xf32>
    %427 = arith.addf %425, %426 : vector<32x256xf32>
    %428 = arith.mulf %427, %420 : vector<32x256xf32>
    %cst_196 = arith.constant 0.284496725 : f32
    %429 = vector.broadcast %cst_196 : f32 to vector<32x256xf32>
    %430 = arith.subf %428, %429 : vector<32x256xf32>
    %431 = arith.mulf %430, %420 : vector<32x256xf32>
    %cst_197 = arith.constant 0.254829586 : f32
    %432 = vector.broadcast %cst_197 : f32 to vector<32x256xf32>
    %433 = arith.addf %431, %432 : vector<32x256xf32>
    %434 = arith.mulf %433, %420 : vector<32x256xf32>
    %cst_198 = arith.constant 0.000000e+00 : f32
    %435 = vector.broadcast %cst_198 : f32 to vector<32x256xf32>
    %436 = arith.subf %435, %414 : vector<32x256xf32>
    %437 = arith.mulf %436, %414 : vector<32x256xf32>
    %438 = math.exp %437 : vector<32x256xf32>
    %439 = arith.mulf %434, %438 : vector<32x256xf32>
    %cst_199 = arith.constant 1.000000e+00 : f32
    %440 = vector.broadcast %cst_199 : f32 to vector<32x256xf32>
    %441 = arith.subf %440, %439 : vector<32x256xf32>
    %cst_200 = arith.constant 0.000000e+00 : f32
    %442 = vector.broadcast %cst_200 : f32 to vector<32x256xf32>
    %443 = arith.cmpf oge, %413, %442 : vector<32x256xf32>
    %cst_201 = arith.constant 0.000000e+00 : f32
    %444 = vector.broadcast %cst_201 : f32 to vector<32x256xf32>
    %445 = arith.subf %444, %441 : vector<32x256xf32>
    %446 = arith.select %443, %441, %445 : vector<32x256xi1>, vector<32x256xf32>
    %cst_202 = arith.constant 1.000000e+00 : f32
    %447 = vector.broadcast %cst_202 : f32 to vector<32x256xf32>
    %448 = arith.addf %447, %446 : vector<32x256xf32>
    %449 = arith.mulf %411, %448 : vector<32x256xf32>
    %450 = arith.addf %389, %449 : vector<32x256xf32>
    %c0_203 = arith.constant 0 : index
    %c0_204 = arith.constant 0 : index
    %c0_205 = arith.constant 0 : index
    %451 = vector.load %arg5[%c0_203, %c0_204, %c0_205] : memref<1x32x256xf32, #tpu.memory_space<vmem>>, vector<1x32x256xf32>
    %452 = vector.shape_cast %451 : vector<1x32x256xf32> to vector<32x256xf32>
    %453 = vector.shape_cast %450 : vector<32x256xf32> to vector<1x32x256xf32>
    tpu.vector_store %arg5[%c0_203, %c0_204, %c0_205], %453 {strides = array<i32>} : memref<1x32x256xf32, #tpu.memory_space<vmem>>, vector<1x32x256xf32>,
    return
  }
  func.func @transform_0(%arg0: i32) -> (i32, i32, i32) {
    %c0_i32 = arith.constant 0 : i32
    %c0_i32_0 = arith.constant 0 : i32
    %c0_i32_1 = arith.constant 0 : i32
    return %arg0, %c0_i32, %c0_i32_0 : i32, i32, i32
  }
  func.func @transform_1(%arg0: i32) -> (i32, i32, i32) {
    %c0_i32 = arith.constant 0 : i32
    %c0_i32_0 = arith.constant 0 : i32
    %c0_i32_1 = arith.constant 0 : i32
    %c0_i32_2 = arith.constant 0 : i32
    return %c0_i32, %c0_i32_0, %c0_i32_1 : i32, i32, i32
  }
  func.func @transform_2(%arg0: i32) -> (i32, i32, i32) {
    %c0_i32 = arith.constant 0 : i32
    %c0_i32_0 = arith.constant 0 : i32
    %c0_i32_1 = arith.constant 0 : i32
    %c0_i32_2 = arith.constant 0 : i32
    return %c0_i32, %c0_i32_0, %c0_i32_1 : i32, i32, i32
  }
  func.func @transform_3(%arg0: i32) -> (i32, i32) {
    %c0_i32 = arith.constant 0 : i32
    %c0_i32_0 = arith.constant 0 : i32
    %c0_i32_1 = arith.constant 0 : i32
    return %c0_i32, %c0_i32_0 : i32, i32
  }
  func.func @transform_4(%arg0: i32) -> (i32, i32, i32) {
    %c0_i32 = arith.constant 0 : i32
    %c0_i32_0 = arith.constant 0 : i32
    %c0_i32_1 = arith.constant 0 : i32
    return %arg0, %c0_i32, %c0_i32_0 : i32, i32, i32
  }
}

</mosaic_0001>

<bundles_post_ra>
// kernel: basic_block_forward.1
= control target key start
LH: loop header
LB: loop body
LE: loop exit
PB: predicated region body
PF: predicated region fallthrough
CT: control target
= control target key end

     0   :  { %s4105_s15 = smov 0   ;;  %s6501_s0 = inlined_call_operand.vmem [shape: f32[2,4,256], index: 0, kind: input, shape index: {}]   ;;  %s6502_s1 = inlined_call_operand.vmem [shape: f32[9,32,4], index: 1, kind: input, shape index: {}]   ;;  %s6503_s2 = inlined_call_operand.vmem [shape: f32[9,32,32], index: 2, kind: input, shape index: {}]   ;;  %s6504_s3 = inlined_call_operand.vmem [shape: f32[32,4], index: 3, kind: input, shape index: {}]   ;;  %s6505_s4 = inlined_call_operand.vmem [shape: f32[2,32,256], index: 4, kind: output, shape index: {}]  }
   0x1 LB: > { %s3627_s16 = sadd.s32 4294967295, %s4069_s15   ;;  %p3631_p0 = scmp.ge.s32.totalorder %s4069_s15, 1  ;;  %s4069_s15 = sphi %s4105_s15, %s14_s15  }
   0x2   : > { %p162_p1 = scmp.lt.s32.totalorder %s4069_s15, 3 }
   0x4   : > { %p163_p2 = pnand %p3631_p0, %p162_p1 }
   0x6   : > { %166 = sbr.rel (%p163_p2) target bundleno = 1422 (0x58e), region = 36 }
   0xb   : > { %p188_p3 = scmp.lt.s32.totalorder %s3627_s16, 1  ;;  %s4071_s21 = smov 17   ;;  %v199_v17 = vlaneseq  ;;  %v4079_v51 = vmov 0.0   ;;  %v322_v43 = vld [vmem:[%s6502_s1 + $0x18] sm:$0xff] }
   0xc   : > { %s4072_s22 = smov 16   ;;  %s4073_s23 = smov 15  }
   0xd   : > { %s6710_s16 = smov (!%p188_p3, %s3627_s16), 1  ;;  %s4074_s24 = smov 1   ;;  %v4148_v18 = vand.u32 127, %v199_v17 }
   0xe   : > { %s3922_s17 = sshll.u32 %s6710_s16, 3  ;;  %s4075_s25 = smov 127  }
   0xf   : > { %s192_s20 = scalar_lea.vmem %s6501_s0, %s3922_s17  ;;  %s4076_s26 = smov 113   ;;  %6553 = vst [vmem:[#allocation2_spill] sm:$0xff] %v4148_v18  ;;  %v201_v19 = vadd.s32 128, %v4148_v18  ;;  %v202_v21 = vcvt.s32.f32 %v4148_v18 }
  0x10   : > { %v4119_v0 = vld [vmem:[%s192_s20] sm:$0xff]  ;;  %s4077_s27 = smov 112   ;;  %s4078_s28 = smov 111  }
  0x11   : > { %305 = vst [vmem:[#allocation1] ss:$2 sm:$0xff] %v4119_v0  ;;  %v203_v22 = vcvt.s32.f32 %v201_v19  ;;  %v204_v23 = vadd.f32 0.5, %v202_v21 }
  0x13   : > { %v205_v24 = vadd.f32 0.5, %v203_v22  ;;  %v206_v25 = vmul.f32 0.0625, %v204_v23  ;;  %v3660_v23 = vld [vmem:[%s6502_s1 + $0x40] sm:$0xff] }
  0x15   : > { %v207_v26 = vmul.f32 0.0625, %v205_v24  ;;  %v4153_v27 = vfloor.f32 %v206_v25  ;;  %v320_v24 = vld [vmem:[%s6502_s1 + $0x8] sm:$0xff] }
  0x16   : > { %v3661_v25 = vld [vmem:[%s6502_s1 + $0x48] sm:$0xff] }
  0x17   : > { %v4155_v28 = vfloor.f32 %v207_v26  ;;  %v210_v29 = vmul.f32 16.0, %v4153_v27  ;;  %v214_v30 = vadd.f32 -1.0, %v4153_v27  ;;  %v321_v26 = vld [vmem:[%s6502_s1 + $0x10] sm:$0xff]  ;;  %v278_v46 = vadd.f32 1.0, %v4153_v27 }
  0x18   : > { %v306_v1 = vld.sshfl [vmem:[#allocation1] sm:$0xff pattern:$0x75316420]  ;;  %v307_v2 = vld.sshfl [vmem:[#allocation1 + $0x8] sm:$0xff pattern:$0x75316420] }
  0x19   : > { %323 = vst [vmem:[#allocation1] ss:$2 sm:$0xff] %v4119_v0  ;;  %310 = vrot.lane.b32.xlu1 %v306_v1, %s4071_s21  ;;  %v211_v31 = vmul.f32 16.0, %v4155_v28  ;;  %v215_v32 = vadd.f32 -1.0, %v4155_v28  ;;  %v4161_v33 = vsub.f32 %v202_v21, %v210_v29  ;;  %vm218_vm0 = vcmp.ge.f32.partialorder %v214_v30, 0.0  ;;  %v3662_v29 = vld [vmem:[%s6502_s1 + $0x50] sm:$0xff] }
  0x1a   : > { %vm220_vm1 = vcmp.le.f32.partialorder %v214_v30, 15.0  ;;  %v279_v47 = vadd.f32 1.0, %v4155_v28 }
  0x1b   : > { %v4163_v34 = vsub.f32 %v203_v22, %v211_v31  ;;  %vm219_vm2 = vcmp.ge.f32.partialorder %v215_v32, 0.0  ;;  %vm221_vm3 = vcmp.le.f32.partialorder %v215_v32, 15.0  ;;  %vm4165_vm4 = vmand %vm218_vm0, %vm220_vm1  ;;  %vm6509_vm5 = vcmp.ge.f32.partialorder %v4161_v33, 0.0  ;;  %v319_v22 = vld [vmem:[%s6502_s1] sm:$0xff] }
  0x1c   : > { %v4171_v36 = vadd.f32 -1.0, %v4161_v33  ;;  %vm4173_vm6 = vmand %vm219_vm2, %vm221_vm3  ;;  %vm6506_vm9 = vcmp.le.f32.partialorder %v4161_v33, 15.0  ;;  %v4188_v41 = vadd.f32 1.0, %v4161_v33 }
  0x1d   : > { %vm6507_vm7 = vcmp.ge.f32.partialorder %v4163_v34, 0.0  ;;  %v4179_v38 = vadd.f32 -1.0, %v4163_v34  ;;  %vm238_vm8 = vmand %vm4165_vm4, %vm6509_vm5  ;;  %vm6508_vm12 = vcmp.le.f32.partialorder %v4163_v34, 15.0  ;;  %v4196_v42 = vadd.f32 1.0, %v4163_v34 }
  0x1e   : > { %vm6512_vm10 = vcmp.ge.f32.partialorder %v4171_v36, 0.0  ;;  %vm239_vm11 = vmand %vm4173_vm6, %vm6507_vm7  ;;  %vm6511_vm0 = vcmp.le.f32.partialorder %v4171_v36, 15.0  ;;  %vm6513_vm2 = vcmp.ge.f32.partialorder %v4188_v41, 0.0 }
  0x1f   : > { %vm4200_vm13 = vmand %vm238_vm8, %vm6506_vm9  ;;  %vm6510_vm14 = vcmp.ge.f32.partialorder %v4179_v38, 0.0  ;;  %vm249_vm8 = vcmp.ge.f32.partialorder %v4196_v42, 0.0  ;;  %vm229_vm9 = vcmp.le.f32.partialorder %v4179_v38, 15.0 }
  0x20   : > { %v324_v3 = vld.sshfl [vmem:[#allocation1] sm:$0xff pattern:$0x75316420]  ;;  %v325_v4 = vld.sshfl [vmem:[#allocation1 + $0x8] sm:$0xff pattern:$0x75316420]  ;;  %vm226_vm15 = vmand %vm4165_vm4, %vm6512_vm10 }
  0x21   : > { %328 = vrot.lane.b32.xlu0 %v324_v3, %s4072_s22  ;;  %496 = vst [vmem:[#allocation1] ss:$2 sm:$0xff] %v4119_v0  ;;  %312 = vrot.lane.b32.xlu1 %v307_v2, %s4071_s21  ;;  %vm4214_vm1 = vmand %vm239_vm11, %vm6508_vm12  ;;  %vm252_vm12 = vcmp.le.f32.partialorder %v4188_v41, 15.0  ;;  %vm332_vm10 = vcmp.lt.s32.totalorder %v4148_v18, 16  ;;  %v4255_v52 = vsel %vm4200_vm13, 1.0, %v4079_v51  ;;  %v3638_v3 = vld [vmem:[%s6502_s1 + $0x30] sm:$0xff] }
  0x22   : > { %vm227_vm3 = vmand %vm4173_vm6, %vm6510_vm14  ;;  %vm253_vm14 = vcmp.le.f32.partialorder %v4196_v42, 15.0  ;;  %6566 = vst [vmem:[#allocation3_spill] sm:$0xff] %v4255_v52  ;;  %v4260_v53 = vsel %vm4214_vm1, 1.0, %v4079_v51  ;;  %vm261_vm13 = vcmp.ge.f32.partialorder %v4155_v28, 0.0  ;;  %vm262_vm1 = vcmp.le.f32.partialorder %v4153_v27, 15.0 }
  0x23   : > { %vm4227_vm7 = vmand %vm226_vm15, %vm6511_vm0  ;;  %vm6515_vm0 = vcmp.lt.s32.totalorder %v4148_v18, 17  ;;  %6567 = vst [vmem:[#allocation4_spill] sm:$0xff] %v4260_v53 }
  0x24   : > { %vm250_vm11 = vmand %vm4165_vm4, %vm6513_vm2  ;;  %vm6514_vm2 = vcmp.lt.s32.totalorder %v4148_v18, 15  ;;  %v4267_v55 = vsel %vm4227_vm7, 1.0, %v4079_v51  ;;  %vm260_vm7 = vcmp.ge.f32.partialorder %v4153_v27, 0.0 }
  0x25   : > { %vm251_vm5 = vmand %vm4173_vm6, %vm249_vm8  ;;  %vm355_vm6 = vcmask 1043456   ;;  %6568 = vst [vmem:[#allocation5_spill] sm:$0xff] %v4267_v55 }
  0x26   : > { %vm231_vm15 = vmand %vm227_vm3, %vm229_vm9 }
  0x27   : > { %vm4247_vm4 = vmand %vm250_vm11, %vm252_vm12  ;;  %v4270_v56 = vsel %vm231_vm15, 1.0, %v4079_v51  ;;  %vm263_vm11 = vcmp.le.f32.partialorder %v4155_v28, 15.0  ;;  %v3674_v28 = vld [vmem:[%s6502_s1 + $0x60] sm:$0xff] }
  0x28   : > { %v497_v5 = vld.sshfl [vmem:[#allocation1] sm:$0xff pattern:$0x75316420]  ;;  %v498_v6 = vld.sshfl [vmem:[#allocation1 + $0x8] sm:$0xff pattern:$0x75316420]  ;;  %vm255_vm3 = vmand %vm251_vm5, %vm253_vm14 }
  0x29   : > { %330 = vrot.lane.b32.xlu0 %v325_v4, %s4072_s22  ;;  %501 = vrot.lane.b32.xlu2 %v497_v5, %s4073_s23  ;;  %599 = vst [vmem:[#allocation1] ss:$2 sm:$0xff] %v4119_v0  ;;  %v4289_v1 = vsel %vm4247_vm4, 1.0, %v4079_v51  ;;  %v4292_v2 = vsel %vm255_vm3, 1.0, %v4079_v51  ;;  %vm342_vm5 = vcmask 31744   ;;  %vm4316_vm15 = vmand %vm260_vm7, %vm262_vm1  ;;  %vm6517_vm4 = vcmp.lt.s32.totalorder %v4148_v18, 1 }
  0x2a   : > { %6569 = vst [vmem:[#allocation6_spill] sm:$0xff] %v4270_v56  ;;  %vm4323_vm3 = vmand %vm261_vm13, %vm263_vm11  ;;  %vm6576_vm7 = vcmp.ge.f32.partialorder %v4171_v36, 0.0  ;;  %vm6578_vm13 = vcmp.le.f32.partialorder %v4171_v36, 15.0 }
  0x2b   : > { %6570 = vst [vmem:[#allocation7_spill] sm:$0xff] %v4289_v1  ;;  %vm266_vm1 = vmand %vm4316_vm15, %vm6576_vm7 }
  0x2c   : > { %6571 = vst [vmem:[#allocation8_spill] sm:$0xff] %v4292_v2  ;;  %vm268_vm11 = vmand %vm266_vm1, %vm6578_vm13  ;;  %vm6516_vm1 = vcmp.lt.s32.totalorder %v4148_v18, 127 }
  0x2d   : > { %v4353_v19 = vsel %vm268_vm11, 1.0, %v4079_v51  ;;  %vm273_vm13 = vmand %vm4323_vm3, %vm249_vm8 }
  0x2e   : > { %6579 = vst [vmem:[#allocation9_spill] sm:$0xff] %v4353_v19 }
  0x30   : > { %v601_v7 = vld.sshfl [vmem:[#allocation1 + $0x8] sm:$0xff pattern:$0x75316420]  ;;  %v600_v8 = vld.sshfl [vmem:[#allocation1] sm:$0xff pattern:$0x75316420] }
  0x31   : > { %503 = vrot.lane.b32.xlu2 %v498_v6, %s4073_s23  ;;  %606 = vrot.lane.b32.xlu1 %v601_v7, %s4074_s24  ;;  %707 = vst [vmem:[#allocation1] ss:$2 sm:$0xff] %v4119_v0  ;;  %v3636_v6 = vld [vmem:[%s6502_s1 + $0x20] sm:$0xff] }
  0x32   : > { %604 = vrot.lane.b32.xlu0 %v600_v8, %s4074_s24 }
  0x38   : > { %v4134_v9 = vld.sshfl [vmem:[#allocation1] sm:$0xff pattern:$0x75316420]  ;;  %v4136_v10 = vld.sshfl [vmem:[#allocation1 + $0x8] sm:$0xff pattern:$0x75316420] }
  0x39   : > { %792 = vst [vmem:[#allocation1] ss:$2 sm:$0xff] %v4119_v0 }
  0x40   : > { %v794_v11 = vld.sshfl [vmem:[#allocation1 + $0x8] sm:$0xff pattern:$0x75316420]  ;;  %v793_v12 = vld.sshfl [vmem:[#allocation1] sm:$0xff pattern:$0x75316420] }
  0x41   : > { %799 = vrot.lane.b32.xlu0 %v794_v11, %s4075_s25  ;;  %895 = vst [vmem:[#allocation1] ss:$2 sm:$0xff] %v4119_v0  ;;  %797 = vrot.lane.b32.xlu2 %v793_v12, %s4075_s25 }
  0x48   : > { %v896_v13 = vld.sshfl [vmem:[#allocation1] sm:$0xff pattern:$0x75316420]  ;;  %v897_v14 = vld.sshfl [vmem:[#allocation1 + $0x8] sm:$0xff pattern:$0x75316420] }
  0x49   : > { %900 = vrot.lane.b32.xlu1 %v896_v13, %s4076_s26  ;;  %902 = vrot.lane.b32.xlu2 %v897_v14, %s4076_s26  ;;  %998 = vst [vmem:[#allocation1] ss:$2 sm:$0xff] %v4119_v0 }
  0x50   : > { %v1000_v15 = vld.sshfl [vmem:[#allocation1 + $0x8] sm:$0xff pattern:$0x75316420]  ;;  %v999_v16 = vld.sshfl [vmem:[#allocation1] sm:$0xff pattern:$0x75316420] }
  0x51   : > { %1005 = vrot.lane.b32.xlu1 %v1000_v15, %s4077_s27  ;;  %1003 = vrot.lane.b32.xlu0 %v999_v16, %s4077_s27  ;;  %1101 = vst [vmem:[#allocation1] ss:$2 sm:$0xff] %v4119_v0  ;;  %v3639_v16 = vld [vmem:[%s6502_s1 + $0x38] sm:$0xff] }
  0x58   : > { %v1103_v20 = vld.sshfl [vmem:[#allocation1 + $0x8] sm:$0xff pattern:$0x75316420]  ;;  %v1102_v44 = vld.sshfl [vmem:[#allocation1] sm:$0xff pattern:$0x75316420] }
  0x59   : > { %1108 = vrot.lane.b32.xlu0 %v1103_v20, %s4078_s28  ;;  %1106 = vrot.lane.b32.xlu2 %v1102_v44, %s4078_s28  ;;  %3051 = vst [vmem:[#allocation1] ss:$2 sm:$0xff] %v4119_v0 }
  0x83   : > { %v502_v40 = vpop.permute.xlu2 %501 }
  0x8b   : > { %v311_v39 = vpop.permute.xlu1 %310  ;;  %v504_v50 = vpop.permute.xlu2 %503 }
  0x8c   : > { %v506_v61 = vsel %vm6514_vm2, %v502_v40, %v504_v50  ;;  %v507_v62 = vsel %vm6514_vm2, %v504_v50, %v502_v40  ;;  %vm6577_vm2 = vcmp.ge.f32.partialorder %v4179_v38, 0.0 }
  0x8d   : > { %v508_v7 = vmul.f32 %v507_v62, %v4289_v1  ;;  %v509_v8 = vmul.f32 %v506_v61, %v4292_v2  ;;  %v3689_v62 = vld [vmem:[%s6502_s1 + $0x88] sm:$0xff] }
  0x93   : > { %v329_v45 = vpop.permute.xlu0 %328  ;;  %v313_v48 = vpop.permute.xlu1 %312 }
  0x94   : > { %v315_v57 = vsel %vm6515_vm0, %v311_v39, %v313_v48  ;;  %v316_v58 = vsel %vm6515_vm0, %v313_v48, %v311_v39  ;;  %vm267_vm0 = vmand %vm4323_vm3, %vm6577_vm2  ;;  %vm280_vm3 = vcmp.ge.f32.partialorder %v278_v46, 0.0 }
  0x95   : > { %v317_v4 = vmul.f32 %v316_v58, %v4267_v55  ;;  %v318_v5 = vmul.f32 %v315_v57, %v4270_v56  ;;  %vm269_vm2 = vmand %vm267_vm0, %vm229_vm9  ;;  %vm6581_vm0 = vcmp.ge.f32.partialorder %v4188_v41, 0.0  ;;  %v3688_v57 = vld [vmem:[%s6502_s1 + $0x80] sm:$0xff] }
  0x96   : > { %vm272_vm7 = vmand %vm4316_vm15, %vm6581_vm0  ;;  %vm282_vm0 = vcmp.le.f32.partialorder %v278_v46, 15.0 }
  0x97   : > { %vm274_vm11 = vmand %vm272_vm7, %vm252_vm12  ;;  %vm283_vm7 = vcmp.le.f32.partialorder %v279_v47, 15.0 }
  0x98   : > { %vm275_vm15 = vmand %vm273_vm13, %vm253_vm14  ;;  %v4417_v37 = vsel %vm274_vm11, 1.0, %v4079_v51  ;;  %vm6518_vm11 = vcmp.lt.s32.totalorder %v4148_v18, 113 }
  0x99   : > { %6582 = vst [vmem:[#allocation11_spill] sm:$0xff] %v4417_v37  ;;  %v4420_v39 = vsel %vm275_vm15, 1.0, %v4079_v51  ;;  %vm4438_vm13 = vmand %vm280_vm3, %vm282_vm0  ;;  %vm6589_vm3 = vcmp.ge.f32.partialorder %v4179_v38, 0.0  ;;  %v3675_v38 = vld [vmem:[%s6502_s1 + $0x68] sm:$0xff] }
  0x9a   : > { %6583 = vst [vmem:[#allocation12_spill] sm:$0xff] %v4420_v39 }
  0x9b   : > { %v331_v54 = vpop.permute.xlu0 %330  ;;  %v798_v31 = vpop.permute.xlu2 %797 }
  0x9c   : > { %v333_v59 = vsel %vm332_vm10, %v329_v45, %v331_v54  ;;  %v334_v60 = vsel %vm332_vm10, %v331_v54, %v329_v45  ;;  %v3663_v45 = vld [vmem:[%s6502_s1 + $0x58] sm:$0xff] }
  0x9d   : > { %v335_v63 = vmul.f32 %v334_v60, %v4255_v52  ;;  %v336_v0 = vmul.f32 %v333_v59, %v4260_v53 }
  0x9f   : > { %3640 = vmatpush.msk.msra.mxu0 %vm355_vm6, %v335_v63  ;;  %3924 = vmatpush.msk.msra.mxu2 %vm355_vm6, %v335_v63  ;;  %v3676_v63 = vld [vmem:[%s6502_s1 + $0x70] sm:$0xff] }
  0xa0   : > { %3645 = vmatpush.msk.msra.mxu1 %vm355_vm6, %v336_v0  ;;  %3925 = vmatpush.msk.msra.mxu3 %vm355_vm6, %v336_v0  ;;  %v3690_v0 = vld [vmem:[%s6502_s1 + $0x90] sm:$0xff] }
  0xa1   : > { %3643 = vmatmul.msk.f32.vlgmr.msra.gmra.mxu2 %vm342_vm5, %v3638_v3  ;;  %3648 = vmatmul.msk.f32.vlgmr.msra.gmra.mxu3 %vm342_vm5, %v3638_v3 }
  0xa2   : > { %3650 = vmatpush.msk.msrb.mxu2 %vm355_vm6, %v317_v4  ;;  %3655 = vmatpush.msk.msrb.mxu3 %vm355_vm6, %v318_v5 }
  0xa3   : > { %3641 = vmatmul.msk.f32.vlgmr.msra.gmra.mxu0 %vm342_vm5, %v3636_v6  ;;  %3646 = vmatmul.msk.f32.vlgmr.msra.gmra.mxu1 %vm342_vm5, %v3636_v6  ;;  %v607_v12 = vpop.permute.xlu1 %606  ;;  %v903_v48 = vpop.permute.xlu2 %902 }
  0xa4   : > { %3664 = vmatpush.msk.msrb.mxu0 %vm355_vm6, %v508_v7  ;;  %3669 = vmatpush.msk.msrb.mxu1 %vm355_vm6, %v509_v8  ;;  %v605_v14 = vpop.permute.xlu0 %604 }
  0xa5   : > { %v610_v15 = vsel %vm6517_vm4, %v607_v12, %v605_v14  ;;  %v609_v17 = vsel %vm6517_vm4, %v605_v14, %v607_v12  ;;  %v3677_v12 = vld [vmem:[%s6502_s1 + $0x78] sm:$0xff] }
  0xa6   : > { %3692 = vmatpush.msk.msra.mxu0 %vm355_vm6, %v4134_v9  ;;  %3697 = vmatpush.msk.msra.mxu1 %vm355_vm6, %v4136_v10  ;;  %v3637_v9 = vld [vmem:[%s6502_s1 + $0x28] sm:$0xff]  ;;  %v4359_v10 = vsel %vm269_vm2, 1.0, %v4079_v51  ;;  %v611_v20 = vmul.f32 %v610_v15, %v4353_v19  ;;  %vm281_vm2 = vcmp.ge.f32.partialorder %v279_v47, 0.0  ;;  %v3733_v47 = vld [vmem:[%s6502_s1 + $0xf8] sm:$0xff] }
  0xa7   : > { %6580 = vst [vmem:[#allocation10_spill] sm:$0xff] %v4359_v10  ;;  %v612_v21 = vmul.f32 %v609_v17, %v4359_v10  ;;  %vm4443_vm15 = vmand %vm281_vm2, %vm283_vm7  ;;  %vm6590_vm2 = vcmp.le.f32.partialorder %v4171_v36, 15.0 }
  0xa8   : > { %3678 = vmatpush.msk.msra.mxu2 %vm355_vm6, %v611_v20  ;;  %vm287_vm0 = vmand %vm4443_vm15, %vm6589_vm3  ;;  %vm1007_vm3 = vcmp.lt.s32.totalorder %v4148_v18, 112 }
  0xa9   : > { %3644 = vmatmul.msk.f32.gmra.mxu2 %vm342_vm5, %v3639_v16  ;;  %3649 = vmatmul.msk.f32.gmra.mxu3 %vm342_vm5, %v3639_v16 }
  0xaa   : > { %3683 = vmatpush.msk.msra.mxu3 %vm355_vm6, %v612_v21  ;;  %v3716_v21 = vld [vmem:[%s6502_s1 + $0xc0] sm:$0xff] }
  0xab   : > { %3642 = vmatmul.msk.f32.gmra.mxu0 %vm342_vm5, %v3637_v9  ;;  %3647 = vmatmul.msk.f32.gmra.mxu1 %vm342_vm5, %v3637_v9 }
  0xb1   : > { %3651 = vmatmul.msk.f32.vlgmr.msrb.gmra.mxu2 %vm342_vm5, %v319_v22  ;;  %3656 = vmatmul.msk.f32.vlgmr.msrb.gmra.mxu3 %vm342_vm5, %v319_v22  ;;  %v3717_v22 = vld [vmem:[%s6502_s1 + $0xc8] sm:$0xff] }
  0xb3   : > { %3665 = vmatmul.msk.f32.vlgmr.msrb.gmra.mxu0 %vm342_vm5, %v3660_v23  ;;  %3670 = vmatmul.msk.f32.vlgmr.msrb.gmra.mxu1 %vm342_vm5, %v3660_v23  ;;  %v800_v30 = vpop.permute.xlu0 %799  ;;  %v1107_v15 = vpop.permute.xlu2 %1106  ;;  %v3704_v23 = vld [vmem:[%s6502_s1 + $0xb0] sm:$0xff] }
  0xb4   : > { %v802_v32 = vsel %vm6516_vm1, %v798_v31, %v800_v30  ;;  %v803_v35 = vsel %vm6516_vm1, %v800_v30, %v798_v31  ;;  %vm6588_vm1 = vcmp.ge.f32.partialorder %v4171_v36, 0.0  ;;  %v3744_v30 = vld [vmem:[%s6502_s1 + $0x100] sm:$0xff]  ;;  %v3731_v31 = vld [vmem:[%s6502_s1 + $0xe8] sm:$0xff] }
  0xb5   : > { %v804_v40 = vmul.f32 %v802_v32, %v4417_v37  ;;  %v805_v44 = vmul.f32 %v803_v35, %v4420_v39  ;;  %vm286_vm4 = vmand %vm4438_vm13, %vm6588_vm1  ;;  %v3745_v32 = vld [vmem:[%s6502_s1 + $0x108] sm:$0xff]  ;;  %v3732_v35 = vld [vmem:[%s6502_s1 + $0xf0] sm:$0xff] }
  0xb6   : > { %vm288_vm7 = vmand %vm286_vm4, %vm6590_vm2 }
  0xb7   : > { %3706 = vmatpush.msk.msrb.mxu2 %vm355_vm6, %v804_v40  ;;  %3711 = vmatpush.msk.msrb.mxu3 %vm355_vm6, %v805_v44  ;;  %vm289_vm1 = vmand %vm287_vm0, %vm229_vm9  ;;  %v4472_v59 = vsel %vm288_vm7, 1.0, %v4079_v51  ;;  %vm6593_vm9 = vcmp.ge.f32.partialorder %v4161_v33, 0.0  ;;  %vm6594_vm0 = vcmp.ge.f32.partialorder %v4163_v34, 0.0  ;;  %vm6595_vm7 = vcmp.le.f32.partialorder %v4161_v33, 15.0  ;;  %v3746_v44 = vld [vmem:[%s6502_s1 + $0x110] sm:$0xff] }
  0xb8   : > { %6591 = vst [vmem:[#allocation13_spill] sm:$0xff] %v4472_v59  ;;  %v4475_v60 = vsel %vm289_vm1, 1.0, %v4079_v51  ;;  %vm292_vm4 = vmand %vm4438_vm13, %vm6593_vm9  ;;  %vm6596_vm9 = vcmp.le.f32.partialorder %v4163_v34, 15.0  ;;  %v3691_v34 = vld [vmem:[%s6502_s1 + $0x98] sm:$0xff] }
  0xb9   : > { %3652 = vmatmul.msk.f32.gmra.mxu2 %vm342_vm5, %v320_v24  ;;  %3657 = vmatmul.msk.f32.gmra.mxu3 %vm342_vm5, %v320_v24  ;;  %6592 = vst [vmem:[#allocation14_spill] sm:$0xff] %v4475_v60  ;;  %vm293_vm2 = vmand %vm4443_vm15, %vm6594_vm0  ;;  %v3718_v24 = vld [vmem:[%s6502_s1 + $0xd0] sm:$0xff] }
  0xba   : > { %vm294_vm1 = vmand %vm292_vm4, %vm6595_vm7 }
  0xbb   : > { %3666 = vmatmul.msk.f32.gmra.mxu0 %vm342_vm5, %v3661_v25  ;;  %3671 = vmatmul.msk.f32.gmra.mxu1 %vm342_vm5, %v3661_v25  ;;  %v901_v50 = vpop.permute.xlu1 %900  ;;  %v4521_v7 = vsel %vm294_vm1, 1.0, %v4079_v51  ;;  %vm299_vm0 = vmand %vm4443_vm15, %vm249_vm8  ;;  %v3705_v25 = vld [vmem:[%s6502_s1 + $0xb8] sm:$0xff] }
  0xbc   : > { %v905_v54 = vsel %vm6518_vm11, %v901_v50, %v903_v48  ;;  %v906_v58 = vsel %vm6518_vm11, %v903_v48, %v901_v50  ;;  %vm295_vm11 = vmand %vm293_vm2, %vm6596_vm9  ;;  %6597 = vst [vmem:[#allocation15_spill] sm:$0xff] %v4521_v7  ;;  %vm1110_vm2 = vcmp.lt.s32.totalorder %v4148_v18, 111  ;;  %v3747_v50 = vld [vmem:[%s6502_s1 + $0x118] sm:$0xff] }
  0xbd   : > { %v907_v61 = vmul.f32 %v905_v54, %v4472_v59  ;;  %v908_v36 = vmul.f32 %v906_v58, %v4475_v60  ;;  %v4524_v8 = vsel %vm295_vm11, 1.0, %v4079_v51  ;;  %vm6599_vm11 = vcmp.ge.f32.partialorder %v4188_v41, 0.0  ;;  %vm301_vm1 = vmand %vm299_vm0, %vm253_vm14  ;;  %v3702_v41 = vld [vmem:[%s6502_s1 + $0xa0] sm:$0xff] }
  0xbe   : > { %6598 = vst [vmem:[#allocation16_spill] sm:$0xff] %v4524_v8  ;;  %vm298_vm4 = vmand %vm4438_vm13, %vm6599_vm11  ;;  %v4557_v16 = vsel %vm301_vm1, 1.0, %v4079_v51 }
  0xbf   : > { %3720 = vmatpush.msk.msrb.mxu0 %vm355_vm6, %v907_v61  ;;  %3725 = vmatpush.msk.msrb.mxu1 %vm355_vm6, %v908_v36  ;;  %vm300_vm7 = vmand %vm298_vm4, %vm252_vm12  ;;  %6601 = vst [vmem:[#allocation18_spill] sm:$0xff] %v4557_v16 }
  0xc0   : > { %v4554_v14 = vsel %vm300_vm7, 1.0, %v4079_v51  ;;  %v3703_v51 = vld [vmem:[%s6502_s1 + $0xa8] sm:$0xff] }
  0xc1   : > { %3653 = vmatmul.msk.f32.gmra.mxu2 %vm342_vm5, %v321_v26  ;;  %3658 = vmatmul.msk.f32.gmra.mxu3 %vm342_vm5, %v321_v26  ;;  %6600 = vst [vmem:[#allocation17_spill] sm:$0xff] %v4554_v14  ;;  %v3719_v26 = vld [vmem:[%s6502_s1 + $0xd8] sm:$0xff] }
  0xc3   : > { %3667 = vmatmul.msk.f32.gmra.mxu0 %vm342_vm5, %v3662_v29  ;;  %3672 = vmatmul.msk.f32.gmra.mxu1 %vm342_vm5, %v3662_v29  ;;  %v1006_v3 = vpop.permute.xlu1 %1005  ;;  %v1004_v4 = vpop.permute.xlu0 %1003  ;;  %v3730_v29 = vld [vmem:[%s6502_s1 + $0xe0] sm:$0xff] }
  0xc4   : > { %v1008_v5 = vsel %vm1007_vm3, %v1004_v4, %v1006_v3  ;;  %v1009_v6 = vsel %vm1007_vm3, %v1006_v3, %v1004_v4 }
  0xc5   : > { %v1010_v11 = vmul.f32 %v1008_v5, %v4521_v7  ;;  %v1011_v33 = vmul.f32 %v1009_v6, %v4524_v8 }
  0xc9   : > { %3654 = vmatmul.msk.f32.gmra.mxu2 %vm342_vm5, %v322_v43  ;;  %3659 = vmatmul.msk.f32.gmra.mxu3 %vm342_vm5, %v322_v43 }
  0xcb   : > { %3668 = vmatmul.msk.f32.gmra.mxu0 %vm342_vm5, %v3663_v45  ;;  %3673 = vmatmul.msk.f32.gmra.mxu1 %vm342_vm5, %v3663_v45  ;;  %v1109_v13 = vpop.permute.xlu0 %1108 }
  0xcc   : > { %v1111_v17 = vsel %vm1110_vm2, %v1107_v15, %v1109_v13  ;;  %v1112_v9 = vsel %vm1110_vm2, %v1109_v13, %v1107_v15 }
  0xcd   : > { %v1113_v42 = vmul.f32 %v1111_v17, %v4554_v14  ;;  %v1114_v20 = vmul.f32 %v1112_v9, %v4557_v16 }
  0xd1   : > { %3679 = vmatmul.msk.f32.vlgmr.msra.gmra.mxu2 %vm342_vm5, %v3674_v28  ;;  %3684 = vmatmul.msk.f32.vlgmr.msra.gmra.mxu3 %vm342_vm5, %v3674_v28 }
  0xd2   : > { %3734 = vmatpush.msk.msra.mxu2 %vm355_vm6, %v1010_v11  ;;  %3739 = vmatpush.msk.msra.mxu3 %vm355_vm6, %v1011_v33 }
  0xd3   : > { %3693 = vmatmul.msk.f32.vlgmr.msra.gmra.mxu0 %vm342_vm5, %v3688_v57  ;;  %3698 = vmatmul.msk.f32.vlgmr.msra.gmra.mxu1 %vm342_vm5, %v3688_v57 }
  0xd4   : > { %3748 = vmatpush.msk.msra.mxu0 %vm355_vm6, %v1113_v42  ;;  %3753 = vmatpush.msk.msra.mxu1 %vm355_vm6, %v1114_v20 }
  0xd9   : > { %3680 = vmatmul.msk.f32.gmra.mxu2 %vm342_vm5, %v3675_v38  ;;  %3685 = vmatmul.msk.f32.gmra.mxu3 %vm342_vm5, %v3675_v38 }
  0xdb   : > { %3694 = vmatmul.msk.f32.gmra.mxu0 %vm342_vm5, %v3689_v62  ;;  %3699 = vmatmul.msk.f32.gmra.mxu1 %vm342_vm5, %v3689_v62 }
  0xe1   : > { %3681 = vmatmul.msk.f32.gmra.mxu2 %vm342_vm5, %v3676_v63  ;;  %3686 = vmatmul.msk.f32.gmra.mxu3 %vm342_vm5, %v3676_v63 }
  0xe3   : > { %3695 = vmatmul.msk.f32.gmra.mxu0 %vm342_vm5, %v3690_v0  ;;  %3700 = vmatmul.msk.f32.gmra.mxu1 %vm342_vm5, %v3690_v0 }
  0xe9   : > { %3682 = vmatmul.msk.f32.gmra.mxu2 %vm342_vm5, %v3677_v12  ;;  %3687 = vmatmul.msk.f32.gmra.mxu3 %vm342_vm5, %v3677_v12 }
  0xeb   : > { %3696 = vmatmul.msk.f32.gmra.mxu0 %vm342_vm5, %v3691_v34  ;;  %3701 = vmatmul.msk.f32.gmra.mxu1 %vm342_vm5, %v3691_v34 }
  0xf1   : > { %3707 = vmatmul.msk.f32.vlgmr.msrb.gmra.mxu2 %vm342_vm5, %v3702_v41  ;;  %3712 = vmatmul.msk.f32.vlgmr.msrb.gmra.mxu3 %vm342_vm5, %v3702_v41 }
  0xf3   : > { %3721 = vmatmul.msk.f32.vlgmr.msrb.gmra.mxu0 %vm342_vm5, %v3716_v21  ;;  %3726 = vmatmul.msk.f32.vlgmr.msrb.gmra.mxu1 %vm342_vm5, %v3716_v21 }
  0xf9   : > { %3708 = vmatmul.msk.f32.gmra.mxu2 %vm342_vm5, %v3703_v51  ;;  %3713 = vmatmul.msk.f32.gmra.mxu3 %vm342_vm5, %v3703_v51 }
  0xfb   : > { %3722 = vmatmul.msk.f32.gmra.mxu0 %vm342_vm5, %v3717_v22  ;;  %3727 = vmatmul.msk.f32.gmra.mxu1 %vm342_vm5, %v3717_v22 }
 0x101   : > { %3709 = vmatmul.msk.f32.gmra.mxu2 %vm342_vm5, %v3704_v23  ;;  %3714 = vmatmul.msk.f32.gmra.mxu3 %vm342_vm5, %v3704_v23 }
 0x103   : > { %3723 = vmatmul.msk.f32.gmra.mxu0 %vm342_vm5, %v3718_v24  ;;  %3728 = vmatmul.msk.f32.gmra.mxu1 %vm342_vm5, %v3718_v24 }
 0x109   : > { %3710 = vmatmul.msk.f32.gmra.mxu2 %vm342_vm5, %v3705_v25  ;;  %3715 = vmatmul.msk.f32.gmra.mxu3 %vm342_vm5, %v3705_v25 }
 0x10b   : > { %3724 = vmatmul.msk.f32.gmra.mxu0 %vm342_vm5, %v3719_v26  ;;  %3729 = vmatmul.msk.f32.gmra.mxu1 %vm342_vm5, %v3719_v26 }
 0x111   : > { %3735 = vmatmul.msk.f32.vlgmr.msra.gmra.mxu2 %vm342_vm5, %v3730_v29  ;;  %3740 = vmatmul.msk.f32.vlgmr.msra.gmra.mxu3 %vm342_vm5, %v3730_v29 }
 0x113   : > { %3749 = vmatmul.msk.f32.vlgmr.msra.gmra.mxu0 %vm342_vm5, %v3744_v30  ;;  %3754 = vmatmul.msk.f32.vlgmr.msra.gmra.mxu1 %vm342_vm5, %v3744_v30 }
 0x119   : > { %3736 = vmatmul.msk.f32.gmra.mxu2 %vm342_vm5, %v3731_v31  ;;  %3741 = vmatmul.msk.f32.gmra.mxu3 %vm342_vm5, %v3731_v31 }
 0x11b   : > { %3750 = vmatmul.msk.f32.gmra.mxu0 %vm342_vm5, %v3745_v32  ;;  %3755 = vmatmul.msk.f32.gmra.mxu1 %vm342_vm5, %v3745_v32 }
 0x120   : > { %v4630_v40 = vpop.f32.mrf.mxu0  ;;  %v4632_v43 = vpop.f32.mrf.mxu1 }
 0x121   : > { %3737 = vmatmul.msk.f32.gmra.mxu2 %vm342_vm5, %v3732_v35  ;;  %3742 = vmatmul.msk.f32.gmra.mxu3 %vm342_vm5, %v3732_v35 }
 0x123   : > { %3751 = vmatmul.msk.f32.gmra.mxu0 %vm342_vm5, %v3746_v44  ;;  %3756 = vmatmul.msk.f32.gmra.mxu1 %vm342_vm5, %v3746_v44 }
 0x124   : > { %v4641_v45 = vpop.f32.mrf.mxu2  ;;  %v4643_v46 = vpop.f32.mrf.mxu3 }
 0x128   : > { %v382_v48 = vpop.f32.mrf.mxu0  ;;  %v411_v49 = vpop.f32.mrf.mxu1 }
 0x129   : > { %3738 = vmatmul.msk.f32.gmra.mxu2 %vm342_vm5, %v3733_v47  ;;  %3743 = vmatmul.msk.f32.gmra.mxu3 %vm342_vm5, %v3733_v47 }
 0x12b   : > { %3752 = vmatmul.msk.f32.gmra.mxu0 %vm342_vm5, %v3747_v50  ;;  %3757 = vmatmul.msk.f32.gmra.mxu1 %vm342_vm5, %v3747_v50 }
 0x12c   : > { %v4655_v27 = vpop.f32.mrf.mxu2  ;;  %v4657_v28 = vpop.f32.mrf.mxu3 }
 0x130   : > { %v4659_v54 = vpop.f32.mrf.mxu0  ;;  %v4661_v57 = vpop.f32.mrf.mxu1 }
 0x134   : > { %v455_v58 = vpop.f32.mrf.mxu2  ;;  %v484_v61 = vpop.f32.mrf.mxu3 }
 0x138   : > { %v553_v36 = vpop.f32.mrf.mxu0  ;;  %v582_v38 = vpop.f32.mrf.mxu1 }
 0x13c   : > { %v458_v62 = vpop.f32.mrf.mxu2  ;;  %v487_v63 = vpop.f32.mrf.mxu3 }
 0x13d   : > { %v459_v37 = vadd.f32 %v458_v62, %v382_v48  ;;  %v488_v19 = vadd.f32 %v487_v63, %v411_v49  ;;  %v456_v62 = vadd.f32 %v455_v58, %v4630_v40  ;;  %v485_v63 = vadd.f32 %v484_v61, %v4632_v43 }
 0x13f   : > { %v593_v1 = vadd.f32 %v553_v36, %v459_v37  ;;  %v594_v56 = vadd.f32 %v582_v38, %v488_v19 }
 0x140   : > { %v556_v0 = vpop.f32.mrf.mxu0  ;;  %v585_v3 = vpop.f32.mrf.mxu1 }
 0x144   : > { %v461_v4 = vpop.f32.mrf.mxu2  ;;  %v490_v5 = vpop.f32.mrf.mxu3 }
 0x148   : > { %v4663_v6 = vpop.f32.mrf.mxu0  ;;  %v4665_v11 = vpop.f32.mrf.mxu1 }
 0x14c   : > { %v464_v12 = vpop.f32.mrf.mxu2  ;;  %v493_v33 = vpop.f32.mrf.mxu3 }
 0x150   : > { %v4667_v34 = vpop.f32.mrf.mxu0  ;;  %v4669_v13 = vpop.f32.mrf.mxu1 }
 0x154   : > { %v653_v15 = vpop.f32.mrf.mxu2  ;;  %v682_v17 = vpop.f32.mrf.mxu3 }
 0x158   : > { %v746_v9 = vpop.f32.mrf.mxu0  ;;  %v775_v41 = vpop.f32.mrf.mxu1 }
 0x15c   : > { %v656_v42 = vpop.f32.mrf.mxu2  ;;  %v685_v20 = vpop.f32.mrf.mxu3 }
 0x15d   : > { %v696_v52 = vadd.f32 %v656_v42, %v593_v1  ;;  %v697_v18 = vadd.f32 %v685_v20, %v594_v56 }
 0x15f   : > { %v786_v48 = vadd.f32 %v746_v9, %v696_v52  ;;  %v787_v49 = vadd.f32 %v775_v41, %v697_v18  ;;  %v494_v18 = vadd.f32 %v493_v33, %v4657_v28 }
 0x160   : > { %v749_v21 = vpop.f32.mrf.mxu0  ;;  %v778_v51 = vpop.f32.mrf.mxu1 }
 0x164   : > { %v659_v22 = vpop.f32.mrf.mxu2  ;;  %v688_v23 = vpop.f32.mrf.mxu3 }
 0x168   : > { %v4671_v24 = vpop.f32.mrf.mxu0  ;;  %v4673_v25 = vpop.f32.mrf.mxu1 }
 0x16c   : > { %v4675_v26 = vpop.f32.mrf.mxu2  ;;  %v4677_v29 = vpop.f32.mrf.mxu3 }
 0x170   : > { %v4679_v30 = vpop.f32.mrf.mxu0  ;;  %v4681_v31 = vpop.f32.mrf.mxu1 }
 0x171   : > { %6602 = vst [vmem:[#allocation19_spill] sm:$0xff] %v4679_v30 }
 0x172   : > { %6603 = vst [vmem:[#allocation20_spill] sm:$0xff] %v4681_v31  ;;  %v462_v31 = vadd.f32 %v461_v4, %v4641_v45  ;;  %v591_v45 = vadd.f32 %v4659_v54, %v456_v62  ;;  %v465_v4 = vadd.f32 %v464_v12, %v4655_v27  ;;  %v598_v54 = vadd.f32 %v4665_v11, %v494_v18 }
 0x174   : > { %v4683_v32 = vpop.f32.mrf.mxu2  ;;  %v4685_v35 = vpop.f32.mrf.mxu3  ;;  %v595_v37 = vadd.f32 %v556_v0, %v462_v31  ;;  %v694_v58 = vadd.f32 %v653_v15, %v591_v45  ;;  %v597_v9 = vadd.f32 %v4663_v6, %v465_v4  ;;  %v701_v15 = vadd.f32 %v4677_v29, %v598_v54 }
 0x176   : > { %v698_v1 = vadd.f32 %v659_v22, %v595_v37  ;;  %v784_v28 = vadd.f32 %v4667_v34, %v694_v58  ;;  %v700_v33 = vadd.f32 %v4675_v26, %v597_v9 }
 0x178   : > { %v952_v44 = vpop.f32.mrf.mxu0  ;;  %v981_v47 = vpop.f32.mrf.mxu1  ;;  %v788_v0 = vadd.f32 %v749_v21, %v698_v1  ;;  %v791_v21 = vadd.f32 %v4673_v25, %v701_v15 }
 0x179   : > { %v6609_v29 = vld [vmem:[#allocation20_spill] sm:$0xff] }
 0x17c   : > { %v849_v50 = vpop.f32.mrf.mxu2  ;;  %v878_v16 = vpop.f32.mrf.mxu3 }
 0x17d   : > { %v889_v36 = vadd.f32 %v849_v50, %v786_v48  ;;  %v890_v38 = vadd.f32 %v878_v16, %v787_v49 }
 0x17f   : > { %v992_v52 = vadd.f32 %v952_v44, %v889_v36  ;;  %v993_v40 = vadd.f32 %v981_v47, %v890_v38 }
 0x180   : > { %v955_v14 = vpop.f32.mrf.mxu0  ;;  %v984_v8 = vpop.f32.mrf.mxu1 }
 0x184   : > { %v852_v7 = vpop.f32.mrf.mxu2  ;;  %v881_v60 = vpop.f32.mrf.mxu3 }
 0x185   : > { %v891_v41 = vadd.f32 %v852_v7, %v788_v0  ;;  %v887_v7 = vadd.f32 %v4683_v32, %v784_v28 }
 0x188   : > { %v4687_v59 = vpop.f32.mrf.mxu0  ;;  %v4689_v39 = vpop.f32.mrf.mxu1 }
 0x189   : > { %6604 = vst [vmem:[#allocation21_spill] sm:$0xff] %v4687_v59  ;;  %v491_v59 = vadd.f32 %v490_v5, %v4643_v46  ;;  %v592_v46 = vadd.f32 %v4661_v57, %v485_v63 }
 0x18a   : > { %6605 = vst [vmem:[#allocation22_spill] sm:$0xff] %v4689_v39 }
 0x18b   : > { %v596_v19 = vadd.f32 %v585_v3, %v491_v59  ;;  %v695_v43 = vadd.f32 %v682_v17, %v592_v46 }
 0x18c   : > { %v4691_v10 = vpop.f32.mrf.mxu2  ;;  %v4693_v2 = vpop.f32.mrf.mxu3 }
 0x18d   : > { %v699_v56 = vadd.f32 %v688_v23, %v596_v19  ;;  %v785_v12 = vadd.f32 %v4669_v13, %v695_v43  ;;  %v790_v13 = vadd.f32 %v4671_v24, %v700_v33  ;;  %v6608_v23 = vld [vmem:[#allocation19_spill] sm:$0xff]  ;;  %v894_v32 = vadd.f32 %v4693_v2, %v791_v21 }
 0x18e   : > { %v990_v26 = vadd.f32 %v6608_v23, %v887_v7 }
 0x18f   : > { %v789_v16 = vadd.f32 %v778_v51, %v699_v56  ;;  %v893_v44 = vadd.f32 %v4691_v10, %v790_v13 }
 0x190   : > { %v4695_v55 = vpop.f32.mrf.mxu0  ;;  %v4697_v53 = vpop.f32.mrf.mxu1  ;;  %v6610_v48 = vld [vmem:[#allocation21_spill] sm:$0xff] }
 0x191   : > { %6606 = vst [vmem:[#allocation23_spill] sm:$0xff] %v4695_v55  ;;  %v892_v57 = vadd.f32 %v881_v60, %v789_v16  ;;  %v994_v60 = vadd.f32 %v955_v14, %v891_v41  ;;  %v996_v49 = vadd.f32 %v6610_v48, %v893_v44  ;;  %v6611_v10 = vld [vmem:[#allocation22_spill] sm:$0xff] }
 0x192   : > { %6607 = vst [vmem:[#allocation24_spill] sm:$0xff] %v4697_v53  ;;  %v997_v62 = vadd.f32 %v6611_v10, %v894_v32 }
 0x194   : > { %v1052_v30 = vpop.f32.mrf.mxu2  ;;  %v1081_v39 = vpop.f32.mrf.mxu3 }
 0x195   : > { %v1093_v14 = vadd.f32 %v1052_v30, %v990_v26 }
 0x198   : > { %v1158_v55 = vpop.f32.mrf.mxu0  ;;  %v1187_v53 = vpop.f32.mrf.mxu1 }
 0x199   : > { %v6613_v38 = vld [vmem:[#allocation24_spill] sm:$0xff] }
 0x19c   : > { %v1055_v61 = vpop.f32.mrf.mxu2  ;;  %v1084_v59 = vpop.f32.mrf.mxu3 }
 0x19d   : > { %v1095_v3 = vadd.f32 %v1055_v61, %v992_v52  ;;  %v1096_v5 = vadd.f32 %v1084_v59, %v993_v40 }
 0x19f   : > { %v4709_v42 = vadd.f32 %v1158_v55, %v1095_v3  ;;  %v4711_v27 = vadd.f32 %v1187_v53, %v1096_v5  ;;  %v888_v55 = vadd.f32 %v4685_v35, %v785_v12  ;;  %v995_v53 = vadd.f32 %v984_v8, %v892_v57 }
 0x1a0   : > { %v1161_v6 = vpop.f32.mrf.mxu0  ;;  %v1190_v20 = vpop.f32.mrf.mxu1 }
 0x1a1   : > { %v1207_v17 = vadd.f32 %v4711_v27, %v4709_v42  ;;  %v991_v31 = vadd.f32 %v6609_v29, %v888_v55  ;;  %v1222_v61 = vmul.f32 %v4709_v42, %v4709_v42  ;;  %v1223_v59 = vmul.f32 %v4711_v27, %v4711_v27 }
 0x1a3   : > { %1208 = vadd.xlane.f32.xlu2 %v1207_v17  ;;  %v1094_v47 = vadd.f32 %v1081_v39, %v991_v31  ;;  %v6612_v39 = vld [vmem:[#allocation23_spill] sm:$0xff]  ;;  %v1231_v3 = vadd.f32 %v1223_v59, %v1222_v61 }
 0x1a4   : > { %v1058_v11 = vpop.f32.mrf.mxu2  ;;  %v1087_v34 = vpop.f32.mrf.mxu3  ;;  %v4740_v36 = vadd.f32 %v6612_v39, %v1093_v14 }
 0x1a5   : > { %v1097_v51 = vadd.f32 %v1058_v11, %v994_v60  ;;  %v1098_v22 = vadd.f32 %v1087_v34, %v995_v53  ;;  %v4743_v1 = vadd.f32 %v6613_v38, %v1094_v47 }
 0x1a6   : > { %v1220_v0 = vmul.f32 %v4740_v36, %v4740_v36 }
 0x1a7   : > { %v4727_v35 = vadd.f32 %v1161_v6, %v1097_v51  ;;  %v4729_v8 = vadd.f32 %v1190_v20, %v1098_v22  ;;  %v1204_v18 = vadd.f32 %v4743_v1, %v4740_v36  ;;  %v1221_v16 = vmul.f32 %v4743_v1, %v4743_v1 }
 0x1a8   : > { %v1164_v63 = vpop.f32.mrf.mxu0  ;;  %v1193_v37 = vpop.f32.mrf.mxu1 }
 0x1a9   : > { %v1210_v24 = vadd.f32 %v4729_v8, %v4727_v35  ;;  %v1224_v25 = vmul.f32 %v4727_v35, %v4727_v35  ;;  %v1225_v50 = vmul.f32 %v4729_v8, %v4729_v8  ;;  %v1228_v5 = vadd.f32 %v1221_v16, %v1220_v0 }
 0x1ab   : > { %1211 = vadd.xlane.f32.xlu2 %v1210_v24  ;;  %v1234_v2 = vadd.f32 %v1225_v50, %v1224_v25 }
 0x1ac   : > { %v1061_v19 = vpop.f32.mrf.mxu2  ;;  %v1090_v30 = vpop.f32.mrf.mxu3 }
 0x1ad   : > { %v1099_v56 = vadd.f32 %v1061_v19, %v996_v49  ;;  %v1100_v45 = vadd.f32 %v1090_v30, %v997_v62  ;;  %1235 = vadd.xlane.f32.xlu1 %v1234_v2 }
 0x1af   : > { %v4745_v46 = vadd.f32 %v1164_v63, %v1099_v56  ;;  %v4747_v4 = vadd.f32 %v1193_v37, %v1100_v45 }
 0x1b1   : > { %v1226_v52 = vmul.f32 %v4745_v46, %v4745_v46  ;;  %v1227_v40 = vmul.f32 %v4747_v4, %v4747_v4  ;;  %v1213_v43 = vadd.f32 %v4747_v4, %v4745_v46 }
 0x1b3   : > { %1205 = vadd.xlane.f32.xlu2 %v1204_v18  ;;  %v1237_v58 = vadd.f32 %v1227_v40, %v1226_v52 }
 0x1b5   : > { %1238 = vadd.xlane.f32.xlu0 %v1237_v58  ;;  %1214 = vadd.xlane.f32.xlu1 %v1213_v43 }
 0x1bd   : > { %1232 = vadd.xlane.f32.xlu0 %v1231_v3  ;;  %1229 = vadd.xlane.f32.xlu1 %v1228_v5 }
 0x216   : > { %v1209_v9 = vpop.xlane.xlu2 %1208 }
 0x217   : > { %v1217_v55 = vmul.f32 0.00390625, %v1209_v9 }
 0x219   : > { %v1245_v51 = vmul.f32 %v1217_v55, %v1217_v55  ;;  %v1254_v3 = vsub.f32 %v4709_v42, %v1217_v55  ;;  %v1255_v5 = vsub.f32 %v4711_v27, %v1217_v55 }
 0x21e   : > { %v1212_v54 = vpop.xlane.xlu2 %1211 }
 0x21f   : > { %v1218_v41 = vmul.f32 0.00390625, %v1212_v54 }
 0x220   : > { %v1236_v57 = vpop.xlane.xlu1 %1235 }
 0x221   : > { %v1242_v28 = vmul.f32 0.00390625, %v1236_v57  ;;  %v1246_v12 = vmul.f32 %v1218_v41, %v1218_v41  ;;  %v1256_v62 = vsub.f32 %v4727_v35, %v1218_v41  ;;  %v1257_v37 = vsub.f32 %v4729_v8, %v1218_v41 }
 0x223   : > { %v1250_v33 = vsub.f32 %v1242_v28, %v1246_v12 }
 0x225   : > { %v1262_v15 = vadd.f32 1e-05, %v1250_v33 }
 0x226   : > { %v1206_v47 = vpop.xlane.xlu2 %1205 }
 0x227   : > { %3943 = vrsqrt.f32 %v1262_v15  ;;  %vm1290_vm14 = vweird.f32 %v1262_v15  ;;  %v4769_v49 = vmul.f32 0.00390625, %v1206_v47 }
 0x228   : > { %v1239_v17 = vpop.xlane.xlu0 %1238  ;;  %v1215_v6 = vpop.xlane.xlu1 %1214 }
 0x229   : > { %v4765_v20 = vmul.f32 0.00390625, %v1215_v6  ;;  %v1243_v11 = vmul.f32 0.00390625, %v1239_v17  ;;  %v1244_v39 = vmul.f32 %v4769_v49, %v4769_v49 }
 0x22b   : > { %v1247_v60 = vmul.f32 %v4765_v20, %v4765_v20  ;;  %v1258_v17 = vsub.f32 %v4745_v46, %v4765_v20  ;;  %v1259_v55 = vsub.f32 %v4747_v4, %v4765_v20 }
 0x22d   : > { %v3944_v7 = vpop.eup %3943  ;;  %v1251_v21 = vsub.f32 %v1243_v11, %v1247_v60 }
 0x22e   : > { %v1285_v53 = vmul.f32 %v3944_v7, %v1262_v15  ;;  %vm1291_vm12 = vweird.f32 %v3944_v7 }
 0x22f   : > { %v1263_v29 = vadd.f32 1e-05, %v1251_v21  ;;  %vm1292_vm8 = vmor %vm1290_vm14, %vm1291_vm12 }
 0x230   : > { %v1286_v34 = vmul.f32 %v3944_v7, %v1285_v53  ;;  %v1233_v13 = vpop.xlane.xlu0 %1232  ;;  %v1230_v50 = vpop.xlane.xlu1 %1229 }
 0x231   : > { %v1241_v22 = vmul.f32 0.00390625, %v1233_v13  ;;  %v1240_v63 = vmul.f32 0.00390625, %v1230_v50  ;;  %vm1300_vm4 = vweird.f32 %v1263_v29 }
 0x232   : > { %v1287_v26 = vmul.f32 0.5, %v1286_v34 }
 0x233   : > { %v1249_v23 = vsub.f32 %v1241_v22, %v1245_v51  ;;  %v1248_v45 = vsub.f32 %v1240_v63, %v1244_v39  ;;  %v1252_v39 = vsub.f32 %v4740_v36, %v4769_v49 }
 0x234   : > { %v1288_v44 = vsub.f32 1.5, %v1287_v26 }
 0x235   : > { %v1261_v31 = vadd.f32 1e-05, %v1249_v23  ;;  %v4785_v58 = vadd.f32 1e-05, %v1248_v45 }
 0x236   : > { %v1289_v32 = vmul.f32 %v3944_v7, %v1288_v44 }
 0x237   : > { %3945 = vrsqrt.f32 %v1261_v31  ;;  %vm1280_vm15 = vweird.f32 %v1261_v31  ;;  %vm1270_vm1 = vweird.f32 %v4785_v58 }
 0x238   : > { %3947 = vrsqrt.f32 %v1263_v29  ;;  %v1293_v48 = vsel %vm1292_vm8, %v3944_v7, %v1289_v32 }
 0x239   : > { %v4773_v19 = vmul.f32 %v1293_v48, %v1256_v62  ;;  %v4777_v38 = vmul.f32 %v1293_v48, %v1257_v37  ;;  %3949 = vrsqrt.f32 %v4785_v58 }
 0x23b   : > { %v4780_v18 = vmul.f32 0.70710677, %v4773_v19  ;;  %v4783_v35 = vmul.f32 0.70710677, %v4777_v38 }
 0x23d   : > { %v3946_v14 = vpop.eup %3945  ;;  %v4788_v8 = vand.u32 2147483647, %v4780_v18  ;;  %v4791_v61 = vand.u32 2147483647, %v4783_v35 }
 0x23e   : > { %v1275_v24 = vmul.f32 %v3946_v14, %v1261_v31  ;;  %v3948_v25 = vpop.eup %3947  ;;  %vm1281_vm13 = vweird.f32 %v3946_v14 }
 0x23f   : > { %v1295_v2 = vmul.f32 %v3948_v25, %v1263_v29  ;;  %vm1282_vm9 = vmor %vm1280_vm15, %vm1281_vm13  ;;  %v1340_v0 = vmul.f32 0.3275911, %v4788_v8  ;;  %v1341_v9 = vmul.f32 0.3275911, %v4791_v61  ;;  %vm1301_vm11 = vweird.f32 %v3948_v25  ;;  %v3950_v12 = vpop.eup %3949 }
 0x240   : > { %v1276_v10 = vmul.f32 %v3946_v14, %v1275_v24  ;;  %vm1302_vm0 = vmor %vm1300_vm4, %vm1301_vm11  ;;  %v1265_v6 = vmul.f32 %v3950_v12, %v4785_v58  ;;  %vm1271_vm7 = vweird.f32 %v3950_v12 }
 0x241   : > { %v1296_v56 = vmul.f32 %v3948_v25, %v1295_v2  ;;  %v4802_v28 = vadd.f32 1.0, %v1340_v0  ;;  %v4804_v33 = vadd.f32 1.0, %v1341_v9  ;;  %vm1272_vm13 = vmor %vm1270_vm1, %vm1271_vm7 }
 0x242   : > { %v1277_v30 = vmul.f32 0.5, %v1276_v10  ;;  %v1266_v13 = vmul.f32 %v3950_v12, %v1265_v6 }
 0x243   : > { %v1297_v40 = vmul.f32 0.5, %v1296_v56  ;;  %3951 = vrcp.f32 %v4802_v28  ;;  %v1253_v56 = vsub.f32 %v4743_v1, %v4769_v49  ;;  %vm1417_vm12 = vweird.f32 %v4802_v28 }
 0x244   : > { %v1278_v52 = vsub.f32 1.5, %v1277_v30  ;;  %3953 = vrcp.f32 %v4804_v33  ;;  %v1267_v26 = vmul.f32 0.5, %v1266_v13  ;;  %v1421_v45 = vand.u32 2147483647, %v4802_v28 }
 0x245   : > { %v1298_v59 = vsub.f32 1.5, %v1297_v40  ;;  %vm1432_vm8 = vweird.f32 %v4804_v33 }
 0x246   : > { %v1279_v43 = vmul.f32 %v3946_v14, %v1278_v52 }
 0x247   : > { %v1299_v54 = vmul.f32 %v3948_v25, %v1298_v59 }
 0x248   : > { %v1283_v16 = vsel %vm1282_vm9, %v3946_v14, %v1279_v43  ;;  %v1268_v14 = vsub.f32 1.5, %v1267_v26  ;;  %v1423_v43 = vand.u32 2147483648, %v4802_v28  ;;  %v1438_v26 = vand.u32 2147483648, %v4804_v33 }
 0x249   : > { %v4798_v41 = vmul.f32 %v1283_v16, %v1254_v3  ;;  %v4800_v57 = vmul.f32 %v1283_v16, %v1255_v5  ;;  %v1303_v15 = vsel %vm1302_vm0, %v3948_v25, %v1299_v54  ;;  %v4833_v51 = vpop.eup %3951  ;;  %v1436_v16 = vand.u32 2147483647, %v4804_v33 }
 0x24a   : > { %v4822_v60 = vmul.f32 %v1303_v15, %v1258_v17  ;;  %v4828_v34 = vmul.f32 %v1303_v15, %v1259_v55  ;;  %v4841_v20 = vpop.eup %3953  ;;  %v1413_v29 = vmul.f32 %v4833_v51, %v4802_v28  ;;  %v1269_v37 = vmul.f32 %v3950_v12, %v1268_v14 }
 0x24b   : > { %v4807_v42 = vmul.f32 0.70710677, %v4798_v41  ;;  %v4810_v27 = vmul.f32 0.70710677, %v4800_v57  ;;  %v1428_v44 = vmul.f32 %v4841_v20, %v4804_v33  ;;  %vm1418_vm14 = vweird.f32 %v4833_v51 }
 0x24c   : > { %v4836_v22 = vmul.f32 0.70710677, %v4822_v60  ;;  %v4844_v23 = vmul.f32 0.70710677, %v4828_v34  ;;  %v1414_v24 = vsub.f32 1.0, %v1413_v29  ;;  %v1273_v59 = vsel %vm1272_vm13, %v3950_v12, %v1269_v37  ;;  %vm4893_vm4 = vmor %vm1417_vm12, %vm1418_vm14 }
 0x24d   : > { %v4817_v7 = vand.u32 2147483647, %v4807_v42  ;;  %v4825_v53 = vand.u32 2147483647, %v4810_v27  ;;  %v1429_v10 = vsub.f32 1.0, %v1428_v44  ;;  %vm1433_vm15 = vweird.f32 %v4841_v20 }
 0x24e   : > { %v4850_v31 = vand.u32 2147483647, %v4836_v22  ;;  %v4855_v32 = vand.u32 2147483647, %v4844_v23  ;;  %v1415_v30 = vmul.f32 %v4833_v51, %v1414_v24  ;;  %v4899_v15 = vmul.f32 %v1273_v59, %v1252_v39 }
 0x24f   : > { %v1338_v11 = vmul.f32 0.3275911, %v4817_v7  ;;  %v1339_v46 = vmul.f32 0.3275911, %v4825_v53  ;;  %v1430_v1 = vmul.f32 %v4841_v20, %v1429_v10  ;;  %v4908_v28 = vmul.f32 %v1273_v59, %v1253_v56 }
 0x250   : > { %v1342_v25 = vmul.f32 0.3275911, %v4850_v31  ;;  %v1343_v62 = vmul.f32 0.3275911, %v4855_v32  ;;  %v1416_v0 = vadd.f32 %v4833_v51, %v1415_v30  ;;  %vm1422_vm12 = vcmp.eq.f32.partialorder %v1421_v45, 8.507059e+37 }
 0x251   : > { %v4831_v21 = vadd.f32 1.0, %v1338_v11  ;;  %v4838_v4 = vadd.f32 1.0, %v1339_v46  ;;  %v1431_v17 = vadd.f32 %v4841_v20, %v1430_v1  ;;  %v4931_v14 = vmul.f32 0.70710677, %v4908_v28 }
 0x252   : > { %v4872_v52 = vadd.f32 1.0, %v1342_v25  ;;  %v4880_v49 = vadd.f32 1.0, %v1343_v62  ;;  %v1420_v11 = vsel %vm4893_vm4, %v4833_v51, %v1416_v0  ;;  %v1439_v33 = vor.u32 1.1754944e-38, %v1438_v26 }
 0x253   : > { %3955 = vrcp.f32 %v4831_v21  ;;  %vm1402_vm11 = vweird.f32 %v4838_v4  ;;  %v1406_v3 = vand.u32 2147483647, %v4838_v4  ;;  %v1408_v5 = vand.u32 2147483648, %v4838_v4 }
 0x254   : > { %3957 = vrcp.f32 %v4838_v4  ;;  %v1393_v6 = vand.u32 2147483648, %v4831_v21  ;;  %vm1387_vm1 = vweird.f32 %v4831_v21  ;;  %v1391_v46 = vand.u32 2147483647, %v4831_v21 }
 0x255   : > { %3959 = vrcp.f32 %v4872_v52  ;;  %v1409_v44 = vor.u32 1.1754944e-38, %v1408_v5  ;;  %vm1407_vm13 = vcmp.eq.f32.partialorder %v1406_v3, 8.507059e+37  ;;  %vm1462_vm4 = vweird.f32 %v4880_v49 }
 0x256   : > { %3961 = vrcp.f32 %v4880_v49 }
 0x259   : > { %v4857_v47 = vpop.eup %3955 }
 0x25a   : > { %v1383_v50 = vmul.f32 %v4857_v47, %v4831_v21  ;;  %v3958_v48 = vpop.eup %3957  ;;  %vm1388_vm0 = vweird.f32 %v4857_v47  ;;  %v4928_v21 = vmul.f32 0.70710677, %v4899_v15 }
 0x25b   : > { %v1398_v63 = vmul.f32 %v3958_v48, %v4838_v4  ;;  %vm1403_vm9 = vweird.f32 %v3958_v48  ;;  %v1424_v4 = vor.u32 1.1754944e-38, %v1423_v43  ;;  %vm4920_vm14 = vmor %vm1387_vm1, %vm1388_vm0  ;;  %v4933_v24 = vpop.eup %3959 }
 0x25c   : > { %v1384_v2 = vsub.f32 1.0, %v1383_v50  ;;  %vm4904_vm7 = vmor %vm1402_vm11, %vm1403_vm9  ;;  %vm1392_vm11 = vcmp.eq.f32.partialorder %v1391_v46, 8.507059e+37  ;;  %v4951_v62 = vand.u32 2147483647, %v4928_v21  ;;  %v1443_v30 = vmul.f32 %v4933_v24, %v4872_v52 }
 0x25d   : > { %v1399_v40 = vsub.f32 1.0, %v1398_v63  ;;  %v4935_v25 = vsel %vm1422_vm12, %v1424_v4, %v1420_v11  ;;  %vm4941_vm9 = vmor %vm1432_vm8, %vm1433_vm15  ;;  %v4956_v63 = vpop.eup %3961  ;;  %vm1437_vm8 = vcmp.eq.f32.partialorder %v1436_v16, 8.507059e+37  ;;  %vm1447_vm15 = vweird.f32 %v4872_v52 }
 0x25e   : > { %v1385_v36 = vmul.f32 %v4857_v47, %v1384_v2  ;;  %v1435_v10 = vsel %vm4941_vm9, %v4841_v20, %v1431_v17  ;;  %v4954_v2 = vand.u32 2147483647, %v4931_v14  ;;  %v1336_v20 = vmul.f32 0.3275911, %v4951_v62 }
 0x25f   : > { %v1400_v58 = vmul.f32 %v3958_v48, %v1399_v40  ;;  %v4965_v45 = vsel %vm1437_vm8, %v1439_v33, %v1435_v10  ;;  %v1476_v40 = vmul.f32 1.0614054, %v4935_v25  ;;  %v1458_v43 = vmul.f32 %v4956_v63, %v4880_v49 }
 0x260   : > { %v1386_v54 = vadd.f32 %v4857_v47, %v1385_v36  ;;  %v1337_v56 = vmul.f32 0.3275911, %v4954_v2  ;;  %v1344_v1 = vadd.f32 1.0, %v1336_v20  ;;  %v1444_v59 = vsub.f32 1.0, %v1443_v30 }
 0x261   : > { %v1401_v12 = vadd.f32 %v3958_v48, %v1400_v58  ;;  %v1477_v16 = vmul.f32 1.0614054, %v4965_v45  ;;  %v3762_v3 = vadd.f32 -1.4531521, %v1476_v40  ;;  %v1459_v5 = vsub.f32 1.0, %v1458_v43 }
 0x262   : > { %v1390_v51 = vsel %vm4920_vm14, %v4857_v47, %v1386_v54  ;;  %v1394_v47 = vor.u32 1.1754944e-38, %v1393_v6  ;;  %v4971_v58 = vadd.f32 1.0, %v1337_v56  ;;  %3963 = vrcp.f32 %v1344_v1 }
 0x263   : > { %v1405_v13 = vsel %vm4904_vm7, %v3958_v48, %v1401_v12  ;;  %v1451_v54 = vand.u32 2147483647, %v4872_v52  ;;  %v1453_v12 = vand.u32 2147483648, %v4872_v52  ;;  %v1468_v17 = vand.u32 2147483648, %v4880_v49 }
 0x264   : > { %v4945_v48 = vsel %vm1407_vm13, %v1409_v44, %v1405_v13  ;;  %v4958_v37 = vsel %vm1392_vm11, %v1394_v47, %v1390_v51  ;;  %3965 = vrcp.f32 %v4971_v58  ;;  %v1445_v6 = vmul.f32 %v4933_v24, %v1444_v59 }
 0x265   : > { %v1475_v39 = vmul.f32 1.0614054, %v4945_v48  ;;  %v1474_v36 = vmul.f32 1.0614054, %v4958_v37  ;;  %v3763_v11 = vadd.f32 -1.4531521, %v1477_v16  ;;  %v1492_v46 = vmul.f32 %v3762_v3, %v4935_v25 }
 0x266   : > { %v1466_v13 = vand.u32 2147483647, %v4880_v49  ;;  %v1460_v26 = vmul.f32 %v4956_v63, %v1459_v5  ;;  %vm4986_vm0 = vcmp.eq.f32.partialorder %v1451_v54, 8.507059e+37  ;;  %v1454_v51 = vor.u32 1.1754944e-38, %v1453_v12 }
 0x267   : > { %v3761_v0 = vadd.f32 -1.4531521, %v1475_v39  ;;  %v3760_v9 = vadd.f32 -1.4531521, %v1474_v36  ;;  %v1469_v50 = vor.u32 1.1754944e-38, %v1468_v17  ;;  %v1446_v33 = vadd.f32 %v4933_v24, %v1445_v6 }
 0x268   : > { %v3964_v4 = vpop.eup %3963  ;;  %vm1448_vm7 = vweird.f32 %v4933_v24  ;;  %vm1463_vm1 = vweird.f32 %v4956_v63  ;;  %v1493_v39 = vmul.f32 %v3763_v11, %v4965_v45  ;;  %v1500_v20 = vadd.f32 1.4214138, %v1492_v46 }
 0x269   : > { %v1491_v55 = vmul.f32 %v3761_v0, %v4945_v48  ;;  %v1490_v29 = vmul.f32 %v3760_v9, %v4958_v37  ;;  %v1353_v47 = vmul.f32 %v3964_v4, %v1344_v1  ;;  %vm4994_vm12 = vcmp.eq.f32.partialorder %v1466_v13, 8.507059e+37  ;;  %vm5003_vm14 = vmor %vm1447_vm15, %vm1448_vm7 }
 0x26a   : > { %v3966_v10 = vpop.eup %3965  ;;  %v1461_v36 = vadd.f32 %v4956_v63, %v1460_v26  ;;  %v1546_v0 = vsub.f32 0.0, %v4817_v7  ;;  %v1363_v16 = vand.u32 2147483648, %v1344_v1  ;;  %vm1358_vm13 = vweird.f32 %v3964_v4  ;;  %vm5016_vm11 = vmor %vm1462_vm4, %vm1463_vm1 }
 0x26b   : > { %v1499_v30 = vadd.f32 1.4214138, %v1491_v55  ;;  %v1354_v40 = vsub.f32 1.0, %v1353_v47  ;;  %v1368_v43 = vmul.f32 %v3966_v10, %v4971_v58  ;;  %v1498_v59 = vadd.f32 1.4214138, %v1490_v29 }
 0x26c   : > { %v1361_v9 = vand.u32 2147483647, %v1344_v1  ;;  %v1450_v12 = vsel %vm5003_vm14, %v4933_v24, %v1446_v33  ;;  %vm1357_vm9 = vweird.f32 %v1344_v1  ;;  %v1378_v6 = vand.u32 2147483648, %v4971_v58 }
 0x26d   : > { %v1355_v5 = vmul.f32 %v3964_v4, %v1354_v40  ;;  %v1369_v54 = vsub.f32 1.0, %v1368_v43  ;;  %v1507_v17 = vmul.f32 %v1499_v30, %v4945_v48  ;;  %vm1373_vm8 = vweird.f32 %v3966_v10  ;;  %vm1359_vm15 = vmor %vm1357_vm9, %vm1358_vm13 }
 0x26e   : > { %v1376_v46 = vand.u32 2147483647, %v4971_v58  ;;  %v1465_v24 = vsel %vm5016_vm11, %v4956_v63, %v1461_v36  ;;  %v1506_v1 = vmul.f32 %v1498_v59, %v4958_v37  ;;  %v1547_v13 = vsub.f32 0.0, %v4825_v53 }
 0x26f   : > { %v1356_v55 = vadd.f32 %v3964_v4, %v1355_v5  ;;  %v1370_v11 = vmul.f32 %v3966_v10, %v1369_v54  ;;  %v1364_v49 = vor.u32 1.1754944e-38, %v1363_v16  ;;  %vm1362_vm4 = vcmp.eq.f32.partialorder %v1361_v9, 8.507059e+37 }
 0x270   : > { %vm1372_vm7 = vweird.f32 %v4971_v58  ;;  %v5030_v47 = vsel %vm4986_vm0, %v1454_v51, %v1450_v12  ;;  %v1379_v63 = vor.u32 1.1754944e-38, %v1378_v6  ;;  %v1544_v30 = vsub.f32 0.0, %v4951_v62 }
 0x271   : > { %v1360_v26 = vsel %vm1359_vm15, %v3964_v4, %v1356_v55  ;;  %v1371_v29 = vadd.f32 %v3966_v10, %v1370_v11  ;;  %vm1374_vm1 = vmor %vm1372_vm7, %vm1373_vm8  ;;  %v3769_v40 = vadd.f32 -0.28449672, %v1507_v17  ;;  %vm1377_vm14 = vcmp.eq.f32.partialorder %v1376_v46, 8.507059e+37 }
 0x272   : > { %v5032_v33 = vsel %vm1362_vm4, %v1364_v49, %v1360_v26  ;;  %v5038_v4 = vsel %vm4994_vm12, %v1469_v50, %v1465_v24  ;;  %v1555_v58 = vmul.f32 %v1547_v13, %v4825_v53  ;;  %v1545_v51 = vsub.f32 0.0, %v4954_v2 }
 0x273   : > { %v1375_v43 = vsel %vm1374_vm1, %v3966_v10, %v1371_v29  ;;  %v1472_v36 = vmul.f32 1.0614054, %v5032_v33  ;;  %v3768_v59 = vadd.f32 -0.28449672, %v1506_v1  ;;  %v1554_v16 = vmul.f32 %v1546_v0, %v4817_v7 }
 0x274   : > { %v5041_v44 = vsel %vm1377_vm14, %v1379_v63, %v1375_v43  ;;  %v1508_v10 = vmul.f32 %v1500_v20, %v4935_v25  ;;  %v1548_v9 = vsub.f32 0.0, %v4788_v8  ;;  %v1478_v56 = vmul.f32 1.0614054, %v5030_v47 }
 0x275   : > { %v1473_v3 = vmul.f32 1.0614054, %v5041_v44  ;;  %v3758_v5 = vadd.f32 -1.4531521, %v1472_v36  ;;  %v1552_v50 = vmul.f32 %v1544_v30, %v4951_v62  ;;  %v1479_v53 = vmul.f32 1.0614054, %v5038_v4 }
 0x276   : > { %v1523_v54 = vmul.f32 %v3769_v40, %v4945_v48  ;;  %v1501_v6 = vadd.f32 1.4214138, %v1493_v39  ;;  %v1566_v7 = vmul.f32 1.442695, %v1555_v58  ;;  %v1553_v0 = vmul.f32 %v1545_v51, %v4954_v2 }
 0x277   : > { %v3759_v12 = vadd.f32 -1.4531521, %v1473_v3  ;;  %v1488_v17 = vmul.f32 %v3758_v5, %v5032_v33  ;;  %v1522_v52 = vmul.f32 %v3768_v59, %v4958_v37  ;;  %v1564_v20 = vmul.f32 1.442695, %v1554_v16 }
 0x278   : > { %v3770_v46 = vadd.f32 -0.28449672, %v1508_v10  ;;  %v1556_v62 = vmul.f32 %v1548_v9, %v4788_v8  ;;  %v3764_v24 = vadd.f32 -1.4531521, %v1478_v56  ;;  %v1560_v1 = vmul.f32 1.442695, %v1552_v50 }
 0x279   : > { %v1489_v55 = vmul.f32 %v3759_v12, %v5041_v44  ;;  %v1496_v11 = vadd.f32 1.4214138, %v1488_v17  ;;  %v3765_v13 = vadd.f32 -1.4531521, %v1479_v53  ;;  %v1531_v49 = vadd.f32 0.2548296, %v1523_v54 }
 0x27a   : > { %v1509_v39 = vmul.f32 %v1501_v6, %v4965_v45  ;;  %v1549_v2 = vsub.f32 0.0, %v4791_v61  ;;  %3967 = vpow2.f32 %v1566_v7  ;;  %v1562_v63 = vmul.f32 1.442695, %v1553_v0 }
 0x27b   : > { %v1497_v26 = vadd.f32 1.4214138, %v1489_v55  ;;  %v1504_v29 = vmul.f32 %v1496_v11, %v5032_v33  ;;  %v1530_v30 = vadd.f32 0.2548296, %v1522_v52  ;;  %3969 = vpow2.f32 %v1564_v20 }
 0x27c   : > { %v1524_v8 = vmul.f32 %v3770_v46, %v4935_v25  ;;  %v1568_v36 = vmul.f32 1.442695, %v1556_v62  ;;  %v1494_v58 = vmul.f32 %v3764_v24, %v5030_v47  ;;  %3971 = vpow2.f32 %v1560_v1 }
 0x27d   : > { %v1505_v40 = vmul.f32 %v1497_v26, %v5041_v44  ;;  %v3766_v43 = vadd.f32 -0.28449672, %v1504_v29  ;;  %v1495_v51 = vmul.f32 %v3765_v13, %v5038_v4  ;;  %v1539_v59 = vmul.f32 %v1531_v49, %v4945_v48 }
 0x27e   : > { %3973 = vpow2.f32 %v1562_v63  ;;  %v3771_v5 = vadd.f32 -0.28449672, %v1509_v39  ;;  %v1538_v10 = vmul.f32 %v1530_v30, %v4958_v37  ;;  %v1532_v53 = vadd.f32 0.2548296, %v1524_v8 }
 0x27f   : > { %v3767_v16 = vadd.f32 -0.28449672, %v1505_v40  ;;  %v1520_v3 = vmul.f32 %v3766_v43, %v5032_v33  ;;  %v1557_v54 = vmul.f32 %v1549_v2, %v4791_v61  ;;  %3975 = vpow2.f32 %v1568_v36 }
 0x280   : > { %v3968_v50 = vpop.eup %3967  ;;  %v1502_v12 = vadd.f32 1.4214138, %v1494_v58  ;;  %v1503_v6 = vadd.f32 1.4214138, %v1495_v51  ;;  %v1550_v20 = vsub.f32 0.0, %v4850_v31  ;;  %v1525_v37 = vmul.f32 %v3771_v5, %v4965_v45 }
 0x281   : > { %v1521_v9 = vmul.f32 %v3767_v16, %v5041_v44  ;;  %v1528_v56 = vadd.f32 0.2548296, %v1520_v3  ;;  %v3970_v17 = vpop.eup %3969  ;;  %v1579_v7 = vmul.f32 %v3968_v50, %v1539_v59  ;;  %v1540_v61 = vmul.f32 %v1532_v53, %v4935_v25 }
 0x282   : > { %v3972_v52 = vpop.eup %3971  ;;  %v1578_v55 = vmul.f32 %v3970_v17, %v1538_v10  ;;  %v1570_v24 = vmul.f32 1.442695, %v1557_v54  ;;  %v1510_v1 = vmul.f32 %v1502_v12, %v5030_v47  ;;  %v1511_v13 = vmul.f32 %v1503_v6, %v5038_v4 }
 0x283   : > { %v1529_v48 = vadd.f32 0.2548296, %v1521_v9  ;;  %v1536_v0 = vmul.f32 %v1528_v56, %v5032_v33  ;;  %v1587_v49 = vsub.f32 1.0, %v1579_v7  ;;  %v1551_v39 = vsub.f32 0.0, %v4855_v32 }
 0x284   : > { %v3974_v62 = vpop.eup %3973  ;;  %v1558_v2 = vmul.f32 %v1550_v20, %v4850_v31  ;;  %v1533_v63 = vadd.f32 0.2548296, %v1525_v37  ;;  %v1586_v30 = vsub.f32 1.0, %v1578_v55  ;;  %3977 = vpow2.f32 %v1570_v24 }
 0x285   : > { %v1537_v11 = vmul.f32 %v1529_v48, %v5041_v44  ;;  %v1576_v46 = vmul.f32 %v3972_v52, %v1536_v0  ;;  %v3976_v29 = vpop.eup %3975  ;;  %v3772_v25 = vadd.f32 -0.28449672, %v1510_v1  ;;  %vm1592_vm0 = vcmp.ge.f32.partialorder %v4928_v21, 0.0 }
 0x286   : > { %v1580_v43 = vmul.f32 %v3976_v29, %v1540_v61  ;;  %v3773_v8 = vadd.f32 -0.28449672, %v1511_v13  ;;  %v1603_v36 = vsub.f32 0.0, %v1587_v49  ;;  %v1559_v59 = vmul.f32 %v1551_v39, %v4855_v32 }
 0x287   : > { %v1577_v26 = vmul.f32 %v3974_v62, %v1537_v11  ;;  %v1584_v33 = vsub.f32 1.0, %v1576_v46  ;;  %v1312_v16 = vmul.f32 0.5, %v4899_v15  ;;  %vm1593_vm12 = vcmp.ge.f32.partialorder %v4931_v14, 0.0 }
 0x288   : > { %v1541_v3 = vmul.f32 %v1533_v63, %v4965_v45  ;;  %v1572_v5 = vmul.f32 1.442695, %v1558_v2  ;;  %v1602_v10 = vsub.f32 0.0, %v1586_v30  ;;  %vm1595_vm13 = vcmp.ge.f32.partialorder %v4810_v27, 0.0 }
 0x289   : > { %v1585_v44 = vsub.f32 1.0, %v1577_v26  ;;  %v1600_v40 = vsub.f32 0.0, %v1584_v33  ;;  %v1313_v21 = vmul.f32 0.5, %v4908_v28  ;;  %v1588_v53 = vsub.f32 1.0, %v1580_v43 }
 0x28a   : > { %v1526_v32 = vmul.f32 %v3772_v25, %v5030_v47  ;;  %v1527_v15 = vmul.f32 %v3773_v8, %v5038_v4  ;;  %v1611_v54 = vsel %vm1595_vm13, %v1587_v49, %v1603_v36  ;;  %v3978_v14 = vpop.eup %3977  ;;  %v1574_v12 = vmul.f32 1.442695, %v1559_v59 }
 0x28b   : > { %v1601_v58 = vsub.f32 0.0, %v1585_v44  ;;  %v1608_v51 = vsel %vm1592_vm0, %v1584_v33, %v1600_v40  ;;  %vm1594_vm9 = vcmp.ge.f32.partialorder %v4807_v42, 0.0  ;;  %3979 = vpow2.f32 %v1572_v5 }
 0x28c   : > { %v1616_v31 = vadd.f32 1.0, %v1608_v51  ;;  %v1610_v27 = vsel %vm1594_vm9, %v1586_v30, %v1602_v10  ;;  %v1619_v28 = vadd.f32 1.0, %v1611_v54  ;;  %v1581_v17 = vmul.f32 %v3978_v14, %v1541_v3 }
 0x28d   : > { %v1609_v9 = vsel %vm1593_vm12, %v1585_v44, %v1601_v58  ;;  %v1604_v6 = vsub.f32 0.0, %v1588_v53  ;;  %v1534_v7 = vadd.f32 0.2548296, %v1526_v32  ;;  %v1535_v48 = vadd.f32 0.2548296, %v1527_v15 }
 0x28e   : > { %v1617_v56 = vadd.f32 1.0, %v1609_v9  ;;  %v5085_v50 = vmul.f32 %v1616_v31, %v1312_v16  ;;  %3981 = vpow2.f32 %v1574_v12  ;;  %v1315_v42 = vmul.f32 0.5, %v4800_v57 }
 0x28f   : > { %v1618_v0 = vadd.f32 1.0, %v1610_v27  ;;  %vm1596_vm11 = vcmp.ge.f32.partialorder %v4780_v18, 0.0  ;;  %v1314_v52 = vmul.f32 0.5, %v4798_v41  ;;  %v1589_v37 = vsub.f32 1.0, %v1581_v17  ;;  %v6631_v27 = vld [vmem:[#allocation3_spill] sm:$0xff]  ;;  %v6632_v17 = vld [vmem:[#allocation4_spill] sm:$0xff] }
 0x290   : > { %v5090_v45 = vmul.f32 %v1617_v56, %v1313_v21  ;;  %1632 = vrot.lane.b32.xlu1 %v5085_v50, %s4071_s21  ;;  %1668 = vrot.lane.b32.xlu0 %v5085_v50, %s4072_s22  ;;  %v5101_v20 = vmul.f32 %v1619_v28, %v1315_v42  ;;  %v1612_v55 = vsel %vm1596_vm11, %v1588_v53, %v1604_v6  ;;  %vm1597_vm8 = vcmp.ge.f32.partialorder %v4783_v35, 0.0  ;;  %v6630_v53 = vld [vmem:[#allocation2_spill] sm:$0xff] }
 0x291   : > { %v1542_v11 = vmul.f32 %v1534_v7, %v5030_v47  ;;  %v1543_v46 = vmul.f32 %v1535_v48, %v5038_v4  ;;  %v3980_v62 = vpop.eup %3979  ;;  %v5105_v61 = vmul.f32 %v1618_v0, %v1314_v52  ;;  %v1620_v57 = vadd.f32 1.0, %v1612_v55 }
 0x292   : > { %1676 = vrot.lane.b32.xlu2 %v5090_v45, %s4072_s22  ;;  %v1605_v41 = vsub.f32 0.0, %v1589_v37  ;;  %v1316_v47 = vmul.f32 0.5, %v4773_v19  ;;  %v1317_v19 = vmul.f32 0.5, %v4777_v38  ;;  %vm1598_vm15 = vcmp.ge.f32.partialorder %v4836_v22, 0.0 }
 0x293   : > { %v1582_v24 = vmul.f32 %v3980_v62, %v1542_v11  ;;  %vm1599_vm4 = vcmp.ge.f32.partialorder %v4844_v23, 0.0  ;;  %v1318_v38 = vmul.f32 0.5, %v4822_v60  ;;  %v1319_v40 = vmul.f32 0.5, %v4828_v34 }
 0x294   : > { %v3982_v18 = vpop.eup %3981  ;;  %v5115_v4 = vmul.f32 %v1620_v57, %v1316_v47  ;;  %v1613_v13 = vsel %vm1597_vm8, %v1589_v37, %v1605_v41  ;;  %vm1705_vm1 = vcmask 261120   ;;  %vm6643_vm8 = vcmp.lt.s32.totalorder %v6630_v53, 15 }
 0x295   : > { %v1583_v1 = vmul.f32 %v3982_v18, %v1543_v46  ;;  %v1590_v49 = vsub.f32 1.0, %v1582_v24  ;;  %v1621_v33 = vadd.f32 1.0, %v1613_v13 }
 0x297   : > { %v1591_v26 = vsub.f32 1.0, %v1583_v1  ;;  %v1606_v29 = vsub.f32 0.0, %v1590_v49  ;;  %v5124_v35 = vmul.f32 %v1621_v33, %v1317_v19  ;;  %v3774_v1 = vld [vmem:[%s6503_s2 + $0x20] sm:$0xff]  ;;  %v6638_v33 = vld [vmem:[#allocation6_spill] sm:$0xff] }
 0x298   : > { %1678 = vrot.lane.b32.xlu1 %v5101_v20, %s4072_s22  ;;  %1640 = vrot.lane.b32.xlu0 %v5090_v45, %s4071_s21 }
 0x299   : > { %v1607_v39 = vsub.f32 0.0, %v1591_v26  ;;  %v1614_v2 = vsel %vm1598_vm15, %v1590_v49, %v1606_v29  ;;  %v6637_v49 = vld [vmem:[#allocation5_spill] sm:$0xff]  ;;  %vm6644_vm15 = vmmov %vm6643_vm8 }
 0x29a   : > { %1670 = vrot.lane.b32.xlu2 %v5105_v61, %s4072_s22  ;;  %v1622_v30 = vadd.f32 1.0, %v1614_v2 }
 0x29b   : > { %v1615_v63 = vsel %vm1599_vm4, %v1591_v26, %v1607_v39  ;;  %vm6645_vm4 = vmmov %vm6643_vm8 }
 0x29c   : > { %v1623_v44 = vadd.f32 1.0, %v1615_v63  ;;  %v5136_v22 = vmul.f32 %v1622_v30, %v1318_v38 }
 0x29e   : > { %v5138_v23 = vmul.f32 %v1623_v44, %v1319_v40 }
 0x2a0   : > { %1672 = vrot.lane.b32.xlu1 %v5115_v4, %s4072_s22  ;;  %1634 = vrot.lane.b32.xlu0 %v5105_v61, %s4071_s21 }
 0x2a2   : > { %1642 = vrot.lane.b32.xlu2 %v5101_v20, %s4071_s21 }
 0x2a8   : > { %1644 = vrot.lane.b32.xlu1 %v5124_v35, %s4071_s21  ;;  %1680 = vrot.lane.b32.xlu0 %v5124_v35, %s4072_s22 }
 0x2aa   : > { %1636 = vrot.lane.b32.xlu2 %v5115_v4, %s4071_s21 }
 0x2b0   : > { %1638 = vrot.lane.b32.xlu1 %v5136_v22, %s4071_s21  ;;  %1682 = vrot.lane.b32.xlu0 %v5138_v23, %s4072_s22 }
 0x2b2   : > { %1674 = vrot.lane.b32.xlu2 %v5136_v22, %s4072_s22 }
 0x2b8   : > { %1848 = vrot.lane.b32.xlu1 %v5105_v61, %s4073_s23  ;;  %1646 = vrot.lane.b32.xlu0 %v5138_v23, %s4071_s21 }
 0x2ba   : > { %1858 = vrot.lane.b32.xlu2 %v5124_v35, %s4073_s23 }
 0x2c0   : > { %1854 = vrot.lane.b32.xlu1 %v5090_v45, %s4073_s23  ;;  %1850 = vrot.lane.b32.xlu0 %v5115_v4, %s4073_s23 }
 0x2c2   : > { %1846 = vrot.lane.b32.xlu2 %v5085_v50, %s4073_s23 }
 0x2c8   : > { %1860 = vrot.lane.b32.xlu1 %v5138_v23, %s4073_s23  ;;  %1856 = vrot.lane.b32.xlu0 %v5101_v20, %s4073_s23 }
 0x2ca   : > { %1852 = vrot.lane.b32.xlu2 %v5136_v22, %s4073_s23 }
 0x2d0   : > { %1965 = vrot.lane.b32.xlu1 %v5115_v4, %s4074_s24  ;;  %1973 = vrot.lane.b32.xlu0 %v5124_v35, %s4074_s24 }
 0x2d2   : > { %1963 = vrot.lane.b32.xlu2 %v5105_v61, %s4074_s24 }
 0x2d8   : > { %1971 = vrot.lane.b32.xlu1 %v5101_v20, %s4074_s24  ;;  %1967 = vrot.lane.b32.xlu0 %v5136_v22, %s4074_s24 }
 0x2da   : > { %1975 = vrot.lane.b32.xlu2 %v5138_v23, %s4074_s24 }
 0x2e0   : > { %2171 = vrot.lane.b32.xlu1 %v5124_v35, %s4075_s25  ;;  %1961 = vrot.lane.b32.xlu0 %v5085_v50, %s4074_s24 }
 0x2e2   : > { %1969 = vrot.lane.b32.xlu2 %v5090_v45, %s4074_s24 }
 0x2e8   : > { %2159 = vrot.lane.b32.xlu1 %v5085_v50, %s4075_s25  ;;  %2161 = vrot.lane.b32.xlu0 %v5105_v61, %s4075_s25 }
 0x2ea   : > { %2163 = vrot.lane.b32.xlu2 %v5115_v4, %s4075_s25 }
 0x2ec   : > { %v1677_v60 = vpop.permute.xlu2 %1676 }
 0x2f0   : > { %2165 = vrot.lane.b32.xlu1 %v5136_v22, %s4075_s25  ;;  %2167 = vrot.lane.b32.xlu0 %v5090_v45, %s4075_s25 }
 0x2f2   : > { %2169 = vrot.lane.b32.xlu2 %v5101_v20, %s4075_s25 }
 0x2f4   : > { %v1671_v34 = vpop.permute.xlu2 %1670 }
 0x2f8   : > { %2276 = vrot.lane.b32.xlu1 %v5105_v61, %s4076_s26  ;;  %2173 = vrot.lane.b32.xlu0 %v5138_v23, %s4075_s25 }
 0x2fa   : > { %2286 = vrot.lane.b32.xlu2 %v5124_v35, %s4076_s26 }
 0x2fc   : > { %v5200_v43 = vpop.permute.xlu2 %1642 }
 0x300   : > { %2282 = vrot.lane.b32.xlu1 %v5090_v45, %s4076_s26  ;;  %2278 = vrot.lane.b32.xlu0 %v5115_v4, %s4076_s26 }
 0x302   : > { %2274 = vrot.lane.b32.xlu2 %v5085_v50, %s4076_s26  ;;  %v5208_v25 = vpop.permute.xlu1 %1632  ;;  %v1669_v8 = vpop.permute.xlu0 %1668 }
 0x303   : > { %v1688_v42 = vsel %vm332_vm10, %v1677_v60, %v1669_v8  ;;  %v1684_v37 = vsel %vm332_vm10, %v1669_v8, %v1677_v60 }
 0x304   : > { %v1637_v36 = vpop.permute.xlu2 %1636  ;;  %v1692_v46 = vmul.f32 %v1688_v42, %v6631_v27  ;;  %v1693_v57 = vmul.f32 %v1684_v37, %v6632_v17 }
 0x308   : > { %2288 = vrot.lane.b32.xlu1 %v5138_v23, %s4076_s26  ;;  %2284 = vrot.lane.b32.xlu0 %v5101_v20, %s4076_s26 }
 0x30a   : > { %2280 = vrot.lane.b32.xlu2 %v5136_v22, %s4076_s26  ;;  %v1679_v58 = vpop.permute.xlu1 %1678  ;;  %v5216_v51 = vpop.permute.xlu0 %1640 }
 0x30b   : > { %v1685_v7 = vsel %vm332_vm10, %v1671_v34, %v1679_v58  ;;  %v1689_v48 = vsel %vm332_vm10, %v1679_v58, %v1671_v34  ;;  %v1664_v58 = vld [vmem:[%s6503_s2] sm:$0xff] }
 0x30c   : > { %v1675_v59 = vpop.permute.xlu2 %1674  ;;  %v1694_v55 = vmul.f32 %v1689_v48, %v6631_v27  ;;  %v1695_v11 = vmul.f32 %v1685_v7, %v6632_v17 }
 0x310   : > { %2393 = vrot.lane.b32.xlu1 %v5115_v4, %s4077_s27  ;;  %2401 = vrot.lane.b32.xlu0 %v5124_v35, %s4077_s27 }
 0x312   : > { %2391 = vrot.lane.b32.xlu2 %v5105_v61, %s4077_s27  ;;  %v1673_v16 = vpop.permute.xlu1 %1672  ;;  %v1635_v31 = vpop.permute.xlu0 %1634 }
 0x314   : > { %v5224_v3 = vpop.permute.xlu2 %1858 }
 0x318   : > { %2399 = vrot.lane.b32.xlu1 %v5101_v20, %s4077_s27  ;;  %2395 = vrot.lane.b32.xlu0 %v5136_v22, %s4077_s27 }
 0x31a   : > { %2403 = vrot.lane.b32.xlu2 %v5138_v23, %s4077_s27  ;;  %v1645_v5 = vpop.permute.xlu1 %1644  ;;  %v1681_v10 = vpop.permute.xlu0 %1680 }
 0x31b   : > { %v1686_v54 = vsel %vm332_vm10, %v1673_v16, %v1681_v10  ;;  %v1690_v14 = vsel %vm332_vm10, %v1681_v10, %v1673_v16  ;;  %v3776_v10 = vld [vmem:[%s6503_s2 + $0x30] sm:$0xff] }
 0x31c   : > { %v5232_v9 = vpop.permute.xlu2 %1846  ;;  %v1696_v0 = vmul.f32 %v1690_v14, %v6631_v27  ;;  %v1697_v52 = vmul.f32 %v1686_v54, %v6632_v17  ;;  %v6648_v54 = vld [vmem:[#allocation8_spill] sm:$0xff] }
 0x320   : > { %2516 = vrot.lane.b32.xlu1 %v5124_v35, %s4078_s28  ;;  %2389 = vrot.lane.b32.xlu0 %v5085_v50, %s4077_s27 }
 0x322   : > { %2397 = vrot.lane.b32.xlu2 %v5090_v45, %s4077_s27  ;;  %v1639_v21 = vpop.permute.xlu1 %1638  ;;  %v1683_v56 = vpop.permute.xlu0 %1682 }
 0x323   : > { %v1687_v32 = vsel %vm332_vm10, %v1675_v59, %v1683_v56  ;;  %v1691_v15 = vsel %vm332_vm10, %v1683_v56, %v1675_v59  ;;  %vm6633_vm10 = vcmp.lt.s32.totalorder %v6630_v53, 17 }
 0x324   : > { %v5248_v12 = vpop.permute.xlu2 %1852  ;;  %v1698_v28 = vmul.f32 %v1691_v15, %v6631_v27  ;;  %v1699_v6 = vmul.f32 %v1687_v32, %v6632_v17  ;;  %vm6634_vm7 = vmmov %vm6633_vm10  ;;  %v6647_v32 = vld [vmem:[#allocation7_spill] sm:$0xff] }
 0x325   : > { %vm6635_vm14 = vmmov %vm6634_vm7 }
 0x326   : > { %1730 = vmatpush.msrb.mxu2 %v1698_v28  ;;  %1759 = vmatpush.msrb.mxu3 %v1699_v6  ;;  %v1650_v47 = vsel %vm6635_vm14, %v1637_v36, %v1645_v5  ;;  %vm6636_vm0 = vmmov %vm6634_vm7 }
 0x327   : > { %v1654_v13 = vsel %vm6636_vm0, %v1645_v5, %v1637_v36  ;;  %vm6639_vm12 = vmmov %vm6636_vm0  ;;  %v1661_v30 = vmul.f32 %v1650_v47, %v6638_v33  ;;  %v3775_v36 = vld [vmem:[%s6503_s2 + $0x28] sm:$0xff]  ;;  %v1667_v47 = vld [vmem:[%s6503_s2 + $0x18] sm:$0xff] }
 0x328   : > { %2510 = vrot.lane.b32.xlu1 %v5136_v22, %s4078_s28  ;;  %2506 = vrot.lane.b32.xlu0 %v5105_v61, %s4078_s28  ;;  %v1649_v19 = vsel %vm6639_vm12, %v1635_v31, %v5200_v43  ;;  %vm6640_vm13 = vmmov %vm6636_vm0  ;;  %v1660_v63 = vmul.f32 %v1654_v13, %v6637_v49 }
 0x329   : > { %1731 = vmatpush.msrb.mxu2 %v1696_v0  ;;  %1760 = vmatpush.msrb.mxu3 %v1697_v52  ;;  %v1653_v2 = vsel %vm6640_vm13, %v5200_v43, %v1635_v31  ;;  %vm6641_vm9 = vmmov %vm6636_vm0  ;;  %v1659_v60 = vmul.f32 %v1649_v19, %v6638_v33  ;;  %vm6653_vm13 = vcmp.lt.s32.totalorder %v6630_v53, 1 }
 0x32a   : > { %2508 = vrot.lane.b32.xlu2 %v5115_v4, %s4078_s28  ;;  %v1849_v62 = vpop.permute.xlu1 %1848  ;;  %v1647_v18 = vpop.permute.xlu0 %1646  ;;  %v1648_v44 = vsel %vm6641_vm9, %v5208_v25, %v5216_v51  ;;  %vm6642_vm11 = vmmov %vm6636_vm0  ;;  %v1658_v40 = vmul.f32 %v1653_v2, %v6637_v49  ;;  %v3795_v2 = vld [vmem:[%s6503_s2 + $0x48] sm:$0xff] }
 0x32b   : > { %1732 = vmatpush.msrb.mxu2 %v1694_v55  ;;  %1761 = vmatpush.msrb.mxu3 %v1695_v11  ;;  %v1651_v41 = vsel %vm6633_vm10, %v1639_v21, %v1647_v18  ;;  %v1655_v24 = vsel %vm6634_vm7, %v1647_v18, %v1639_v21  ;;  %v1652_v38 = vsel %vm6642_vm11, %v5216_v51, %v5208_v25  ;;  %vm6646_vm10 = vmmov %vm6645_vm4 }
 0x32c   : > { %v1662_v26 = vmul.f32 %v1655_v24, %v6637_v49  ;;  %v1663_v29 = vmul.f32 %v1651_v41, %v6638_v33  ;;  %v5285_v39 = vpop.permute.xlu2 %1963  ;;  %v1656_v8 = vmul.f32 %v1652_v38, %v6637_v49  ;;  %v1657_v25 = vmul.f32 %v1648_v44, %v6638_v33  ;;  %vm6649_vm7 = vmmov %vm6645_vm4  ;;  %v6657_v24 = vld [vmem:[#allocation10_spill] sm:$0xff] }
 0x32d   : > { %1733 = vmatpush.msrb.mxu2 %v1692_v46  ;;  %1762 = vmatpush.msrb.mxu3 %v1693_v57  ;;  %vm6650_vm14 = vmmov %vm6645_vm4  ;;  %v1666_v46 = vld [vmem:[%s6503_s2 + $0x10] sm:$0xff] }
 0x32e   : > { %3778 = vmatmul.msk.f32.vlgmr.msrb.gmra.mxu2 %vm1705_vm1, %v3774_v1  ;;  %3782 = vmatmul.msk.f32.vlgmr.msrb.gmra.mxu3 %vm1705_vm1, %v3774_v1  ;;  %vm6651_vm0 = vmmov %vm6645_vm4  ;;  %v6658_v1 = vld [vmem:[#allocation9_spill] sm:$0xff] }
 0x32f   : > { %1800 = vmatpush.msrb.mxu0 %v1662_v26  ;;  %1829 = vmatpush.msrb.mxu1 %v1663_v29  ;;  %vm6652_vm12 = vmmov %vm6651_vm0 }
 0x330   : > { %2504 = vrot.lane.b32.xlu1 %v5085_v50, %s4078_s28  ;;  %2518 = vrot.lane.b32.xlu0 %v5138_v23, %s4078_s28  ;;  %vm6654_vm9 = vmmov %vm6653_vm13 }
 0x331   : > { %1801 = vmatpush.msrb.mxu0 %v1660_v63  ;;  %1830 = vmatpush.msrb.mxu1 %v1661_v30  ;;  %vm6655_vm11 = vmmov %vm6654_vm9 }
 0x332   : > { %2514 = vrot.lane.b32.xlu2 %v5101_v20, %s4078_s28  ;;  %v1855_v34 = vpop.permute.xlu1 %1854  ;;  %v1851_v43 = vpop.permute.xlu0 %1850 }
 0x333   : > { %1802 = vmatpush.msrb.mxu0 %v1658_v40  ;;  %1831 = vmatpush.msrb.mxu1 %v1659_v60  ;;  %v1864_v21 = vsel %vm6645_vm4, %v1851_v43, %v5224_v3  ;;  %v1868_v56 = vsel %vm6646_vm10, %v5224_v3, %v1851_v43  ;;  %v1862_v6 = vsel %vm6651_vm0, %v5232_v9, %v1855_v34  ;;  %v3806_v40 = vld [vmem:[%s6503_s2 + $0x60] sm:$0xff]  ;;  %v3796_v43 = vld [vmem:[%s6503_s2 + $0x50] sm:$0xff] }
 0x334   : > { %v1976_v51 = vpop.permute.xlu2 %1975  ;;  %v1874_v3 = vmul.f32 %v1868_v56, %v6647_v32  ;;  %v1875_v17 = vmul.f32 %v1864_v21, %v6648_v54  ;;  %v1866_v7 = vsel %vm6652_vm12, %v1855_v34, %v5232_v9  ;;  %v1871_v11 = vmul.f32 %v1862_v6, %v6648_v54  ;;  %v3777_v9 = vld [vmem:[%s6503_s2 + $0x38] sm:$0xff]  ;;  %v3818_v56 = vld [vmem:[%s6503_s2 + $0x80] sm:$0xff] }
 0x335   : > { %1803 = vmatpush.msrb.mxu0 %v1656_v8  ;;  %1832 = vmatpush.msrb.mxu1 %v1657_v25  ;;  %v1870_v55 = vmul.f32 %v1866_v7, %v6647_v32  ;;  %v3807_v8 = vld [vmem:[%s6503_s2 + $0x68] sm:$0xff] }
 0x336   : > { %3779 = vmatmul.msk.f32.gmra.mxu2 %vm1705_vm1, %v3775_v36  ;;  %3783 = vmatmul.msk.f32.gmra.mxu3 %vm1705_vm1, %v3775_v36 }
 0x337   : > { %3786 = vmatmul.msk.f32.vlgmr.msrb.gmra.mxu0 %vm1705_vm1, %v1664_v58  ;;  %3790 = vmatmul.msk.f32.vlgmr.msrb.gmra.mxu1 %vm1705_vm1, %v1664_v58 }
 0x338   : > { %2512 = vrot.lane.b32.xlu0 %v5090_v45, %s4078_s28  ;;  %s3923_s28 = sshll.u32 %s6710_s16, 6 }
 0x339   : > { %s6066_s14 = scalar_lea.vmem %s6505_s4, %s3923_s28 }
 0x33a   : > { %v1861_v59 = vpop.permute.xlu1 %1860  ;;  %v1857_v16 = vpop.permute.xlu0 %1856 }
 0x33b   : > { %v1865_v31 = vsel %vm6643_vm8, %v5248_v12, %v1861_v59  ;;  %v1869_v5 = vsel %vm6644_vm15, %v1861_v59, %v5248_v12  ;;  %v1665_v12 = vld [vmem:[%s6503_s2 + $0x8] sm:$0xff]  ;;  %v1863_v27 = vsel %vm6649_vm7, %v1849_v62, %v1857_v16  ;;  %v1867_v28 = vsel %vm6650_vm14, %v1857_v16, %v1849_v62  ;;  %vm6656_vm8 = vmmov %vm6654_vm9  ;;  %v3808_v59 = vld [vmem:[%s6503_s2 + $0x70] sm:$0xff] }
 0x33c   : > { %v1876_v15 = vmul.f32 %v1869_v5, %v6647_v32  ;;  %v1877_v14 = vmul.f32 %v1865_v31, %v6648_v54  ;;  %v1970_v48 = vpop.permute.xlu2 %1969  ;;  %v1872_v42 = vmul.f32 %v1867_v28, %v6647_v32  ;;  %v1873_v0 = vmul.f32 %v1863_v27, %v6648_v54  ;;  %vm6659_vm15 = vmmov %vm6656_vm8  ;;  %v6667_v54 = vld [vmem:[#allocation11_spill] sm:$0xff]  ;;  %v3809_v28 = vld [vmem:[%s6503_s2 + $0x78] sm:$0xff] }
 0x33d   : > { %vm6660_vm4 = vmmov %vm6656_vm8  ;;  %vm6663_vm14 = vcmp.lt.s32.totalorder %v6630_v53, 127 }
 0x33e   : > { %3780 = vmatmul.msk.f32.gmra.mxu2 %vm1705_vm1, %v3776_v10  ;;  %3784 = vmatmul.msk.f32.gmra.mxu3 %vm1705_vm1, %v3776_v10  ;;  %vm6661_vm10 = vmmov %vm6660_vm4 }
 0x33f   : > { %1907 = vmatpush.msra.mxu2 %v1876_v15  ;;  %1936 = vmatpush.msra.mxu3 %v1877_v14  ;;  %vm6662_vm7 = vmmov %vm6660_vm4 }
 0x340   : > { %3787 = vmatmul.msk.f32.gmra.mxu0 %vm1705_vm1, %v1665_v12  ;;  %3791 = vmatmul.msk.f32.gmra.mxu1 %vm1705_vm1, %v1665_v12  ;;  %vm6664_vm0 = vmmov %vm6663_vm14  ;;  %v6668_v12 = vld [vmem:[#allocation12_spill] sm:$0xff] }
 0x341   : > { %1908 = vmatpush.msra.mxu2 %v1874_v3  ;;  %1937 = vmatpush.msra.mxu3 %v1875_v17  ;;  %vm6665_vm12 = vmmov %vm6664_vm0 }
 0x342   : > { %v1966_v52 = vpop.permute.xlu1 %1965  ;;  %v1974_v37 = vpop.permute.xlu0 %1973 }
 0x343   : > { %1909 = vmatpush.msra.mxu2 %v1872_v42  ;;  %1938 = vmatpush.msra.mxu3 %v1873_v0 }
 0x344   : > { %v5381_v57 = vpop.permute.xlu2 %2163 }
 0x345   : > { %1910 = vmatpush.msra.mxu2 %v1870_v55  ;;  %1939 = vmatpush.msra.mxu3 %v1871_v11 }
 0x346   : > { %3781 = vmatmul.msk.f32.gmra.mxu2 %vm1705_vm1, %v3777_v9  ;;  %3785 = vmatmul.msk.f32.gmra.mxu3 %vm1705_vm1, %v3777_v9 }
 0x347   : > { %2105 = vmatpush.msrb.mxu2 %v5136_v22  ;;  %2134 = vmatpush.msrb.mxu3 %v5138_v23  ;;  %v3794_v23 = vld [vmem:[%s6503_s2 + $0x40] sm:$0xff] }
 0x348   : > { %3788 = vmatmul.msk.f32.gmra.mxu0 %vm1705_vm1, %v1666_v46  ;;  %3792 = vmatmul.msk.f32.gmra.mxu1 %vm1705_vm1, %v1666_v46 }
 0x349   : > { %2106 = vmatpush.msrb.mxu2 %v5115_v4  ;;  %2135 = vmatpush.msrb.mxu3 %v5124_v35  ;;  %v1979_v4 = vsel %vm6654_vm9, %v1966_v52, %v1974_v37  ;;  %v1983_v35 = vsel %vm6655_vm11, %v1974_v37, %v1966_v52  ;;  %vm6669_vm9 = vmmov %vm6664_vm0 }
 0x34a   : > { %v1972_v62 = vpop.permute.xlu1 %1971  ;;  %v1968_v18 = vpop.permute.xlu0 %1967  ;;  %vm6670_vm11 = vmmov %vm6664_vm0 }
 0x34b   : > { %2107 = vmatpush.msrb.mxu2 %v5105_v61  ;;  %2136 = vmatpush.msrb.mxu3 %v5101_v20  ;;  %v1980_v22 = vsel %vm6653_vm13, %v1968_v18, %v1976_v51  ;;  %v1984_v41 = vsel %vm6656_vm8, %v1976_v51, %v1968_v18  ;;  %v1978_v13 = vsel %vm6659_vm15, %v5285_v39, %v1972_v62  ;;  %v3797_v51 = vld [vmem:[%s6503_s2 + $0x58] sm:$0xff]  ;;  %vm6666_vm13 = vmmov %vm6664_vm0  ;;  %v3830_v18 = vld [vmem:[%s6503_s2 + $0xa0] sm:$0xff] }
 0x34c   : > { %v1992_v61 = vmul.f32 %v1980_v22, %v6657_v24  ;;  %v1991_v20 = vmul.f32 %v1984_v41, %v6658_v1  ;;  %v1982_v49 = vsel %vm6660_vm4, %v1972_v62, %v5285_v39  ;;  %v1988_v33 = vmul.f32 %v1978_v13, %v6657_v24  ;;  %v2170_v44 = vpop.permute.xlu2 %2169  ;;  %vm6671_vm8 = vmmov %vm6664_vm0  ;;  %v3819_v62 = vld [vmem:[%s6503_s2 + $0x88] sm:$0xff] }
 0x34d   : > { %2108 = vmatpush.msrb.mxu2 %v5085_v50  ;;  %2137 = vmatpush.msrb.mxu3 %v5090_v45  ;;  %v1989_v50 = vmul.f32 %v1983_v35, %v6658_v1  ;;  %v1990_v45 = vmul.f32 %v1979_v4, %v6657_v24  ;;  %v1987_v26 = vmul.f32 %v1982_v49, %v6658_v1  ;;  %vm6672_vm15 = vmmov %vm6664_vm0  ;;  %vm6673_vm4 = vcmp.lt.s32.totalorder %v6630_v53, 113  ;;  %v3820_v35 = vld [vmem:[%s6503_s2 + $0x90] sm:$0xff]  ;;  %v3831_v49 = vld [vmem:[%s6503_s2 + $0xa8] sm:$0xff] }
 0x34e   : > { %3798 = vmatmul.msk.f32.vlgmr.msra.gmra.mxu2 %vm1705_vm1, %v3794_v23  ;;  %3802 = vmatmul.msk.f32.vlgmr.msra.gmra.mxu3 %vm1705_vm1, %v3794_v23 }
 0x34f   : > { %2022 = vmatpush.msra.mxu0 %v1991_v20  ;;  %2051 = vmatpush.msra.mxu1 %v1992_v61  ;;  %v6677_v61 = vld [vmem:[#allocation13_spill] sm:$0xff]  ;;  %v6678_v20 = vld [vmem:[#allocation14_spill] sm:$0xff] }
 0x350   : > { %3789 = vmatmul.msk.f32.gmra.mxu0 %vm1705_vm1, %v1667_v47  ;;  %3793 = vmatmul.msk.f32.gmra.mxu1 %vm1705_vm1, %v1667_v47 }
 0x351   : > { %2023 = vmatpush.msra.mxu0 %v1989_v50  ;;  %2052 = vmatpush.msra.mxu1 %v1990_v45 }
 0x352   : > { %v2172_v29 = vpop.permute.xlu1 %2171  ;;  %v1962_v39 = vpop.permute.xlu0 %1961 }
 0x353   : > { %2024 = vmatpush.msra.mxu0 %v1987_v26  ;;  %2053 = vmatpush.msra.mxu1 %v1988_v33  ;;  %v1977_v19 = vsel %vm6661_vm10, %v1962_v39, %v1970_v48  ;;  %v1981_v63 = vsel %vm6662_vm7, %v1970_v48, %v1962_v39  ;;  %v2177_v32 = vsel %vm6665_vm12, %v5381_v57, %v2172_v29  ;;  %vm6674_vm10 = vmmov %vm6673_vm4 }
 0x354   : > { %v1986_v30 = vmul.f32 %v1977_v19, %v6657_v24  ;;  %v1985_v38 = vmul.f32 %v1981_v63, %v6658_v1  ;;  %v2287_v25 = vpop.permute.xlu2 %2286  ;;  %v2181_v15 = vsel %vm6666_vm13, %v2172_v29, %v5381_v57  ;;  %v2187_v6 = vmul.f32 %v2177_v32, %v6667_v54  ;;  %vm6675_vm7 = vmmov %vm6673_vm4 }
 0x355   : > { %v2188_v7 = vmul.f32 %v2181_v15, %v6668_v12 }
 0x356   : > { %3799 = vmatmul.msk.f32.gmra.mxu2 %vm1705_vm1, %v3795_v2  ;;  %3803 = vmatmul.msk.f32.gmra.mxu3 %vm1705_vm1, %v3795_v2 }
 0x357   : > { %2025 = vmatpush.msra.mxu0 %v1985_v38  ;;  %2054 = vmatpush.msra.mxu1 %v1986_v30 }
 0x358   : > { %3810 = vmatmul.msk.f32.vlgmr.msra.gmra.mxu0 %vm1705_vm1, %v3806_v40  ;;  %3814 = vmatmul.msk.f32.vlgmr.msra.gmra.mxu1 %vm1705_vm1, %v3806_v40  ;;  %v3821_v40 = vld [vmem:[%s6503_s2 + $0x98] sm:$0xff] }
 0x35a   : > { %v2160_v60 = vpop.permute.xlu1 %2159  ;;  %v2162_v34 = vpop.permute.xlu0 %2161 }
 0x35b   : > { %v2176_v3 = vsel %vm6669_vm9, %v2162_v34, %v2170_v44  ;;  %v2180_v17 = vsel %vm6670_vm11, %v2170_v44, %v2162_v34 }
 0x35c   : > { %v5453_v16 = vpop.permute.xlu2 %2274  ;;  %v2185_v0 = vmul.f32 %v2176_v3, %v6667_v54  ;;  %v2186_v52 = vmul.f32 %v2180_v17, %v6668_v12  ;;  %v3843_v17 = vld [vmem:[%s6503_s2 + $0xc8] sm:$0xff] }
 0x35e   : > { %3800 = vmatmul.msk.f32.gmra.mxu2 %vm1705_vm1, %v3796_v43  ;;  %3804 = vmatmul.msk.f32.gmra.mxu3 %vm1705_vm1, %v3796_v43 }
 0x360   : > { %3811 = vmatmul.msk.f32.gmra.mxu0 %vm1705_vm1, %v3807_v8  ;;  %3815 = vmatmul.msk.f32.gmra.mxu1 %vm1705_vm1, %v3807_v8 }
 0x362   : > { %v2166_v36 = vpop.permute.xlu1 %2165  ;;  %v2168_v58 = vpop.permute.xlu0 %2167 }
 0x363   : > { %v2175_v48 = vsel %vm6671_vm8, %v2160_v60, %v2168_v58  ;;  %v2179_v42 = vsel %vm6672_vm15, %v2168_v58, %v2160_v60  ;;  %v3832_v60 = vld [vmem:[%s6503_s2 + $0xb0] sm:$0xff]  ;;  %v3842_v58 = vld [vmem:[%s6503_s2 + $0xc0] sm:$0xff] }
 0x364   : > { %v2281_v11 = vpop.permute.xlu2 %2280  ;;  %v2183_v9 = vmul.f32 %v2175_v48, %v6667_v54  ;;  %v2184_v46 = vmul.f32 %v2179_v42, %v6668_v12  ;;  %v3854_v42 = vld [vmem:[%s6503_s2 + $0xe0] sm:$0xff] }
 0x366   : > { %3801 = vmatmul.msk.f32.gmra.mxu2 %vm1705_vm1, %v3797_v51  ;;  %3805 = vmatmul.msk.f32.gmra.mxu3 %vm1705_vm1, %v3797_v51 }
 0x368   : > { %3812 = vmatmul.msk.f32.gmra.mxu0 %vm1705_vm1, %v3808_v59  ;;  %3816 = vmatmul.msk.f32.gmra.mxu1 %vm1705_vm1, %v3808_v59 }
 0x36a   : > { %v2277_v31 = vpop.permute.xlu1 %2276  ;;  %v2174_v5 = vpop.permute.xlu0 %2173 }
 0x36b   : > { %v2178_v10 = vsel %vm6663_vm14, %v2166_v36, %v2174_v5  ;;  %v2182_v21 = vsel %vm6664_vm0, %v2174_v5, %v2166_v36  ;;  %vm6676_vm14 = vmmov %vm6673_vm4  ;;  %v6684_v5 = vld [vmem:[#allocation16_spill] sm:$0xff] }
 0x36c   : > { %v2189_v14 = vmul.f32 %v2178_v10, %v6667_v54  ;;  %v2190_v27 = vmul.f32 %v2182_v21, %v6668_v12  ;;  %v2392_v13 = vpop.permute.xlu2 %2391  ;;  %vm6679_vm0 = vmmov %vm6673_vm4  ;;  %v3833_v21 = vld [vmem:[%s6503_s2 + $0xb8] sm:$0xff] }
 0x36d   : > { %vm6680_vm12 = vmmov %vm6679_vm0 }
 0x36e   : > { %3822 = vmatmul.msk.f32.vlgmr.msrb.gmra.mxu2 %vm1705_vm1, %v3818_v56  ;;  %3826 = vmatmul.msk.f32.vlgmr.msrb.gmra.mxu3 %vm1705_vm1, %v3818_v56  ;;  %vm6681_vm13 = vmmov %vm6679_vm0 }
 0x36f   : > { %2220 = vmatpush.msrb.mxu0 %v2189_v14  ;;  %2249 = vmatpush.msrb.mxu1 %v2190_v27  ;;  %vm6682_vm9 = vmmov %vm6679_vm0 }
 0x370   : > { %3813 = vmatmul.msk.f32.gmra.mxu0 %vm1705_vm1, %v3809_v28  ;;  %3817 = vmatmul.msk.f32.gmra.mxu1 %vm1705_vm1, %v3809_v28 }
 0x371   : > { %2221 = vmatpush.msrb.mxu0 %v2187_v6  ;;  %2250 = vmatpush.msrb.mxu1 %v2188_v7 }
 0x372   : > { %v2283_v37 = vpop.permute.xlu1 %2282  ;;  %v2279_v55 = vpop.permute.xlu0 %2278 }
 0x373   : > { %2222 = vmatpush.msrb.mxu0 %v2185_v0  ;;  %2251 = vmatpush.msrb.mxu1 %v2186_v52  ;;  %v2292_v41 = vsel %vm6675_vm7, %v2279_v55, %v2287_v25  ;;  %v2296_v24 = vsel %vm6676_vm14, %v2287_v25, %v2279_v55  ;;  %v2290_v29 = vsel %vm6681_vm13, %v5453_v16, %v2283_v37  ;;  %v3052_v52 = vld.sshfl [vmem:[#allocation1] sm:$0xff pattern:$0x75316420] }
 0x374   : > { %v2302_v26 = vmul.f32 %v2292_v41, %v6677_v61  ;;  %v2303_v33 = vmul.f32 %v2296_v24, %v6678_v20  ;;  %v2294_v39 = vsel %vm6682_vm9, %v2283_v37, %v5453_v16  ;;  %v2298_v44 = vmul.f32 %v2290_v29, %v6677_v61  ;;  %v2404_v34 = vpop.permute.xlu2 %2403  ;;  %v6683_v16 = vld [vmem:[#allocation15_spill] sm:$0xff]  ;;  %v3053_v37 = vld.sshfl [vmem:[#allocation1 + $0x8] sm:$0xff pattern:$0x75316420]  ;;  %v6685_v41 = vld [vmem:[#allocation17_spill] sm:$0xff] }
 0x375   : > { %2223 = vmatpush.msrb.mxu0 %v2183_v9  ;;  %2252 = vmatpush.msrb.mxu1 %v2184_v46  ;;  %v2299_v38 = vmul.f32 %v2294_v39, %v6678_v20  ;;  %v3844_v9 = vld [vmem:[%s6503_s2 + $0xd0] sm:$0xff]  ;;  %v3855_v46 = vld [vmem:[%s6503_s2 + $0xe8] sm:$0xff] }
 0x376   : > { %3823 = vmatmul.msk.f32.gmra.mxu2 %vm1705_vm1, %v3819_v62  ;;  %3827 = vmatmul.msk.f32.gmra.mxu3 %vm1705_vm1, %v3819_v62 }
 0x378   : > { %3834 = vmatmul.msk.f32.vlgmr.msrb.gmra.mxu0 %vm1705_vm1, %v3830_v18  ;;  %3838 = vmatmul.msk.f32.vlgmr.msrb.gmra.mxu1 %vm1705_vm1, %v3830_v18 }
 0x37a   : > { %v2289_v57 = vpop.permute.xlu1 %2288  ;;  %v2285_v22 = vpop.permute.xlu0 %2284 }
 0x37b   : > { %v2293_v23 = vsel %vm6673_vm4, %v2281_v11, %v2289_v57  ;;  %v2297_v4 = vsel %vm6674_vm10, %v2289_v57, %v2281_v11  ;;  %v2291_v50 = vsel %vm6679_vm0, %v2277_v31, %v2285_v22  ;;  %v2295_v45 = vsel %vm6680_vm12, %v2285_v22, %v2277_v31 }
 0x37c   : > { %v2304_v1 = vmul.f32 %v2293_v23, %v6677_v61  ;;  %v2305_v47 = vmul.f32 %v2297_v4, %v6678_v20  ;;  %v2300_v19 = vmul.f32 %v2291_v50, %v6677_v61  ;;  %v2301_v2 = vmul.f32 %v2295_v45, %v6678_v20  ;;  %v2398_v14 = vpop.permute.xlu2 %2397  ;;  %v3845_v23 = vld [vmem:[%s6503_s2 + $0xd8] sm:$0xff]  ;;  %v6686_v61 = vld [vmem:[#allocation18_spill] sm:$0xff] }
 0x37e   : > { %3824 = vmatmul.msk.f32.gmra.mxu2 %vm1705_vm1, %v3820_v35  ;;  %3828 = vmatmul.msk.f32.gmra.mxu3 %vm1705_vm1, %v3820_v35 }
 0x37f   : > { %2335 = vmatpush.msra.mxu2 %v2304_v1  ;;  %2364 = vmatpush.msra.mxu3 %v2305_v47  ;;  %v3856_v47 = vld [vmem:[%s6503_s2 + $0xf0] sm:$0xff] }
 0x380   : > { %3835 = vmatmul.msk.f32.gmra.mxu0 %vm1705_vm1, %v3831_v49  ;;  %3839 = vmatmul.msk.f32.gmra.mxu1 %vm1705_vm1, %v3831_v49 }
 0x381   : > { %2336 = vmatpush.msra.mxu2 %v2302_v26  ;;  %2365 = vmatpush.msra.mxu3 %v2303_v33 }
 0x382   : > { %v2394_v63 = vpop.permute.xlu1 %2393  ;;  %v2402_v30 = vpop.permute.xlu0 %2401 }
 0x383   : > { %2337 = vmatpush.msra.mxu2 %v2300_v19  ;;  %2366 = vmatpush.msra.mxu3 %v2301_v2  ;;  %v2407_v51 = vsel %vm1007_vm3, %v2394_v63, %v2402_v30  ;;  %v2411_v59 = vsel %vm1007_vm3, %v2402_v30, %v2394_v63 }
 0x384   : > { %v2417_v15 = vmul.f32 %v2407_v51, %v6683_v16  ;;  %v2418_v54 = vmul.f32 %v2411_v59, %v6684_v5  ;;  %v2509_v11 = vpop.permute.xlu2 %2508  ;;  %v3868_v59 = vld [vmem:[%s6503_s2 + $0x110] sm:$0xff] }
 0x385   : > { %2338 = vmatpush.msra.mxu2 %v2298_v44  ;;  %2367 = vmatpush.msra.mxu3 %v2299_v38  ;;  %v3866_v44 = vld [vmem:[%s6503_s2 + $0x100] sm:$0xff]  ;;  %v3857_v38 = vld [vmem:[%s6503_s2 + $0xf8] sm:$0xff] }
 0x386   : > { %3825 = vmatmul.msk.f32.gmra.mxu2 %vm1705_vm1, %v3821_v40  ;;  %3829 = vmatmul.msk.f32.gmra.mxu3 %vm1705_vm1, %v3821_v40 }
 0x388   : > { %3836 = vmatmul.msk.f32.gmra.mxu0 %vm1705_vm1, %v3832_v60  ;;  %3840 = vmatmul.msk.f32.gmra.mxu1 %vm1705_vm1, %v3832_v60 }
 0x38a   : > { %v2396_v43 = vpop.permute.xlu0 %2395  ;;  %v2400_v8 = vpop.permute.xlu1 %2399 }
 0x38b   : > { %v2408_v25 = vsel %vm1007_vm3, %v2396_v43, %v2404_v34  ;;  %v2412_v36 = vsel %vm1007_vm3, %v2404_v34, %v2396_v43  ;;  %v2406_v56 = vsel %vm1007_vm3, %v2392_v13, %v2400_v8  ;;  %v2410_v32 = vsel %vm1007_vm3, %v2400_v8, %v2392_v13  ;;  %v3867_v43 = vld [vmem:[%s6503_s2 + $0x108] sm:$0xff] }
 0x38c   : > { %v2419_v31 = vmul.f32 %v2408_v25, %v6683_v16  ;;  %v2420_v10 = vmul.f32 %v2412_v36, %v6684_v5  ;;  %v2415_v12 = vmul.f32 %v2406_v56, %v6683_v16  ;;  %v2416_v27 = vmul.f32 %v2410_v32, %v6684_v5  ;;  %v2515_v20 = vpop.permute.xlu2 %2514  ;;  %v3047_v36 = vld [vmem:[%s6504_s3] sm:$0xff] }
 0x38e   : > { %3846 = vmatmul.msk.f32.vlgmr.msra.gmra.mxu2 %vm1705_vm1, %v3842_v58  ;;  %3850 = vmatmul.msk.f32.vlgmr.msra.gmra.mxu3 %vm1705_vm1, %v3842_v58 }
 0x38f   : > { %2450 = vmatpush.msra.mxu0 %v2419_v31  ;;  %2479 = vmatpush.msra.mxu1 %v2420_v10 }
 0x390   : > { %3837 = vmatmul.msk.f32.gmra.mxu0 %vm1705_vm1, %v3833_v21  ;;  %3841 = vmatmul.msk.f32.gmra.mxu1 %vm1705_vm1, %v3833_v21 }
 0x391   : > { %2451 = vmatpush.msra.mxu0 %v2417_v15  ;;  %2480 = vmatpush.msra.mxu1 %v2418_v54  ;;  %v3869_v15 = vld [vmem:[%s6503_s2 + $0x118] sm:$0xff] }
 0x392   : > { %v2390_v28 = vpop.permute.xlu0 %2389  ;;  %v2517_v0 = vpop.permute.xlu1 %2516 }
 0x393   : > { %2452 = vmatpush.msra.mxu0 %v2415_v12  ;;  %2481 = vmatpush.msra.mxu1 %v2416_v27  ;;  %v2405_v3 = vsel %vm1007_vm3, %v2390_v28, %v2398_v14  ;;  %v2409_v6 = vsel %vm1007_vm3, %v2398_v14, %v2390_v28  ;;  %v2522_v4 = vsel %vm1110_vm2, %v2509_v11, %v2517_v0  ;;  %v3049_v12 = vld [vmem:[%s6504_s3 + $0x10] sm:$0xff] }
 0x394   : > { %v2413_v7 = vmul.f32 %v2405_v3, %v6683_v16  ;;  %v2414_v48 = vmul.f32 %v2409_v6, %v6684_v5  ;;  %v2526_v35 = vsel %vm1110_vm2, %v2517_v0, %v2509_v11  ;;  %v2532_v50 = vmul.f32 %v2522_v4, %v6685_v41  ;;  %v3048_v5 = vld [vmem:[%s6504_s3 + $0x8] sm:$0xff] }
 0x395   : > { %v2533_v45 = vmul.f32 %v2526_v35, %v6686_v61 }
 0x396   : > { %3847 = vmatmul.msk.f32.gmra.mxu2 %vm1705_vm1, %v3843_v17  ;;  %3851 = vmatmul.msk.f32.gmra.mxu3 %vm1705_vm1, %v3843_v17 }
 0x397   : > { %2453 = vmatpush.msra.mxu0 %v2413_v7  ;;  %2482 = vmatpush.msra.mxu1 %v2414_v48  ;;  %v3050_v48 = vld [vmem:[%s6504_s3 + $0x18] sm:$0xff] }
 0x398   : > { %3858 = vmatmul.msk.f32.vlgmr.msra.gmra.mxu0 %vm1705_vm1, %v3854_v42  ;;  %3862 = vmatmul.msk.f32.vlgmr.msra.gmra.mxu1 %vm1705_vm1, %v3854_v42 }
 0x399   : > { %3894 = vmatpush.msk.msrb.mxu0 %vm355_vm6, %v3052_v52  ;;  %3899 = vmatpush.msk.msrb.mxu1 %vm355_vm6, %v3053_v37 }
 0x39a   : > { %v2507_v55 = vpop.permute.xlu0 %2506  ;;  %v2511_v62 = vpop.permute.xlu1 %2510 }
 0x39b   : > { %v2521_v13 = vsel %vm1110_vm2, %v2507_v55, %v2515_v20  ;;  %v2525_v49 = vsel %vm1110_vm2, %v2515_v20, %v2507_v55 }
 0x39c   : > { %v2530_v26 = vmul.f32 %v2521_v13, %v6685_v41  ;;  %v2531_v33 = vmul.f32 %v2525_v49, %v6686_v61 }
 0x39e   : > { %3848 = vmatmul.msk.f32.gmra.mxu2 %vm1705_vm1, %v3844_v9  ;;  %3852 = vmatmul.msk.f32.gmra.mxu3 %vm1705_vm1, %v3844_v9 }
 0x3a0   : > { %3859 = vmatmul.msk.f32.gmra.mxu0 %vm1705_vm1, %v3855_v46  ;;  %3863 = vmatmul.msk.f32.gmra.mxu1 %vm1705_vm1, %v3855_v46 }
 0x3a2   : > { %v2519_v18 = vpop.permute.xlu0 %2518  ;;  %v2505_v29 = vpop.permute.xlu1 %2504 }
 0x3a3   : > { %v2523_v57 = vsel %vm1110_vm2, %v2511_v62, %v2519_v18  ;;  %v2527_v22 = vsel %vm1110_vm2, %v2519_v18, %v2511_v62 }
 0x3a4   : > { %v2534_v24 = vmul.f32 %v2523_v57, %v6685_v41  ;;  %v2535_v1 = vmul.f32 %v2527_v22, %v6686_v61 }
 0x3a6   : > { %3849 = vmatmul.msk.f32.gmra.mxu2 %vm1705_vm1, %v3845_v23  ;;  %3853 = vmatmul.msk.f32.gmra.mxu3 %vm1705_vm1, %v3845_v23 }
 0x3a7   : > { %2565 = vmatpush.msrb.mxu2 %v2534_v24  ;;  %2594 = vmatpush.msrb.mxu3 %v2535_v1 }
 0x3a8   : > { %3860 = vmatmul.msk.f32.gmra.mxu0 %vm1705_vm1, %v3856_v47  ;;  %3864 = vmatmul.msk.f32.gmra.mxu1 %vm1705_vm1, %v3856_v47 }
 0x3a9   : > { %2566 = vmatpush.msrb.mxu2 %v2532_v50  ;;  %2595 = vmatpush.msrb.mxu3 %v2533_v45 }
 0x3aa   : > { %v2513_v39 = vpop.permute.xlu0 %2512 }
 0x3ab   : > { %2567 = vmatpush.msrb.mxu2 %v2530_v26  ;;  %2596 = vmatpush.msrb.mxu3 %v2531_v33  ;;  %v2520_v19 = vsel %vm1110_vm2, %v2505_v29, %v2513_v39  ;;  %v2524_v2 = vsel %vm1110_vm2, %v2513_v39, %v2505_v29 }
 0x3ac   : > { %v2528_v63 = vmul.f32 %v2520_v19, %v6685_v41  ;;  %v2529_v30 = vmul.f32 %v2524_v2, %v6686_v61 }
 0x3ae   : > { %2568 = vmatpush.msrb.mxu2 %v2528_v63  ;;  %2597 = vmatpush.msrb.mxu3 %v2529_v30 }
 0x3af   : > { %3870 = vmatmul.msk.f32.vlgmr.msrb.gmra.mxu2 %vm1705_vm1, %v3866_v44  ;;  %3874 = vmatmul.msk.f32.vlgmr.msrb.gmra.mxu3 %vm1705_vm1, %v3866_v44 }
 0x3b0   : > { %3861 = vmatmul.msk.f32.gmra.mxu0 %vm1705_vm1, %v3857_v38  ;;  %3865 = vmatmul.msk.f32.gmra.mxu1 %vm1705_vm1, %v3857_v38 }
 0x3b1   : > { %v1735_v53 = vpop.f32.mrf.mxu2  ;;  %v1764_v40 = vpop.f32.mrf.mxu3 }
 0x3b4   : > { %v1805_v60 = vpop.f32.mrf.mxu0  ;;  %v1834_v34 = vpop.f32.mrf.mxu1 }
 0x3b5   : > { %v1806_v8 = vadd.f32 %v1805_v60, %v1735_v53  ;;  %v1835_v25 = vadd.f32 %v1834_v34, %v1764_v40 }
 0x3b7   : > { %3871 = vmatmul.msk.f32.gmra.mxu2 %vm1705_vm1, %v3867_v43  ;;  %3875 = vmatmul.msk.f32.gmra.mxu3 %vm1705_vm1, %v3867_v43 }
 0x3b8   : > { %3895 = vmatmul.msk.f32.vlgmr.msrb.gmra.mxu0 %vm342_vm5, %v3047_v36  ;;  %3900 = vmatmul.msk.f32.vlgmr.msrb.gmra.mxu1 %vm342_vm5, %v3047_v36 }
 0x3b9   : > { %v1738_v58 = vpop.f32.mrf.mxu2  ;;  %v1767_v51 = vpop.f32.mrf.mxu3 }
 0x3bd   : > { %v1808_v16 = vpop.f32.mrf.mxu0  ;;  %v1837_v31 = vpop.f32.mrf.mxu1 }
 0x3be   : > { %v1809_v10 = vadd.f32 %v1808_v16, %v1738_v58  ;;  %v1838_v21 = vadd.f32 %v1837_v31, %v1767_v51 }
 0x3bf   : > { %3872 = vmatmul.msk.f32.gmra.mxu2 %vm1705_vm1, %v3868_v59  ;;  %3876 = vmatmul.msk.f32.gmra.mxu3 %vm1705_vm1, %v3868_v59 }
 0x3c0   : > { %3896 = vmatmul.msk.f32.gmra.mxu0 %vm342_vm5, %v3048_v5  ;;  %3901 = vmatmul.msk.f32.gmra.mxu1 %vm342_vm5, %v3048_v5 }
 0x3c1   : > { %v1741_v56 = vpop.f32.mrf.mxu2  ;;  %v1770_v32 = vpop.f32.mrf.mxu3 }
 0x3c5   : > { %v1811_v54 = vpop.f32.mrf.mxu0  ;;  %v1840_v14 = vpop.f32.mrf.mxu1 }
 0x3c6   : > { %v1812_v27 = vadd.f32 %v1811_v54, %v1741_v56  ;;  %v1841_v28 = vadd.f32 %v1840_v14, %v1770_v32 }
 0x3c7   : > { %3873 = vmatmul.msk.f32.gmra.mxu2 %vm1705_vm1, %v3869_v15  ;;  %3877 = vmatmul.msk.f32.gmra.mxu3 %vm1705_vm1, %v3869_v15 }
 0x3c8   : > { %3897 = vmatmul.msk.f32.gmra.mxu0 %vm342_vm5, %v3049_v12  ;;  %3902 = vmatmul.msk.f32.gmra.mxu1 %vm342_vm5, %v3049_v12 }
 0x3c9   : > { %v1744_v3 = vpop.f32.mrf.mxu2  ;;  %v1773_v17 = vpop.f32.mrf.mxu3 }
 0x3cd   : > { %v1814_v6 = vpop.f32.mrf.mxu0  ;;  %v1843_v7 = vpop.f32.mrf.mxu1 }
 0x3ce   : > { %v1815_v42 = vadd.f32 %v1814_v6, %v1744_v3  ;;  %v1844_v0 = vadd.f32 %v1843_v7, %v1773_v17 }
 0x3d0   : > { %3898 = vmatmul.msk.f32.gmra.mxu0 %vm342_vm5, %v3050_v48  ;;  %3903 = vmatmul.msk.f32.gmra.mxu1 %vm342_vm5, %v3050_v48 }
 0x3d1   : > { %v1912_v52 = vpop.f32.mrf.mxu2  ;;  %v1941_v37 = vpop.f32.mrf.mxu3 }
 0x3d2   : > { %v1953_v55 = vadd.f32 %v1912_v52, %v1806_v8  ;;  %v1954_v11 = vadd.f32 %v1941_v37, %v1835_v25 }
 0x3d5   : > { %v2027_v9 = vpop.f32.mrf.mxu0  ;;  %v2056_v46 = vpop.f32.mrf.mxu1 }
 0x3d6   : > { %v2068_v62 = vadd.f32 %v2027_v9, %v1953_v55  ;;  %v2069_v18 = vadd.f32 %v2056_v46, %v1954_v11 }
 0x3d9   : > { %v1915_v57 = vpop.f32.mrf.mxu2  ;;  %v1944_v22 = vpop.f32.mrf.mxu3 }
 0x3da   : > { %v1955_v23 = vadd.f32 %v1915_v57, %v1809_v10  ;;  %v1956_v4 = vadd.f32 %v1944_v22, %v1838_v21 }
 0x3dd   : > { %v2030_v35 = vpop.f32.mrf.mxu0  ;;  %v2059_v41 = vpop.f32.mrf.mxu1 }
 0x3de   : > { %v2070_v24 = vadd.f32 %v2030_v35, %v1955_v23  ;;  %v2071_v61 = vadd.f32 %v2059_v41, %v1956_v4 }
 0x3e1   : > { %v1918_v1 = vpop.f32.mrf.mxu2  ;;  %v1947_v20 = vpop.f32.mrf.mxu3 }
 0x3e2   : > { %v1957_v47 = vadd.f32 %v1918_v1, %v1812_v27  ;;  %v1958_v13 = vadd.f32 %v1947_v20, %v1841_v28 }
 0x3e5   : > { %v2033_v49 = vpop.f32.mrf.mxu0  ;;  %v2062_v50 = vpop.f32.mrf.mxu1 }
 0x3e6   : > { %v2072_v45 = vadd.f32 %v2033_v49, %v1957_v47  ;;  %v2073_v26 = vadd.f32 %v2062_v50, %v1958_v13 }
 0x3e9   : > { %v1921_v33 = vpop.f32.mrf.mxu2  ;;  %v1950_v29 = vpop.f32.mrf.mxu3 }
 0x3ea   : > { %v1959_v39 = vadd.f32 %v1921_v33, %v1815_v42  ;;  %v1960_v19 = vadd.f32 %v1950_v29, %v1844_v0 }
 0x3ed   : > { %v2036_v2 = vpop.f32.mrf.mxu0  ;;  %v2065_v63 = vpop.f32.mrf.mxu1 }
 0x3ee   : > { %v5682_v30 = vadd.f32 %v2036_v2, %v1959_v39  ;;  %v5684_v44 = vadd.f32 %v2065_v63, %v1960_v19 }
 0x3f1   : > { %v2110_v38 = vpop.f32.mrf.mxu2  ;;  %v2139_v53 = vpop.f32.mrf.mxu3 }
 0x3f2   : > { %v2151_v40 = vadd.f32 %v2110_v38, %v2068_v62  ;;  %v2152_v60 = vadd.f32 %v2139_v53, %v2069_v18 }
 0x3f5   : > { %v2225_v34 = vpop.f32.mrf.mxu0  ;;  %v2254_v43 = vpop.f32.mrf.mxu1 }
 0x3f6   : > { %v2266_v8 = vadd.f32 %v2225_v34, %v2151_v40  ;;  %v2267_v25 = vadd.f32 %v2254_v43, %v2152_v60 }
 0x3f9   : > { %v2113_v36 = vpop.f32.mrf.mxu2  ;;  %v2142_v58 = vpop.f32.mrf.mxu3 }
 0x3fa   : > { %v2153_v23 = vadd.f32 %v2113_v36, %v2070_v24  ;;  %v2154_v4 = vadd.f32 %v2142_v58, %v2071_v61 }
 0x3fd   : > { %v2228_v51 = vpop.f32.mrf.mxu0  ;;  %v2257_v59 = vpop.f32.mrf.mxu1 }
 0x3fe   : > { %v2268_v35 = vadd.f32 %v2228_v51, %v2153_v23  ;;  %v2269_v41 = vadd.f32 %v2257_v59, %v2154_v4 }
 0x401   : > { %v2116_v16 = vpop.f32.mrf.mxu2  ;;  %v2145_v31 = vpop.f32.mrf.mxu3 }
 0x402   : > { %v2155_v5 = vadd.f32 %v2116_v16, %v2072_v45  ;;  %v2156_v10 = vadd.f32 %v2145_v31, %v2073_v26 }
 0x405   : > { %v2231_v21 = vpop.f32.mrf.mxu0  ;;  %v2260_v56 = vpop.f32.mrf.mxu1 }
 0x406   : > { %v5686_v32 = vadd.f32 %v2231_v21, %v2155_v5  ;;  %v5688_v15 = vadd.f32 %v2260_v56, %v2156_v10 }
 0x409   : > { %v2119_v54 = vpop.f32.mrf.mxu2  ;;  %v2148_v14 = vpop.f32.mrf.mxu3 }
 0x40a   : > { %v2157_v31 = vadd.f32 %v2119_v54, %v5682_v30  ;;  %v2158_v5 = vadd.f32 %v2148_v14, %v5684_v44 }
 0x40d   : > { %v5690_v12 = vpop.f32.mrf.mxu0  ;;  %v5692_v27 = vpop.f32.mrf.mxu1 }
 0x411   : > { %v2340_v28 = vpop.f32.mrf.mxu2  ;;  %v2369_v3 = vpop.f32.mrf.mxu3 }
 0x412   : > { %v2381_v26 = vadd.f32 %v2340_v28, %v2266_v8  ;;  %v2382_v24 = vadd.f32 %v2369_v3, %v2267_v25 }
 0x415   : > { %v2455_v17 = vpop.f32.mrf.mxu0  ;;  %v2484_v6 = vpop.f32.mrf.mxu1 }
 0x416   : > { %v2496_v39 = vadd.f32 %v2455_v17, %v2381_v26  ;;  %v2497_v19 = vadd.f32 %v2484_v6, %v2382_v24  ;;  %v2272_v6 = vadd.f32 %v5690_v12, %v2157_v31 }
 0x419   : > { %v2343_v7 = vpop.f32.mrf.mxu2  ;;  %v2372_v48 = vpop.f32.mrf.mxu3 }
 0x41a   : > { %v2383_v50 = vadd.f32 %v2343_v7, %v2268_v35  ;;  %v2384_v45 = vadd.f32 %v2372_v48, %v2269_v41  ;;  %v2273_v7 = vadd.f32 %v5692_v27, %v2158_v5 }
 0x41d   : > { %v2458_v42 = vpop.f32.mrf.mxu0  ;;  %v2487_v0 = vpop.f32.mrf.mxu1 }
 0x41e   : > { %v2498_v33 = vadd.f32 %v2458_v42, %v2383_v50  ;;  %v2499_v29 = vadd.f32 %v2487_v0, %v2384_v45 }
 0x421   : > { %v2346_v52 = vpop.f32.mrf.mxu2  ;;  %v2375_v37 = vpop.f32.mrf.mxu3 }
 0x422   : > { %v2385_v56 = vadd.f32 %v2346_v52, %v5686_v32  ;;  %v2386_v28 = vadd.f32 %v2375_v37, %v5688_v15 }
 0x425   : > { %v2461_v55 = vpop.f32.mrf.mxu0  ;;  %v2490_v11 = vpop.f32.mrf.mxu1 }
 0x426   : > { %v2500_v48 = vadd.f32 %v2461_v55, %v2385_v56  ;;  %v2501_v30 = vadd.f32 %v2490_v11, %v2386_v28 }
 0x429   : > { %v2349_v9 = vpop.f32.mrf.mxu2  ;;  %v2378_v46 = vpop.f32.mrf.mxu3 }
 0x42a   : > { %v2387_v44 = vadd.f32 %v2349_v9, %v2272_v6  ;;  %v2388_v54 = vadd.f32 %v2378_v46, %v2273_v7 }
 0x42d   : > { %v2464_v62 = vpop.f32.mrf.mxu0  ;;  %v2493_v18 = vpop.f32.mrf.mxu1 }
 0x42e   : > { %v2502_v0 = vadd.f32 %v2464_v62, %v2387_v44  ;;  %v2503_v52 = vadd.f32 %v2493_v18, %v2388_v54 }
 0x432   : > { %v2570_v57 = vpop.f32.mrf.mxu2  ;;  %v2599_v22 = vpop.f32.mrf.mxu3 }
 0x433   : > { %v5708_v40 = vadd.f32 %v2570_v57, %v2496_v39  ;;  %v5710_v60 = vadd.f32 %v2599_v22, %v2497_v19 }
 0x435   : > { %v5694_v1 = vpop.f32.mrf.mxu0  ;;  %v5696_v20 = vpop.f32.mrf.mxu1  ;;  %v2619_v36 = vadd.f32 %v5710_v60, %v5708_v40  ;;  %v2635_v59 = vmul.f32 %v5708_v40, %v5708_v40  ;;  %v2636_v16 = vmul.f32 %v5710_v60, %v5710_v60 }
 0x436   : > { %v3128_v47 = vadd.f32 %v5696_v20, %v5694_v1  ;;  %v3144_v13 = vmul.f32 %v5694_v1, %v5694_v1  ;;  %v3145_v49 = vmul.f32 %v5696_v20, %v5696_v20 }
 0x437   : > { %v2643_v3 = vadd.f32 %v2636_v16, %v2635_v59 }
 0x438   : > { %3129 = vadd.xlane.f32.xlu1 %v3128_v47  ;;  %v3152_v61 = vadd.f32 %v3145_v49, %v3144_v13 }
 0x43a   : > { %3153 = vadd.xlane.f32.xlu2 %v3152_v61  ;;  %v2573_v2 = vpop.f32.mrf.mxu2  ;;  %v2602_v63 = vpop.f32.mrf.mxu3 }
 0x43b   : > { %v5704_v38 = vadd.f32 %v2573_v2, %v2498_v33  ;;  %v5706_v53 = vadd.f32 %v2602_v63, %v2499_v29 }
 0x43d   : > { %v5712_v34 = vpop.f32.mrf.mxu0  ;;  %v5714_v43 = vpop.f32.mrf.mxu1  ;;  %v2622_v8 = vadd.f32 %v5706_v53, %v5704_v38  ;;  %v2637_v37 = vmul.f32 %v5704_v38, %v5704_v38  ;;  %v2638_v12 = vmul.f32 %v5706_v53, %v5706_v53 }
 0x43e   : > { %v3131_v25 = vadd.f32 %v5714_v43, %v5712_v34  ;;  %v3146_v13 = vmul.f32 %v5712_v34, %v5712_v34  ;;  %v3147_v49 = vmul.f32 %v5714_v43, %v5714_v43 }
 0x43f   : > { %v2646_v18 = vadd.f32 %v2638_v12, %v2637_v37 }
 0x440   : > { %3132 = vadd.xlane.f32.xlu0 %v3131_v25  ;;  %2623 = vadd.xlane.f32.xlu1 %v2622_v8  ;;  %v3155_v61 = vadd.f32 %v3147_v49, %v3146_v13 }
 0x442   : > { %2620 = vadd.xlane.f32.xlu2 %v2619_v36  ;;  %v2576_v58 = vpop.f32.mrf.mxu2  ;;  %v2605_v51 = vpop.f32.mrf.mxu3 }
 0x443   : > { %v5738_v14 = vadd.f32 %v2576_v58, %v2500_v48  ;;  %v5740_v42 = vadd.f32 %v2605_v51, %v2501_v30 }
 0x445   : > { %v5728_v10 = vpop.f32.mrf.mxu0  ;;  %v5730_v21 = vpop.f32.mrf.mxu1  ;;  %v2625_v62 = vadd.f32 %v5740_v42, %v5738_v14  ;;  %v2639_v57 = vmul.f32 %v5738_v14, %v5738_v14  ;;  %v2640_v22 = vmul.f32 %v5740_v42, %v5740_v42 }
 0x446   : > { %v3134_v17 = vadd.f32 %v5730_v21, %v5728_v10  ;;  %v3148_v50 = vmul.f32 %v5728_v10, %v5728_v10  ;;  %v3149_v45 = vmul.f32 %v5730_v21, %v5730_v21 }
 0x447   : > { %v2649_v35 = vadd.f32 %v2640_v22, %v2639_v57 }
 0x448   : > { %2644 = vadd.xlane.f32.xlu0 %v2643_v3  ;;  %v3158_v33 = vadd.f32 %v3149_v45, %v3148_v50 }
 0x44a   : > { %3135 = vadd.xlane.f32.xlu2 %v3134_v17  ;;  %v2579_v32 = vpop.f32.mrf.mxu2  ;;  %v2608_v15 = vpop.f32.mrf.mxu3 }
 0x44b   : > { %v5750_v11 = vadd.f32 %v2579_v32, %v2502_v0  ;;  %v5752_v9 = vadd.f32 %v2608_v15, %v2503_v52 }
 0x44d   : > { %v5746_v27 = vpop.f32.mrf.mxu0  ;;  %v5748_v55 = vpop.f32.mrf.mxu1  ;;  %v2641_v23 = vmul.f32 %v5750_v11, %v5750_v11  ;;  %v2642_v4 = vmul.f32 %v5752_v9, %v5752_v9  ;;  %v2628_v47 = vadd.f32 %v5752_v9, %v5750_v11 }
 0x44e   : > { %v3137_v46 = vadd.f32 %v5748_v55, %v5746_v27  ;;  %v3150_v26 = vmul.f32 %v5746_v27, %v5746_v27  ;;  %v3151_v24 = vmul.f32 %v5748_v55, %v5748_v55 }
 0x44f   : > { %v2652_v41 = vadd.f32 %v2642_v4, %v2641_v23 }
 0x450   : > { %3138 = vadd.xlane.f32.xlu1 %v3137_v46  ;;  %2626 = vadd.xlane.f32.xlu0 %v2625_v62  ;;  %v3161_v29 = vadd.f32 %v3151_v24, %v3150_v26 }
 0x452   : > { %2647 = vadd.xlane.f32.xlu2 %v2646_v18 }
 0x458   : > { %2650 = vadd.xlane.f32.xlu1 %v2649_v35  ;;  %2653 = vadd.xlane.f32.xlu0 %v2652_v41 }
 0x45a   : > { %2629 = vadd.xlane.f32.xlu2 %v2628_v47 }
 0x460   : > { %3156 = vadd.xlane.f32.xlu1 %v3155_v61  ;;  %3159 = vadd.xlane.f32.xlu0 %v3158_v33 }
 0x462   : > { %3162 = vadd.xlane.f32.xlu2 %v3161_v29 }
 0x4ab   : > { %v3130_v39 = vpop.xlane.xlu1 %3129 }
 0x4ac   : > { %v3140_v19 = vmul.f32 0.00390625, %v3130_v39 }
 0x4ad   : > { %v3154_v2 = vpop.xlane.xlu2 %3153 }
 0x4ae   : > { %v3164_v63 = vmul.f32 0.00390625, %v3154_v2  ;;  %v3168_v8 = vmul.f32 %v3140_v19, %v3140_v19  ;;  %v3176_v15 = vsub.f32 %v5694_v1, %v3140_v19  ;;  %v3177_v0 = vsub.f32 %v5696_v20, %v3140_v19 }
 0x4b0   : > { %v3172_v25 = vsub.f32 %v3164_v63, %v3168_v8 }
 0x4b2   : > { %v3184_v36 = vadd.f32 1e-05, %v3172_v25 }
 0x4b3   : > { %v5780_v58 = vpop.xlane.xlu0 %3132  ;;  %v2624_v6 = vpop.xlane.xlu1 %2623 }
 0x4b4   : > { %3983 = vrsqrt.f32 %v3184_v36  ;;  %vm3194_vm5 = vweird.f32 %v3184_v36  ;;  %v5788_v32 = vmul.f32 0.00390625, %v2624_v6 }
 0x4b5   : > { %v2621_v51 = vpop.xlane.xlu2 %2620 }
 0x4b6   : > { %v5782_v59 = vmul.f32 0.00390625, %v2621_v51  ;;  %v2660_v57 = vmul.f32 %v5788_v32, %v5788_v32 }
 0x4b8   : > { %v2659_v56 = vmul.f32 %v5782_v59, %v5782_v59  ;;  %v2667_v51 = vsub.f32 %v5708_v40, %v5782_v59 }
 0x4ba   : > { %v3984_v16 = vpop.eup %3983 }
 0x4bb   : > { %v3189_v31 = vmul.f32 %v3984_v16, %v3184_v36  ;;  %v2645_v5 = vpop.xlane.xlu0 %2644  ;;  %vm3195_vm6 = vweird.f32 %v3984_v16 }
 0x4bc   : > { %v2655_v28 = vmul.f32 0.00390625, %v2645_v5  ;;  %vm3196_vm3 = vmor %vm3194_vm5, %vm3195_vm6 }
 0x4bd   : > { %v3190_v3 = vmul.f32 %v3984_v16, %v3189_v31  ;;  %v5786_v17 = vpop.xlane.xlu2 %3135 }
 0x4be   : > { %v2663_v7 = vsub.f32 %v2655_v28, %v2659_v56 }
 0x4bf   : > { %v3191_v48 = vmul.f32 0.5, %v3190_v3 }
 0x4c0   : > { %v2675_v30 = vadd.f32 1e-05, %v2663_v7 }
 0x4c1   : > { %v3192_v44 = vsub.f32 1.5, %v3191_v48 }
 0x4c2   : > { %3985 = vrsqrt.f32 %v2675_v30  ;;  %vm2685_vm1 = vweird.f32 %v2675_v30 }
 0x4c3   : > { %v3193_v54 = vmul.f32 %v3984_v16, %v3192_v44  ;;  %v5796_v62 = vpop.xlane.xlu1 %3138  ;;  %v2627_v26 = vpop.xlane.xlu0 %2626 }
 0x4c4   : > { %v5813_v29 = vmul.f32 0.00390625, %v2627_v26 }
 0x4c5   : > { %v3197_v52 = vsel %vm3196_vm3, %v3984_v16, %v3193_v54  ;;  %v2648_v37 = vpop.xlane.xlu2 %2647  ;;  %v2668_v16 = vsub.f32 %v5710_v60, %v5782_v59 }
 0x4c6   : > { %v5792_v12 = vmul.f32 %v3197_v52, %v3176_v15  ;;  %v5794_v46 = vmul.f32 %v3197_v52, %v3177_v0  ;;  %v2656_v18 = vmul.f32 0.00390625, %v2648_v37  ;;  %v2661_v3 = vmul.f32 %v5813_v29, %v5813_v29 }
 0x4c8   : > { %v3986_v22 = vpop.eup %3985  ;;  %v5801_v23 = vmul.f32 0.70710677, %v5792_v12  ;;  %v5804_v1 = vmul.f32 0.70710677, %v5794_v46  ;;  %v2664_v4 = vsub.f32 %v2656_v18, %v2660_v57 }
 0x4c9   : > { %v2680_v20 = vmul.f32 %v3986_v22, %v2675_v30  ;;  %vm2686_vm2 = vweird.f32 %v3986_v22 }
 0x4ca   : > { %v3252_v35 = vand.u32 2147483647, %v5801_v23  ;;  %v3253_v41 = vand.u32 2147483647, %v5804_v1  ;;  %v5808_v13 = vadd.f32 1e-05, %v2664_v4  ;;  %vm2687_vm11 = vmor %vm2685_vm1, %vm2686_vm2 }
 0x4cb   : > { %v2681_v47 = vmul.f32 %v3986_v22, %v2680_v20  ;;  %v2651_v39 = vpop.xlane.xlu1 %2650 }
 0x4cc   : > { %v3260_v49 = vmul.f32 0.3275911, %v3252_v35  ;;  %v3261_v50 = vmul.f32 0.3275911, %v3253_v41  ;;  %3987 = vrsqrt.f32 %v5808_v13  ;;  %v3468_v19 = vsub.f32 0.0, %v3252_v35 }
 0x4cd   : > { %v2682_v45 = vmul.f32 0.5, %v2681_v47  ;;  %v3469_v2 = vsub.f32 0.0, %v3253_v41  ;;  %v5818_v25 = vmul.f32 0.00390625, %v2651_v39  ;;  %v2630_v54 = vpop.xlane.xlu2 %2629  ;;  %vm2695_vm10 = vweird.f32 %v5808_v13 }
 0x4ce   : > { %v3268_v24 = vadd.f32 1.0, %v3260_v49  ;;  %v5811_v61 = vadd.f32 1.0, %v3261_v50  ;;  %v3476_v5 = vmul.f32 %v3468_v19, %v3252_v35  ;;  %v5849_v47 = vmul.f32 0.00390625, %v2630_v54 }
 0x4cf   : > { %v2683_v33 = vsub.f32 1.5, %v2682_v45  ;;  %v3477_v56 = vmul.f32 %v3469_v2, %v3253_v41  ;;  %v2665_v59 = vsub.f32 %v5818_v25, %v2661_v3 }
 0x4d0   : > { %3989 = vrcp.f32 %v3268_v24  ;;  %v3285_v36 = vand.u32 2147483647, %v3268_v24  ;;  %v3287_v7 = vand.u32 2147483648, %v3268_v24  ;;  %vm3281_vm8 = vweird.f32 %v3268_v24 }
 0x4d1   : > { %3991 = vrcp.f32 %v5811_v61  ;;  %v2684_v8 = vmul.f32 %v3986_v22, %v2683_v33  ;;  %vm3296_vm15 = vweird.f32 %v5811_v61  ;;  %v3300_v52 = vand.u32 2147483647, %v5811_v61 }
 0x4d2   : > { %v5816_v63 = vpop.eup %3987  ;;  %vm5835_vm4 = vcmp.eq.f32.partialorder %v3285_v36, 8.507059e+37  ;;  %v3302_v37 = vand.u32 2147483648, %v5811_v61  ;;  %v3288_v4 = vor.u32 1.1754944e-38, %v3287_v7  ;;  %v3484_v41 = vmul.f32 1.442695, %v3476_v5  ;;  %v2654_v36 = vpop.xlane.xlu0 %2653 }
 0x4d3   : > { %v2690_v31 = vmul.f32 %v5816_v63, %v5808_v13  ;;  %v2688_v28 = vsel %vm2687_vm11, %v3986_v22, %v2684_v8  ;;  %v3486_v33 = vmul.f32 1.442695, %v3477_v56  ;;  %vm5853_vm0 = vcmp.eq.f32.partialorder %v3300_v52, 8.507059e+37 }
 0x4d4   : > { %v5828_v48 = vmul.f32 %v2688_v28, %v2667_v51  ;;  %v5830_v30 = vmul.f32 %v2688_v28, %v2668_v16  ;;  %v3303_v16 = vor.u32 1.1754944e-38, %v3302_v37  ;;  %vm2696_vm13 = vweird.f32 %v5816_v63 }
 0x4d5   : > { %v2691_v40 = vmul.f32 %v5816_v63, %v2690_v31  ;;  %v2662_v31 = vmul.f32 %v5849_v47, %v5849_v47  ;;  %3993 = vpow2.f32 %v3484_v41  ;;  %vm2697_vm6 = vmor %vm2695_vm10, %vm2696_vm13  ;;  %vm3517_vm13 = vcmp.ge.f32.partialorder %v5804_v1, 0.0 }
 0x4d6   : > { %v3990_v6 = vpop.eup %3989  ;;  %v5843_v57 = vmul.f32 0.70710677, %v5828_v48  ;;  %v5846_v22 = vmul.f32 0.70710677, %v5830_v30 }
 0x4d7   : > { %v3992_v44 = vpop.eup %3991  ;;  %v3277_v60 = vmul.f32 %v3990_v6, %v3268_v24  ;;  %v2692_v20 = vmul.f32 0.5, %v2691_v40  ;;  %vm3282_vm7 = vweird.f32 %v3990_v6  ;;  %v2658_v40 = vmul.f32 0.00390625, %v2654_v36 }
 0x4d8   : > { %v3292_v0 = vmul.f32 %v3992_v44, %v5811_v61  ;;  %v2743_v50 = vand.u32 2147483647, %v5843_v57  ;;  %v2744_v45 = vand.u32 2147483647, %v5846_v22  ;;  %vm3297_vm14 = vweird.f32 %v3992_v44  ;;  %vm3283_vm12 = vmor %vm3281_vm8, %vm3282_vm7 }
 0x4d9   : > { %v3278_v18 = vsub.f32 1.0, %v3277_v60  ;;  %v2693_v39 = vsub.f32 1.5, %v2692_v20  ;;  %vm3298_vm9 = vmor %vm3296_vm15, %vm3297_vm14  ;;  %v2670_v20 = vsub.f32 %v5706_v53, %v5788_v32 }
 0x4da   : > { %v3293_v35 = vsub.f32 1.0, %v3292_v0  ;;  %v2751_v8 = vmul.f32 0.3275911, %v2743_v50  ;;  %v2752_v25 = vmul.f32 0.3275911, %v2744_v45  ;;  %v2959_v0 = vsub.f32 0.0, %v2743_v50 }
 0x4db   : > { %v3279_v49 = vmul.f32 %v3990_v6, %v3278_v18  ;;  %v2694_v3 = vmul.f32 %v5816_v63, %v2693_v39  ;;  %v2960_v52 = vsub.f32 0.0, %v2744_v45  ;;  %v5893_v13 = vpop.eup %3993 }
 0x4dc   : > { %v3294_v26 = vmul.f32 %v3992_v44, %v3293_v35  ;;  %v5863_v56 = vadd.f32 1.0, %v2751_v8  ;;  %v5865_v28 = vadd.f32 1.0, %v2752_v25 }
 0x4dd   : > { %v3280_v19 = vadd.f32 %v3990_v6, %v3279_v49  ;;  %v2698_v37 = vsel %vm2697_vm6, %v5816_v63, %v2694_v3  ;;  %v2968_v53 = vmul.f32 %v2960_v52, %v2744_v45 }
 0x4de   : > { %v3295_v51 = vadd.f32 %v3992_v44, %v3294_v26  ;;  %3995 = vrcp.f32 %v5863_v56  ;;  %v5898_v49 = vmul.f32 %v2698_v37, %v2670_v20  ;;  %vm2772_vm5 = vweird.f32 %v5863_v56 }
 0x4df   : > { %v3284_v5 = vsel %vm3283_vm12, %v3990_v6, %v3280_v19  ;;  %v5878_v6 = vadd.f32 1e-05, %v2665_v59  ;;  %3997 = vrcp.f32 %v5865_v28  ;;  %v2669_v59 = vsub.f32 %v5704_v38, %v5788_v32 }
 0x4e0   : > { %v5870_v24 = vsel %vm5835_vm4, %v3288_v4, %v3284_v5  ;;  %v3299_v7 = vsel %vm3298_vm9, %v3992_v44, %v3295_v51  ;;  %v2666_v44 = vsub.f32 %v2658_v40, %v2662_v31  ;;  %3999 = vpow2.f32 %v3486_v33 }
 0x4e1   : > { %v5874_v60 = vsel %vm5853_vm0, %v3303_v16, %v3299_v7  ;;  %v3396_v61 = vmul.f32 1.0614054, %v5870_v24  ;;  %4001 = vrsqrt.f32 %v5878_v6  ;;  %v5896_v41 = vmul.f32 %v2698_v37, %v2669_v59 }
 0x4e2   : > { %v3397_v54 = vmul.f32 1.0614054, %v5874_v60  ;;  %v5900_v63 = vadd.f32 1e-05, %v2666_v44  ;;  %v2967_v38 = vmul.f32 %v2959_v0, %v2743_v50  ;;  %v2776_v2 = vand.u32 2147483647, %v5863_v56 }
 0x4e3   : > { %v3904_v15 = vadd.f32 -1.4531521, %v3396_v61  ;;  %v2778_v8 = vand.u32 2147483648, %v5863_v56  ;;  %vm2787_vm3 = vweird.f32 %v5865_v28  ;;  %v2791_v51 = vand.u32 2147483647, %v5865_v28 }
 0x4e4   : > { %v3905_v18 = vadd.f32 -1.4531521, %v3397_v54  ;;  %v3996_v26 = vpop.eup %3995  ;;  %v5912_v31 = vmul.f32 0.70710677, %v5896_v41  ;;  %v5915_v5 = vmul.f32 0.70710677, %v5898_v49  ;;  %vm2705_vm10 = vweird.f32 %v5878_v6 }
 0x4e5   : > { %v3412_v4 = vmul.f32 %v3904_v15, %v5870_v24  ;;  %v3998_v32 = vpop.eup %3997  ;;  %v2768_v19 = vmul.f32 %v3996_v26, %v5863_v56  ;;  %vm2773_vm2 = vweird.f32 %v3996_v26  ;;  %v2793_v61 = vand.u32 2147483648, %v5865_v28 }
 0x4e6   : > { %v3413_v35 = vmul.f32 %v3905_v18, %v5874_v60  ;;  %v2783_v36 = vmul.f32 %v3998_v32, %v5865_v28  ;;  %v4000_v16 = vpop.eup %3999  ;;  %v5921_v15 = vand.u32 2147483647, %v5912_v31  ;;  %v5924_v0 = vand.u32 2147483647, %v5915_v5  ;;  %vm2774_vm8 = vmor %vm2772_vm5, %vm2773_vm2 }
 0x4e7   : > { %v3420_v33 = vadd.f32 1.4214138, %v3412_v4  ;;  %v2769_v45 = vsub.f32 1.0, %v2768_v19  ;;  %v5917_v3 = vpop.eup %4001  ;;  %vm5927_vm1 = vcmp.eq.f32.partialorder %v2776_v2, 8.507059e+37  ;;  %vm2788_vm11 = vweird.f32 %v3998_v32 }
 0x4e8   : > { %v3421_v39 = vadd.f32 1.4214138, %v3413_v35  ;;  %v2784_v40 = vsub.f32 1.0, %v2783_v36  ;;  %v2753_v4 = vmul.f32 0.3275911, %v5921_v15  ;;  %v2794_v2 = vor.u32 1.1754944e-38, %v2793_v61  ;;  %vm2789_vm15 = vmor %vm2787_vm3, %vm2788_vm11 }
 0x4e9   : > { %v3428_v25 = vmul.f32 %v3420_v33, %v5870_v24  ;;  %v2770_v44 = vmul.f32 %v3996_v26, %v2769_v45  ;;  %v2754_v35 = vmul.f32 0.3275911, %v5924_v0  ;;  %vm2792_vm4 = vcmp.eq.f32.partialorder %v2791_v51, 8.507059e+37 }
 0x4ea   : > { %v3429_v50 = vmul.f32 %v3421_v39, %v5874_v60  ;;  %v2785_v18 = vmul.f32 %v3998_v32, %v2784_v40  ;;  %v2779_v39 = vor.u32 1.1754944e-38, %v2778_v8  ;;  %v2700_v56 = vmul.f32 %v5917_v3, %v5878_v6 }
 0x4eb   : > { %v3912_v7 = vadd.f32 -0.28449672, %v3428_v25  ;;  %v2771_v20 = vadd.f32 %v3996_v26, %v2770_v44  ;;  %v5941_v45 = vadd.f32 1.0, %v2754_v35  ;;  %v2977_v37 = vmul.f32 1.442695, %v2968_v53 }
 0x4ec   : > { %v3913_v54 = vadd.f32 -0.28449672, %v3429_v50  ;;  %v2786_v19 = vadd.f32 %v3998_v32, %v2785_v18  ;;  %v5939_v50 = vadd.f32 1.0, %v2753_v4  ;;  %v2701_v51 = vmul.f32 %v5917_v3, %v2700_v56 }
 0x4ed   : > { %v3444_v52 = vmul.f32 %v3912_v7, %v5870_v24  ;;  %v2775_v36 = vsel %vm2774_vm8, %v3996_v26, %v2771_v20  ;;  %vm2706_vm7 = vweird.f32 %v5917_v3  ;;  %vm3516_vm12 = vcmp.ge.f32.partialorder %v5801_v23, 0.0 }
 0x4ee   : > { %v3445_v59 = vmul.f32 %v3913_v54, %v5874_v60  ;;  %v5945_v7 = vsel %vm5927_vm1, %v2779_v39, %v2775_v36  ;;  %v2790_v40 = vsel %vm2789_vm15, %v3998_v32, %v2786_v19  ;;  %4003 = vrcp.f32 %v5939_v50  ;;  %vm2707_vm2 = vmor %vm2705_vm10, %vm2706_vm7 }
 0x4ef   : > { %v3452_v33 = vadd.f32 0.2548296, %v3444_v52  ;;  %v5950_v61 = vsel %vm2792_vm4, %v2794_v2, %v2790_v40  ;;  %v2887_v28 = vmul.f32 1.0614054, %v5945_v7  ;;  %v2975_v54 = vmul.f32 1.442695, %v2967_v38 }
 0x4f0   : > { %v3453_v25 = vadd.f32 0.2548296, %v3445_v59  ;;  %v2888_v26 = vmul.f32 1.0614054, %v5950_v61  ;;  %4005 = vrcp.f32 %v5941_v45  ;;  %v5968_v38 = vmul.f32 0.5, %v5792_v12 }
 0x4f1   : > { %v3460_v8 = vmul.f32 %v3452_v33, %v5870_v24  ;;  %v3878_v52 = vadd.f32 -1.4531521, %v2887_v28  ;;  %4007 = vrsqrt.f32 %v5900_v63  ;;  %v2806_v20 = vand.u32 2147483647, %v5939_v50 }
 0x4f2   : > { %v3461_v44 = vmul.f32 %v3453_v25, %v5874_v60  ;;  %v3879_v32 = vadd.f32 -1.4531521, %v2888_v26  ;;  %4009 = vpow2.f32 %v2975_v54  ;;  %v2702_v19 = vmul.f32 0.5, %v2701_v51 }
 0x4f3   : > { %v5960_v24 = vmul.f32 %v5893_v13, %v3460_v8  ;;  %v2903_v18 = vmul.f32 %v3878_v52, %v5945_v7  ;;  %4011 = vpow2.f32 %v2977_v37  ;;  %vm2802_vm14 = vweird.f32 %v5939_v50 }
 0x4f4   : > { %v2904_v53 = vmul.f32 %v3879_v32, %v5950_v61  ;;  %v4004_v4 = vpop.eup %4003  ;;  %v5972_v35 = vmul.f32 %v4000_v16, %v3461_v44  ;;  %v2808_v16 = vand.u32 2147483648, %v5939_v50  ;;  %vm5984_vm0 = vcmp.eq.f32.partialorder %v2806_v20, 8.507059e+37 }
 0x4f5   : > { %v2911_v13 = vadd.f32 1.4214138, %v2903_v18  ;;  %v2798_v39 = vmul.f32 %v4004_v4, %v5939_v50  ;;  %v3508_v2 = vsub.f32 1.0, %v5960_v24  ;;  %vm2817_vm9 = vweird.f32 %v5941_v45 }
 0x4f6   : > { %v2912_v33 = vadd.f32 1.4214138, %v2904_v53  ;;  %v4006_v12 = vpop.eup %4005  ;;  %v3509_v26 = vsub.f32 1.0, %v5972_v35  ;;  %v2821_v44 = vand.u32 2147483647, %v5941_v45  ;;  %vm2803_vm6 = vweird.f32 %v4004_v4 }
 0x4f7   : > { %v2919_v25 = vmul.f32 %v2911_v13, %v5945_v7  ;;  %v5981_v36 = vpop.eup %4007  ;;  %v2799_v56 = vsub.f32 1.0, %v2798_v39  ;;  %v2813_v28 = vmul.f32 %v4006_v12, %v5941_v45  ;;  %v2823_v53 = vand.u32 2147483648, %v5941_v45  ;;  %vm6001_vm3 = vmor %vm2802_vm14, %vm2803_vm6 }
 0x4f8   : > { %v2920_v40 = vmul.f32 %v2912_v33, %v5950_v61  ;;  %v4010_v52 = vpop.eup %4009  ;;  %v2703_v20 = vsub.f32 1.5, %v2702_v19  ;;  %v2710_v35 = vmul.f32 %v5981_v36, %v5900_v63  ;;  %vm2818_vm5 = vweird.f32 %v4006_v12 }
 0x4f9   : > { %v3886_v54 = vadd.f32 -0.28449672, %v2919_v25  ;;  %v2800_v32 = vmul.f32 %v4004_v4, %v2799_v56  ;;  %v2814_v51 = vsub.f32 1.0, %v2813_v28  ;;  %v4012_v24 = vpop.eup %4011  ;;  %v3524_v25 = vsub.f32 0.0, %v3508_v2  ;;  %vm2819_vm1 = vmor %vm2817_vm9, %vm2818_vm5 }
 0x4fa   : > { %v3887_v37 = vadd.f32 -0.28449672, %v2920_v40  ;;  %v2809_v56 = vor.u32 1.1754944e-38, %v2808_v16  ;;  %v2704_v28 = vmul.f32 %v5917_v3, %v2703_v20  ;;  %v3525_v19 = vsub.f32 0.0, %v3509_v26 }
 0x4fb   : > { %v2935_v18 = vmul.f32 %v3886_v54, %v5945_v7  ;;  %v2801_v33 = vadd.f32 %v4004_v4, %v2800_v32  ;;  %v2815_v39 = vmul.f32 %v4006_v12, %v2814_v51  ;;  %v2824_v32 = vor.u32 1.1754944e-38, %v2823_v53 }
 0x4fc   : > { %v2936_v13 = vmul.f32 %v3887_v37, %v5950_v61  ;;  %v2708_v16 = vsel %vm2707_vm2, %v5917_v3, %v2704_v28  ;;  %v2711_v51 = vmul.f32 %v5981_v36, %v2710_v35  ;;  %vm2822_vm11 = vcmp.eq.f32.partialorder %v2821_v44, 8.507059e+37 }
 0x4fd   : > { %v2943_v60 = vadd.f32 0.2548296, %v2935_v18  ;;  %v2805_v59 = vsel %vm6001_vm3, %v4004_v4, %v2801_v33  ;;  %v2816_v37 = vadd.f32 %v4006_v12, %v2815_v39  ;;  %v6697_v4 = vsub.f32 %v5738_v14, %v5813_v29 }
 0x4fe   : > { %v2944_v54 = vadd.f32 0.2548296, %v2936_v13  ;;  %v6698_v3 = vsub.f32 %v5740_v42, %v5813_v29  ;;  %v3533_v14 = vsel %vm3517_vm13, %v3509_v26, %v3525_v19  ;;  %v2712_v53 = vmul.f32 0.5, %v2711_v51 }
 0x4ff   : > { %v2951_v50 = vmul.f32 %v2943_v60, %v5945_v7  ;;  %v2820_v20 = vsel %vm2819_vm1, %v4006_v12, %v2816_v37  ;;  %v6021_v13 = vmul.f32 %v2708_v16, %v6697_v4  ;;  %v6025_v7 = vsel %vm5984_vm0, %v2809_v56, %v2805_v59 }
 0x500   : > { %v2952_v18 = vmul.f32 %v2944_v54, %v5950_v61  ;;  %v6027_v45 = vsel %vm2822_vm11, %v2824_v32, %v2820_v20  ;;  %v6032_v60 = vmul.f32 %v2708_v16, %v6698_v3  ;;  %v3237_v61 = vmul.f32 0.5, %v5794_v46 }
 0x501   : > { %v2991_v6 = vmul.f32 %v4010_v52, %v2951_v50  ;;  %v3532_v12 = vsel %vm3516_vm12, %v3508_v2, %v3524_v25  ;;  %v6040_v59 = vmul.f32 0.70710677, %v6021_v13  ;;  %v2727_v42 = vmul.f32 0.5, %v5828_v48 }
 0x502   : > { %v2992_v44 = vmul.f32 %v4012_v24, %v2952_v18  ;;  %v6043_v8 = vmul.f32 0.70710677, %v6032_v60  ;;  %v2889_v46 = vmul.f32 1.0614054, %v6025_v7  ;;  %v2890_v23 = vmul.f32 1.0614054, %v6027_v45 }
 0x503   : > { %v2999_v52 = vsub.f32 1.0, %v2991_v6  ;;  %vm3007_vm8 = vcmp.ge.f32.partialorder %v5843_v57, 0.0  ;;  %v6050_v2 = vand.u32 2147483647, %v6040_v59  ;;  %v3540_v24 = vadd.f32 1.0, %v3532_v12 }
 0x504   : > { %v3000_v29 = vsub.f32 1.0, %v2992_v44  ;;  %v6053_v26 = vand.u32 2147483647, %v6043_v8  ;;  %v3541_v35 = vadd.f32 1.0, %v3533_v14  ;;  %vm3008_vm15 = vcmp.ge.f32.partialorder %v5846_v22, 0.0 }
 0x505   : > { %v3015_v1 = vsub.f32 0.0, %v2999_v52  ;;  %v2755_v39 = vmul.f32 0.3275911, %v6050_v2  ;;  %v2713_v40 = vsub.f32 1.5, %v2712_v53  ;;  %v2728_v57 = vmul.f32 0.5, %v5830_v30 }
 0x506   : > { %v3016_v48 = vsub.f32 0.0, %v3000_v29  ;;  %v2756_v25 = vmul.f32 0.3275911, %v6053_v26  ;;  %v3880_v19 = vadd.f32 -1.4531521, %v2889_v46  ;;  %v3548_v22 = vmul.f32 %v3540_v24, %v5968_v38 }
 0x507   : > { %v3023_v33 = vsel %vm3007_vm8, %v2999_v52, %v3015_v1  ;;  %v3881_v37 = vadd.f32 -1.4531521, %v2890_v23  ;;  %v2763_v50 = vadd.f32 1.0, %v2755_v39  ;;  %v3549_v16 = vmul.f32 %v3541_v35, %v3237_v61 }
 0x508   : > { %v3024_v56 = vsel %vm3008_vm15, %v3000_v29, %v3016_v48  ;;  %v3031_v28 = vadd.f32 1.0, %v3023_v33  ;;  %v6060_v32 = vadd.f32 1.0, %v2756_v25  ;;  %v2714_v18 = vmul.f32 %v5981_v36, %v2713_v40 }
 0x509   : > { %v3032_v54 = vadd.f32 1.0, %v3024_v56  ;;  %4013 = vrcp.f32 %v2763_v50  ;;  %vm2716_vm4 = vweird.f32 %v5981_v36  ;;  %v2905_v4 = vmul.f32 %v3880_v19, %v6025_v7 }
 0x50a   : > { %v3039_v51 = vmul.f32 %v3031_v28, %v2727_v42  ;;  %v2961_v38 = vsub.f32 0.0, %v5921_v15  ;;  %v2906_v3 = vmul.f32 %v3881_v37, %v6027_v45  ;;  %4015 = vrcp.f32 %v6060_v32 }
 0x50b   : > { %v3040_v30 = vmul.f32 %v3032_v54, %v2728_v57  ;;  %vm2715_vm10 = vweird.f32 %v5900_v63  ;;  %v2673_v61 = vsub.f32 %v5750_v11, %v5849_v47  ;;  %v2962_v12 = vsub.f32 0.0, %v5924_v0 }
 0x50c   : > { %v3556_v20 = vadd.f32 %v3548_v22, %v3039_v51  ;;  %vm2717_vm7 = vmor %vm2715_vm10, %vm2716_vm4  ;;  %v2674_v14 = vsub.f32 %v5752_v9, %v5849_v47  ;;  %v2913_v52 = vadd.f32 1.4214138, %v2905_v4  ;;  %v2969_v53 = vmul.f32 %v2961_v38, %v5921_v15 }
 0x50d   : > { %v3557_v6 = vadd.f32 %v3549_v16, %v3040_v30  ;;  %v2718_v44 = vsel %vm2717_vm7, %v5981_v36, %v2714_v18  ;;  %v2914_v63 = vadd.f32 1.4214138, %v2906_v3  ;;  %v6089_v1 = vmul.f32 0.00390625, %v5780_v58 }
 0x50e   : > { %3564 = vst [vmem:[%s6066_s14] sm:$0xff] %v3556_v20  ;;  %v6084_v42 = vmul.f32 %v2718_v44, %v2673_v61  ;;  %v6086_v46 = vmul.f32 %v2718_v44, %v2674_v14  ;;  %v2970_v24 = vmul.f32 %v2962_v12, %v5924_v0  ;;  %v2921_v47 = vmul.f32 %v2913_v52, %v6025_v7 }
 0x50f   : > { %3565 = vst [vmem:[%s6066_s14 + $0x8] sm:$0xff] %v3557_v6  ;;  %v4014_v29 = vpop.eup %4013  ;;  %v2979_v36 = vmul.f32 1.442695, %v2969_v53  ;;  %v2922_v48 = vmul.f32 %v2914_v63, %v6027_v45  ;;  %v2838_v33 = vand.u32 2147483648, %v2763_v50  ;;  %v2836_v0 = vand.u32 2147483647, %v2763_v50 }
 0x510   : > { %v2828_v23 = vmul.f32 %v4014_v29, %v2763_v50  ;;  %v4016_v11 = vpop.eup %4015  ;;  %v6093_v9 = vmul.f32 0.70710677, %v6084_v42  ;;  %v6099_v39 = vmul.f32 0.70710677, %v6086_v46  ;;  %vm2833_vm14 = vweird.f32 %v4014_v29 }
 0x511   : > { %v2843_v35 = vmul.f32 %v4016_v11, %v6060_v32  ;;  %vm2832_vm0 = vweird.f32 %v2763_v50  ;;  %v2853_v57 = vand.u32 2147483648, %v6060_v32  ;;  %vm2848_vm12 = vweird.f32 %v4016_v11 }
 0x512   : > { %v2829_v15 = vsub.f32 1.0, %v2828_v23  ;;  %v6102_v58 = vand.u32 2147483647, %v6093_v9  ;;  %v6106_v56 = vand.u32 2147483647, %v6099_v39  ;;  %vm2834_vm13 = vmor %vm2832_vm0, %vm2833_vm14  ;;  %v2839_v16 = vor.u32 1.1754944e-38, %v2838_v33 }
 0x513   : > { %v2844_v40 = vsub.f32 1.0, %v2843_v35  ;;  %v2851_v37 = vand.u32 2147483647, %v6060_v32  ;;  %v3888_v22 = vadd.f32 -0.28449672, %v2921_v47  ;;  %vm2837_vm9 = vcmp.eq.f32.partialorder %v2836_v0, 8.507059e+37 }
 0x514   : > { %v2830_v25 = vmul.f32 %v4014_v29, %v2829_v15  ;;  %v2757_v28 = vmul.f32 0.3275911, %v6102_v58  ;;  %v2758_v51 = vmul.f32 0.3275911, %v6106_v56  ;;  %vm2847_vm6 = vweird.f32 %v6060_v32 }
 0x515   : > { %v2845_v54 = vmul.f32 %v4016_v11, %v2844_v40  ;;  %v3889_v20 = vadd.f32 -0.28449672, %v2922_v48  ;;  %vm2849_vm5 = vmor %vm2847_vm6, %vm2848_vm12  ;;  %v2854_v38 = vor.u32 1.1754944e-38, %v2853_v57  ;;  %vm2852_vm3 = vcmp.eq.f32.partialorder %v2851_v37, 8.507059e+37 }
 0x516   : > { %v2831_v19 = vadd.f32 %v4014_v29, %v2830_v25  ;;  %v6111_v30 = vadd.f32 1.0, %v2757_v28  ;;  %v6116_v6 = vadd.f32 1.0, %v2758_v51  ;;  %v2981_v12 = vmul.f32 1.442695, %v2970_v24  ;;  %v3160_v25 = vpop.xlane.xlu0 %3159 }
 0x517   : > { %v2846_v18 = vadd.f32 %v4016_v11, %v2845_v54  ;;  %v2963_v44 = vsub.f32 0.0, %v6050_v2  ;;  %v2937_v32 = vmul.f32 %v3888_v22, %v6025_v7  ;;  %v3178_v63 = vsub.f32 %v5712_v34, %v6089_v1 }
 0x518   : > { %v2835_v50 = vsel %vm2834_vm13, %v4014_v29, %v2831_v19  ;;  %4017 = vrcp.f32 %v6111_v30  ;;  %v3157_v29 = vpop.xlane.xlu1 %3156  ;;  %v2938_v23 = vmul.f32 %v3889_v20, %v6027_v45  ;;  %v6131_v24 = vmul.f32 0.00390625, %v5786_v17 }
 0x519   : > { %v6114_v4 = vsel %vm2837_vm9, %v2839_v16, %v2835_v50  ;;  %v2850_v3 = vsel %vm2849_vm5, %v4016_v11, %v2846_v18  ;;  %4019 = vrcp.f32 %v6116_v6  ;;  %v2964_v11 = vsub.f32 0.0, %v6053_v26 }
 0x51a   : > { %v2891_v61 = vmul.f32 1.0614054, %v6114_v4  ;;  %v6120_v14 = vsel %vm2852_vm3, %v2854_v38, %v2850_v3  ;;  %4021 = vpow2.f32 %v2979_v36  ;;  %v6135_v35 = vmul.f32 0.00390625, %v5796_v62  ;;  %v3163_v38 = vpop.xlane.xlu2 %3162 }
 0x51b   : > { %v2892_v52 = vmul.f32 1.0614054, %v6120_v14  ;;  %4023 = vpow2.f32 %v2981_v12  ;;  %v3165_v48 = vmul.f32 0.00390625, %v3157_v29  ;;  %v3169_v33 = vmul.f32 %v6089_v1, %v6089_v1 }
 0x51c   : > { %v3882_v53 = vadd.f32 -1.4531521, %v2891_v61  ;;  %v2945_v40 = vadd.f32 0.2548296, %v2937_v32  ;;  %v2971_v17 = vmul.f32 %v2963_v44, %v6050_v2  ;;  %v2946_v36 = vadd.f32 0.2548296, %v2938_v23 }
 0x51d   : > { %v3883_v47 = vadd.f32 -1.4531521, %v2892_v52  ;;  %v2972_v19 = vmul.f32 %v2964_v11, %v6053_v26  ;;  %v3173_v62 = vsub.f32 %v3165_v48, %v3169_v33  ;;  %vm2862_vm2 = vweird.f32 %v6111_v30 }
 0x51e   : > { %v2907_v15 = vmul.f32 %v3882_v53, %v6114_v4  ;;  %v4018_v0 = vpop.eup %4017  ;;  %v3170_v16 = vmul.f32 %v6131_v24, %v6131_v24  ;;  %v3166_v51 = vmul.f32 0.00390625, %v3160_v25  ;;  %v2866_v18 = vand.u32 2147483647, %v6111_v30 }
 0x51f   : > { %v2908_v57 = vmul.f32 %v3883_v47, %v6120_v14  ;;  %v2858_v54 = vmul.f32 %v4018_v0, %v6111_v30  ;;  %v4020_v37 = vpop.eup %4019  ;;  %v6148_v2 = vadd.f32 1e-05, %v3173_v62  ;;  %vm2863_vm1 = vweird.f32 %v4018_v0 }
 0x520   : > { %v2915_v28 = vadd.f32 1.4214138, %v2907_v15  ;;  %v2873_v20 = vmul.f32 %v4020_v37, %v6116_v6  ;;  %v4022_v26 = vpop.eup %4021  ;;  %v2868_v61 = vand.u32 2147483648, %v6111_v30  ;;  %v3174_v12 = vsub.f32 %v3166_v51, %v3170_v16  ;;  %vm2864_vm15 = vmor %vm2862_vm2, %vm2863_vm1 }
 0x521   : > { %v2916_v22 = vadd.f32 1.4214138, %v2908_v57  ;;  %v2859_v50 = vsub.f32 1.0, %v2858_v54  ;;  %v4024_v44 = vpop.eup %4023  ;;  %4025 = vrsqrt.f32 %v6148_v2  ;;  %vm2877_vm11 = vweird.f32 %v6116_v6 }
 0x522   : > { %v2923_v3 = vmul.f32 %v2915_v28, %v6114_v4  ;;  %v2874_v53 = vsub.f32 1.0, %v2873_v20  ;;  %v2883_v29 = vand.u32 2147483648, %v6116_v6  ;;  %v6156_v23 = vadd.f32 1e-05, %v3174_v12 }
 0x523   : > { %v2924_v32 = vmul.f32 %v2916_v22, %v6120_v14  ;;  %v2860_v52 = vmul.f32 %v4018_v0, %v2859_v50  ;;  %v3167_v11 = vmul.f32 0.00390625, %v3163_v38  ;;  %vm2878_vm8 = vweird.f32 %v4020_v37 }
 0x524   : > { %v2875_v15 = vmul.f32 %v4020_v37, %v2874_v53  ;;  %v2881_v48 = vand.u32 2147483647, %v6116_v6  ;;  %vm2867_vm4 = vcmp.eq.f32.partialorder %v2866_v18, 8.507059e+37  ;;  %v2869_v33 = vor.u32 1.1754944e-38, %v2868_v61  ;;  %vm2879_vm10 = vmor %vm2877_vm11, %vm2878_vm8 }
 0x525   : > { %v2861_v47 = vadd.f32 %v4018_v0, %v2860_v52  ;;  %4027 = vrsqrt.f32 %v6156_v23  ;;  %v3171_v25 = vmul.f32 %v6135_v35, %v6135_v35  ;;  %v3890_v57 = vadd.f32 -0.28449672, %v2923_v3 }
 0x526   : > { %v3891_v28 = vadd.f32 -0.28449672, %v2924_v32  ;;  %v2876_v62 = vadd.f32 %v4020_v37, %v2875_v15  ;;  %v2983_v22 = vmul.f32 1.442695, %v2971_v17  ;;  %v2884_v51 = vor.u32 1.1754944e-38, %v2883_v29 }
 0x527   : > { %v2865_v54 = vsel %vm2864_vm15, %v4018_v0, %v2861_v47  ;;  %v3175_v30 = vsub.f32 %v3167_v11, %v3171_v25  ;;  %v4026_v50 = vpop.eup %4025  ;;  %v2953_v18 = vmul.f32 %v2945_v40, %v6025_v7  ;;  %vm2882_vm7 = vcmp.eq.f32.partialorder %v2881_v48, 8.507059e+37 }
 0x528   : > { %v6165_v16 = vsel %vm2867_vm4, %v2869_v33, %v2865_v54  ;;  %v2880_v20 = vsel %vm2879_vm10, %v4020_v37, %v2876_v62  ;;  %v2954_v3 = vmul.f32 %v2946_v36, %v6027_v45  ;;  %v2985_v61 = vmul.f32 1.442695, %v2972_v19 }
 0x529   : > { %v2893_v38 = vmul.f32 1.0614054, %v6165_v16  ;;  %v6172_v0 = vsel %vm2882_vm7, %v2884_v51, %v2880_v20  ;;  %v3199_v17 = vmul.f32 %v4026_v50, %v6148_v2  ;;  %v3179_v6 = vsub.f32 %v5714_v43, %v6089_v1 }
 0x52a   : > { %v2939_v12 = vmul.f32 %v3890_v57, %v6114_v4  ;;  %v2940_v32 = vmul.f32 %v3891_v28, %v6120_v14  ;;  %v2894_v7 = vmul.f32 1.0614054, %v6172_v0  ;;  %v3180_v37 = vsub.f32 %v5728_v10, %v6131_v24 }
 0x52b   : > { %v4028_v40 = vpop.eup %4027  ;;  %v3884_v52 = vadd.f32 -1.4531521, %v2893_v38  ;;  %v3200_v45 = vmul.f32 %v4026_v50, %v3199_v17  ;;  %v6182_v36 = vadd.f32 1e-05, %v3175_v30  ;;  %v3181_v19 = vsub.f32 %v5730_v21, %v6131_v24 }
 0x52c   : > { %v2993_v53 = vmul.f32 %v4022_v26, %v2953_v18  ;;  %4029 = vpow2.f32 %v2983_v22  ;;  %v3209_v43 = vmul.f32 %v4028_v40, %v6156_v23  ;;  %v3182_v29 = vsub.f32 %v5746_v27, %v6135_v35 }
 0x52d   : > { %v2994_v11 = vmul.f32 %v4024_v44, %v2954_v3  ;;  %4031 = vpow2.f32 %v2985_v61  ;;  %v3201_v47 = vmul.f32 0.5, %v3200_v45  ;;  %v2947_v15 = vadd.f32 0.2548296, %v2939_v12 }
 0x52e   : > { %v2948_v48 = vadd.f32 0.2548296, %v2940_v32  ;;  %v3885_v33 = vadd.f32 -1.4531521, %v2894_v7  ;;  %v3210_v25 = vmul.f32 %v4028_v40, %v3209_v43  ;;  %v2909_v57 = vmul.f32 %v3884_v52, %v6165_v16 }
 0x52f   : > { %v3202_v28 = vsub.f32 1.5, %v3201_v47  ;;  %vm3205_vm14 = vweird.f32 %v4026_v50  ;;  %4033 = vrsqrt.f32 %v6182_v36  ;;  %v3183_v26 = vsub.f32 %v5748_v55, %v6135_v35 }
 0x530   : > { %v6194_v54 = vmul.f32 0.5, %v5896_v41  ;;  %v3001_v62 = vsub.f32 1.0, %v2993_v53  ;;  %v3211_v44 = vmul.f32 0.5, %v3210_v25  ;;  %v6197_v22 = vmul.f32 0.5, %v5898_v49 }
 0x531   : > { %v3002_v51 = vsub.f32 1.0, %v2994_v11  ;;  %v3203_v30 = vmul.f32 %v4026_v50, %v3202_v28  ;;  %vm3204_vm0 = vweird.f32 %v6148_v2  ;;  %vm3009_vm12 = vcmp.ge.f32.partialorder %v5912_v31, 0.0 }
 0x532   : > { %v4030_v18 = vpop.eup %4029  ;;  %v2955_v20 = vmul.f32 %v2947_v15, %v6114_v4  ;;  %v2956_v38 = vmul.f32 %v2948_v48, %v6120_v14  ;;  %v2910_v3 = vmul.f32 %v3885_v33, %v6172_v0  ;;  %vm3206_vm13 = vmor %vm3204_vm0, %vm3205_vm14  ;;  %vm3010_vm9 = vcmp.ge.f32.partialorder %v5915_v5, 0.0 }
 0x533   : > { %v4032_v41 = vpop.eup %4031  ;;  %v2917_v49 = vadd.f32 1.4214138, %v2909_v57  ;;  %v3207_v61 = vsel %vm3206_vm13, %v4026_v50, %v3203_v30  ;;  %v3212_v17 = vsub.f32 1.5, %v3211_v44  ;;  %v3017_v12 = vsub.f32 0.0, %v3001_v62 }
 0x534   : > { %v2965_v2 = vsub.f32 0.0, %v6102_v58  ;;  %v3230_v32 = vmul.f32 %v3207_v61, %v3178_v63  ;;  %vm3215_vm6 = vweird.f32 %v4028_v40  ;;  %v3018_v14 = vsub.f32 0.0, %v3002_v51 }
 0x535   : > { %v6210_v4 = vpop.eup %4033  ;;  %v3231_v7 = vmul.f32 %v3207_v61, %v3179_v6  ;;  %v3213_v52 = vmul.f32 %v4028_v40, %v3212_v17  ;;  %vm3214_vm5 = vweird.f32 %v6156_v23  ;;  %v2995_v45 = vmul.f32 %v4030_v18, %v2955_v20 }
 0x536   : > { %v2996_v53 = vmul.f32 %v4032_v41, %v2956_v38  ;;  %v2918_v43 = vadd.f32 1.4214138, %v2910_v3  ;;  %v6213_v50 = vmul.f32 0.70710677, %v3230_v32  ;;  %v6216_v11 = vmul.f32 0.5, %v6021_v13  ;;  %vm3216_vm3 = vmor %vm3214_vm5, %vm3215_vm6 }
 0x537   : > { %v6219_v47 = vmul.f32 0.5, %v6032_v60  ;;  %v2925_v34 = vmul.f32 %v2917_v49, %v6165_v16  ;;  %v6222_v1 = vmul.f32 0.70710677, %v3231_v7  ;;  %v3025_v63 = vsel %vm3009_vm12, %v3001_v62, %v3017_v12 }
 0x538   : > { %v3254_v23 = vand.u32 2147483647, %v6213_v50  ;;  %v3217_v6 = vsel %vm3216_vm3, %v4028_v40, %v3213_v52  ;;  %v3219_v15 = vmul.f32 %v6210_v4, %v6182_v36  ;;  %v3026_v13 = vsel %vm3010_vm9, %v3002_v51, %v3018_v14 }
 0x539   : > { %v2966_v60 = vsub.f32 0.0, %v6106_v56  ;;  %v2973_v48 = vmul.f32 %v2965_v2, %v6102_v58  ;;  %v3255_v33 = vand.u32 2147483647, %v6222_v1  ;;  %v3003_v25 = vsub.f32 1.0, %v2995_v45 }
 0x53a   : > { %v3004_v57 = vsub.f32 1.0, %v2996_v53  ;;  %v2926_v31 = vmul.f32 %v2918_v43, %v6172_v0  ;;  %v3262_v28 = vmul.f32 0.3275911, %v3254_v23  ;;  %vm3011_vm2 = vcmp.ge.f32.partialorder %v6040_v59, 0.0 }
 0x53b   : > { %v3892_v40 = vadd.f32 -0.28449672, %v2925_v34  ;;  %v3263_v62 = vmul.f32 0.3275911, %v3255_v33  ;;  %v6239_v5 = vmul.f32 %v3217_v6, %v3180_v37  ;;  %v3033_v44 = vadd.f32 1.0, %v3025_v63 }
 0x53c   : > { %v6241_v51 = vadd.f32 1.0, %v3262_v28  ;;  %v6246_v58 = vmul.f32 %v3217_v6, %v3181_v19  ;;  %v3220_v30 = vmul.f32 %v6210_v4, %v3219_v15  ;;  %v3034_v18 = vadd.f32 1.0, %v3026_v13 }
 0x53d   : > { %v2974_v20 = vmul.f32 %v2966_v60, %v6106_v56  ;;  %v2987_v38 = vmul.f32 1.442695, %v2973_v48  ;;  %v6250_v3 = vadd.f32 1.0, %v3263_v62  ;;  %v3019_v41 = vsub.f32 0.0, %v3003_v25 }
 0x53e   : > { %v3020_v10 = vsub.f32 0.0, %v3004_v57  ;;  %v3893_v37 = vadd.f32 -0.28449672, %v2926_v31  ;;  %4035 = vrcp.f32 %v6241_v51  ;;  %vm3012_vm1 = vcmp.ge.f32.partialorder %v6043_v8, 0.0 }
 0x53f   : > { %v2941_v49 = vmul.f32 %v3892_v40, %v6165_v16  ;;  %4037 = vrcp.f32 %v6250_v3  ;;  %v6257_v21 = vmul.f32 0.70710677, %v6239_v5  ;;  %v3470_v24 = vsub.f32 0.0, %v3254_v23 }
 0x540   : > { %v3471_v19 = vsub.f32 0.0, %v3255_v33  ;;  %v6260_v56 = vmul.f32 0.70710677, %v6246_v58  ;;  %v3221_v61 = vmul.f32 0.5, %v3220_v30  ;;  %v6263_v17 = vmul.f32 %v3033_v44, %v6194_v54 }
 0x541   : > { %v6266_v12 = vmul.f32 %v3034_v18, %v6197_v22  ;;  %4039 = vpow2.f32 %v2987_v38  ;;  %v6268_v8 = vmul.f32 1.442695, %v2974_v20  ;;  %v6272_v2 = vsel %vm3011_vm2, %v3003_v25, %v3019_v41 }
 0x542   : > { %v6274_v14 = vsel %vm3012_vm1, %v3004_v57, %v3020_v10  ;;  %v6277_v52 = vmul.f32 %v3893_v37, %v6172_v0  ;;  %vm3224_vm11 = vweird.f32 %v6182_v36  ;;  %vm3225_vm8 = vweird.f32 %v6210_v4 }
 0x543   : > { %v6281_v54 = vadd.f32 0.2548296, %v2941_v49  ;;  %v6283_v22 = vmul.f32 0.5, %v3230_v32  ;;  %v6285_v45 = vmul.f32 0.5, %v3231_v7  ;;  %v3256_v53 = vand.u32 2147483647, %v6257_v21  ;;  %vm3226_vm12 = vmor %vm3224_vm11, %vm3225_vm8 }
 0x544   : > { %v4036_v59 = vpop.eup %4035  ;;  %v3478_v43 = vmul.f32 %v3470_v24, %v3254_v23  ;;  %v3479_v34 = vmul.f32 %v3471_v19, %v3255_v33  ;;  %v6289_v63 = vand.u32 2147483647, %v6260_v56  ;;  %v3222_v6 = vsub.f32 1.5, %v3221_v61 }
 0x545   : > { %v4038_v15 = vpop.eup %4037  ;;  %v3307_v13 = vmul.f32 %v4036_v59, %v6241_v51  ;;  %vm3311_vm15 = vweird.f32 %v6241_v51  ;;  %v3315_v60 = vand.u32 2147483647, %v6241_v51  ;;  %v3264_v32 = vmul.f32 0.3275911, %v3256_v53 }
 0x546   : > { %v3317_v7 = vand.u32 2147483648, %v6241_v51  ;;  %v3322_v48 = vmul.f32 %v4038_v15, %v6250_v3  ;;  %vm3326_vm4 = vweird.f32 %v6250_v3  ;;  %v3265_v23 = vmul.f32 0.3275911, %v6289_v63 }
 0x547   : > { %v6298_v33 = vpop.eup %4039  ;;  %v3308_v25 = vsub.f32 1.0, %v3307_v13  ;;  %v3330_v57 = vand.u32 2147483647, %v6250_v3  ;;  %v3332_v31 = vand.u32 2147483648, %v6250_v3  ;;  %v6302_v28 = vadd.f32 1.0, %v3264_v32 }
 0x548   : > { %vm3312_vm10 = vweird.f32 %v4036_v59  ;;  %v3323_v40 = vsub.f32 1.0, %v3322_v48  ;;  %v3488_v62 = vmul.f32 1.442695, %v3478_v43  ;;  %v6304_v44 = vadd.f32 1.0, %v3265_v23 }
 0x549   : > { %v3309_v30 = vmul.f32 %v4036_v59, %v3308_v25  ;;  %4041 = vrcp.f32 %v6302_v28  ;;  %v3472_v18 = vsub.f32 0.0, %v3256_v53  ;;  %v3223_v20 = vmul.f32 %v6210_v4, %v3222_v6  ;;  %vm3313_vm13 = vmor %vm3311_vm15, %vm3312_vm10 }
 0x54a   : > { %vm6308_vm7 = vcmp.eq.f32.partialorder %v3315_v60, 8.507059e+37  ;;  %v3324_v41 = vmul.f32 %v4038_v15, %v3323_v40  ;;  %vm3327_vm14 = vweird.f32 %v4038_v15  ;;  %4043 = vrcp.f32 %v6304_v44 }
 0x54b   : > { %v3310_v10 = vadd.f32 %v4036_v59, %v3309_v30  ;;  %v3318_v37 = vor.u32 1.1754944e-38, %v3317_v7  ;;  %vm6313_vm0 = vcmp.eq.f32.partialorder %v3330_v57, 8.507059e+37  ;;  %v3333_v24 = vor.u32 1.1754944e-38, %v3332_v31  ;;  %vm3328_vm9 = vmor %vm3326_vm4, %vm3327_vm14 }
 0x54c   : > { %v3325_v19 = vadd.f32 %v4038_v15, %v3324_v41  ;;  %4045 = vpow2.f32 %v3488_v62  ;;  %v6324_v61 = vmul.f32 1.442695, %v3479_v34  ;;  %v3345_v43 = vand.u32 2147483647, %v6302_v28 }
 0x54d   : > { %v3314_v6 = vsel %vm3313_vm13, %v4036_v59, %v3310_v10  ;;  %v3473_v13 = vsub.f32 0.0, %v6289_v63  ;;  %v3480_v60 = vmul.f32 %v3472_v18, %v3256_v53  ;;  %v3227_v36 = vsel %vm3226_vm12, %v6210_v4, %v3223_v20 }
 0x54e   : > { %v6333_v32 = vsel %vm6308_vm7, %v3318_v37, %v3314_v6  ;;  %v3329_v51 = vsel %vm3328_vm9, %v4038_v15, %v3325_v19  ;;  %vm3341_vm6 = vweird.f32 %v6302_v28  ;;  %v3347_v34 = vand.u32 2147483648, %v6302_v28 }
 0x54f   : > { %v4042_v7 = vpop.eup %4041  ;;  %v6339_v59 = vsel %vm6313_vm0, %v3333_v24, %v3329_v51  ;;  %v3398_v3 = vmul.f32 1.0614054, %v6333_v32  ;;  %v6345_v4 = vmul.f32 %v3227_v36, %v3182_v29  ;;  %v6350_v53 = vmul.f32 %v3227_v36, %v3183_v26 }
 0x550   : > { %v4044_v15 = vpop.eup %4043  ;;  %v3399_v48 = vmul.f32 1.0614054, %v6339_v59  ;;  %v3337_v23 = vmul.f32 %v4042_v7, %v6302_v28  ;;  %vm6354_vm5 = vcmp.eq.f32.partialorder %v3345_v43, 8.507059e+37  ;;  %vm3356_vm3 = vweird.f32 %v6304_v44 }
 0x551   : > { %v3906_v57 = vadd.f32 -1.4531521, %v3398_v3  ;;  %v3352_v27 = vmul.f32 %v4044_v15, %v6304_v44  ;;  %v3360_v29 = vand.u32 2147483647, %v6304_v44  ;;  %v3362_v55 = vand.u32 2147483648, %v6304_v44 }
 0x552   : > { %v6362_v35 = vpop.eup %4045  ;;  %v3907_v26 = vadd.f32 -1.4531521, %v3399_v48  ;;  %v3338_v31 = vsub.f32 1.0, %v3337_v23  ;;  %v3348_v40 = vor.u32 1.1754944e-38, %v3347_v34  ;;  %v6365_v62 = vmul.f32 0.70710677, %v6345_v4 }
 0x553   : > { %v3414_v30 = vmul.f32 %v3906_v57, %v6333_v32  ;;  %v3353_v18 = vsub.f32 1.0, %v3352_v27  ;;  %v3481_v20 = vmul.f32 %v3473_v13, %v6289_v63  ;;  %v6370_v38 = vmul.f32 0.70710677, %v6350_v53 }
 0x554   : > { %v3415_v41 = vmul.f32 %v3907_v26, %v6339_v59  ;;  %v3339_v10 = vmul.f32 %v4042_v7, %v3338_v31  ;;  %vm3342_vm2 = vweird.f32 %v4042_v7  ;;  %v6374_v37 = vand.u32 2147483647, %v6365_v62 }
 0x555   : > { %v3422_v49 = vadd.f32 1.4214138, %v3414_v30  ;;  %v3354_v24 = vmul.f32 %v4044_v15, %v3353_v18  ;;  %vm3357_vm1 = vweird.f32 %v4044_v15  ;;  %v6377_v19 = vand.u32 2147483647, %v6370_v38  ;;  %vm3343_vm11 = vmor %vm3341_vm6, %vm3342_vm2 }
 0x556   : > { %v3423_v43 = vadd.f32 1.4214138, %v3415_v41  ;;  %v3340_v6 = vadd.f32 %v4042_v7, %v3339_v10  ;;  %v3492_v36 = vmul.f32 1.442695, %v3480_v60  ;;  %v3266_v63 = vmul.f32 0.3275911, %v6374_v37  ;;  %vm3358_vm15 = vmor %vm3356_vm3, %vm3357_vm1 }
 0x557   : > { %v3430_v13 = vmul.f32 %v3422_v49, %v6333_v32  ;;  %v3355_v51 = vadd.f32 %v4044_v15, %v3354_v24  ;;  %vm3361_vm8 = vcmp.eq.f32.partialorder %v3360_v29, 8.507059e+37  ;;  %v3267_v34 = vmul.f32 0.3275911, %v6377_v19 }
 0x558   : > { %v3431_v3 = vmul.f32 %v3423_v43, %v6339_v59  ;;  %v3344_v48 = vsel %vm3343_vm11, %v4042_v7, %v3340_v6  ;;  %v3363_v23 = vor.u32 1.1754944e-38, %v3362_v55  ;;  %v6387_v57 = vadd.f32 1.0, %v3266_v63 }
 0x559   : > { %v3914_v60 = vadd.f32 -0.28449672, %v3430_v13  ;;  %v6391_v27 = vsel %vm6354_vm5, %v3348_v40, %v3344_v48  ;;  %v3359_v28 = vsel %vm3358_vm15, %v4044_v15, %v3355_v51  ;;  %v6393_v26 = vadd.f32 1.0, %v3267_v34 }
 0x55a   : > { %v3915_v29 = vadd.f32 -0.28449672, %v3431_v3  ;;  %v6395_v31 = vsel %vm3361_vm8, %v3363_v23, %v3359_v28  ;;  %v3400_v30 = vmul.f32 1.0614054, %v6391_v27  ;;  %4047 = vrcp.f32 %v6387_v57 }
 0x55b   : > { %v3446_v44 = vmul.f32 %v3914_v60, %v6333_v32  ;;  %4049 = vpow2.f32 %v6324_v61  ;;  %v3401_v7 = vmul.f32 1.0614054, %v6395_v31  ;;  %v3494_v55 = vmul.f32 1.442695, %v3481_v20 }
 0x55c   : > { %v6403_v25 = vadd.f32 0.2548296, %v6277_v52  ;;  %v3447_v15 = vmul.f32 %v3915_v29, %v6339_v59  ;;  %v3908_v40 = vadd.f32 -1.4531521, %v3400_v30  ;;  %4051 = vrcp.f32 %v6393_v26 }
 0x55d   : > { %v6409_v18 = vmul.f32 %v6281_v54, %v6165_v16  ;;  %v3454_v41 = vadd.f32 0.2548296, %v3446_v44  ;;  %v3909_v10 = vadd.f32 -1.4531521, %v3401_v7  ;;  %v3375_v49 = vand.u32 2147483647, %v6387_v57 }
 0x55e   : > { %v3455_v61 = vadd.f32 0.2548296, %v3447_v15  ;;  %vm3518_vm4 = vcmp.ge.f32.partialorder %v6213_v50, 0.0  ;;  %v3416_v20 = vmul.f32 %v3908_v40, %v6391_v27  ;;  %4053 = vpow2.f32 %v3492_v36 }
 0x55f   : > { %v3377_v52 = vand.u32 2147483648, %v6387_v57  ;;  %v3462_v24 = vmul.f32 %v3454_v41, %v6333_v32  ;;  %vm3519_vm10 = vcmp.ge.f32.partialorder %v6222_v1, 0.0  ;;  %v3417_v43 = vmul.f32 %v3909_v10, %v6395_v31 }
 0x560   : > { %4055 = vpow2.f32 %v3494_v55  ;;  %v4048_v16 = vpop.eup %4047  ;;  %v3463_v54 = vmul.f32 %v3455_v61, %v6339_v59  ;;  %v3424_v6 = vadd.f32 1.4214138, %v3416_v20  ;;  %vm3371_vm7 = vweird.f32 %v6387_v57 }
 0x561   : > { %v3474_v63 = vsub.f32 0.0, %v6374_v37  ;;  %v4050_v13 = vpop.eup %4049  ;;  %v3502_v36 = vmul.f32 %v6362_v35, %v3462_v24  ;;  %v3425_v51 = vadd.f32 1.4214138, %v3417_v43  ;;  %v3367_v34 = vmul.f32 %v4048_v16, %v6387_v57 }
 0x562   : > { %vm6423_vm14 = vcmp.eq.f32.partialorder %v3375_v49, 8.507059e+37  ;;  %v4052_v3 = vpop.eup %4051  ;;  %v3503_v48 = vmul.f32 %v4050_v13, %v3463_v54  ;;  %v3432_v23 = vmul.f32 %v3424_v6, %v6391_v27  ;;  %v3378_v59 = vor.u32 1.1754944e-38, %v3377_v52 }
 0x563   : > { %vm3386_vm0 = vweird.f32 %v6393_v26  ;;  %v3510_v60 = vsub.f32 1.0, %v3502_v36  ;;  %v3433_v28 = vmul.f32 %v3425_v51, %v6395_v31  ;;  %v3368_v29 = vsub.f32 1.0, %v3367_v34 }
 0x564   : > { %v3382_v35 = vmul.f32 %v4052_v3, %v6393_v26  ;;  %v4054_v30 = vpop.eup %4053  ;;  %v3511_v44 = vsub.f32 1.0, %v3503_v48  ;;  %v3916_v7 = vadd.f32 -0.28449672, %v3432_v23  ;;  %vm3372_vm12 = vweird.f32 %v4048_v16 }
 0x565   : > { %v3390_v55 = vand.u32 2147483647, %v6393_v26  ;;  %v3526_v40 = vsub.f32 0.0, %v3510_v60  ;;  %v3917_v41 = vadd.f32 -0.28449672, %v3433_v28  ;;  %v3369_v10 = vmul.f32 %v4048_v16, %v3368_v29  ;;  %vm3373_vm9 = vmor %vm3371_vm7, %vm3372_vm12 }
 0x566   : > { %v4056_v15 = vpop.eup %4055  ;;  %v3383_v49 = vsub.f32 1.0, %v3382_v35  ;;  %v3527_v61 = vsub.f32 0.0, %v3511_v44  ;;  %v3448_v20 = vmul.f32 %v3916_v7, %v6391_v27  ;;  %vm3387_vm13 = vweird.f32 %v4052_v3 }
 0x567   : > { %v3392_v52 = vand.u32 2147483648, %v6393_v26  ;;  %v3534_v24 = vsel %vm3518_vm4, %v3510_v60, %v3526_v40  ;;  %v3449_v43 = vmul.f32 %v3917_v41, %v6395_v31  ;;  %v3370_v54 = vadd.f32 %v4048_v16, %v3369_v10  ;;  %vm3388_vm5 = vmor %vm3386_vm0, %vm3387_vm13 }
 0x568   : > { %v3384_v6 = vmul.f32 %v4052_v3, %v3383_v49  ;;  %v3535_v13 = vsel %vm3519_vm10, %v3511_v44, %v3527_v61  ;;  %v3542_v36 = vadd.f32 1.0, %v3534_v24  ;;  %v3456_v51 = vadd.f32 0.2548296, %v3448_v20 }
 0x569   : > { %vm6442_vm6 = vcmp.eq.f32.partialorder %v3390_v55, 8.507059e+37  ;;  %v3543_v48 = vadd.f32 1.0, %v3535_v13  ;;  %v3457_v50 = vadd.f32 0.2548296, %v3449_v43  ;;  %v3374_v23 = vsel %vm3373_vm9, %v4048_v16, %v3370_v54 }
 0x56a   : > { %v3385_v60 = vadd.f32 %v4052_v3, %v3384_v6  ;;  %v3550_v28 = vmul.f32 %v3542_v36, %v6283_v22  ;;  %v3464_v29 = vmul.f32 %v3456_v51, %v6391_v27  ;;  %v6450_v1 = vsel %vm6423_vm14, %v3378_v59, %v3374_v23 }
 0x56b   : > { %v3393_v57 = vor.u32 1.1754944e-38, %v3392_v52  ;;  %v3551_v35 = vmul.f32 %v3543_v48, %v6285_v45  ;;  %v3465_v44 = vmul.f32 %v3457_v50, %v6395_v31  ;;  %v3402_v22 = vmul.f32 1.0614054, %v6450_v1 }
 0x56c   : > { %v3389_v16 = vsel %vm3388_vm5, %v4052_v3, %v3385_v60  ;;  %v3558_v27 = vadd.f32 %v3550_v28, %v6263_v17  ;;  %v3504_v7 = vmul.f32 %v4054_v30, %v3464_v29  ;;  %v3475_v59 = vsub.f32 0.0, %v6377_v19 }
 0x56d   : > { %v3394_v32 = vsel %vm6442_vm6, %v3393_v57, %v3389_v16  ;;  %v3559_v26 = vadd.f32 %v3551_v35, %v6266_v12  ;;  %v3505_v55 = vmul.f32 %v4056_v15, %v3465_v44  ;;  %v3910_v41 = vadd.f32 -1.4531521, %v3402_v22 }
 0x56e   : > { %v3403_v40 = vmul.f32 1.0614054, %v3394_v32  ;;  %v3035_v45 = vadd.f32 1.0, %v6272_v2  ;;  %4057 = vpow2.f32 %v6268_v8  ;;  %3566 = vst [vmem:[%s6066_s14 + $0x10] sm:$0xff] %v3558_v27  ;;  %v3512_v31 = vsub.f32 1.0, %v3504_v7 }
 0x56f   : > { %v3482_v17 = vmul.f32 %v3474_v63, %v6374_v37  ;;  %v3036_v3 = vadd.f32 1.0, %v6274_v14  ;;  %3567 = vst [vmem:[%s6066_s14 + $0x18] sm:$0xff] %v3559_v26  ;;  %v3513_v30 = vsub.f32 1.0, %v3505_v55  ;;  %v3418_v12 = vmul.f32 %v3910_v41, %v6450_v1 }
 0x570   : > { %v3911_v10 = vadd.f32 -1.4531521, %v3403_v40  ;;  %v2958_v15 = vmul.f32 %v6403_v25, %v6172_v0  ;;  %v2997_v2 = vmul.f32 %v6298_v33, %v6409_v18  ;;  %v3528_v8 = vsub.f32 0.0, %v3512_v31 }
 0x571   : > { %v3483_v49 = vmul.f32 %v3475_v59, %v6377_v19  ;;  %vm3520_vm3 = vcmp.ge.f32.partialorder %v6257_v21, 0.0  ;;  %v3529_v61 = vsub.f32 0.0, %v3513_v30  ;;  %v3426_v63 = vadd.f32 1.4214138, %v3418_v12 }
 0x572   : > { %v3419_v37 = vmul.f32 %v3911_v10, %v3394_v32  ;;  %v3240_v14 = vmul.f32 0.5, %v6239_v5  ;;  %vm3521_vm2 = vcmp.ge.f32.partialorder %v6260_v56, 0.0  ;;  %v3536_v20 = vsel %vm3520_vm3, %v3512_v31, %v3528_v8 }
 0x573   : > { %v3496_v52 = vmul.f32 1.442695, %v3482_v17  ;;  %v3537_v24 = vsel %vm3521_vm2, %v3513_v30, %v3529_v61  ;;  %v3544_v43 = vadd.f32 1.0, %v3536_v20  ;;  %v3434_v25 = vmul.f32 %v3426_v63, %v6450_v1 }
 0x574   : > { %v3427_v0 = vadd.f32 1.4214138, %v3419_v37  ;;  %v4058_v33 = vpop.eup %4057  ;;  %v3043_v18 = vmul.f32 %v3035_v45, %v6216_v11  ;;  %v3241_v19 = vmul.f32 0.5, %v6246_v58  ;;  %v3545_v21 = vadd.f32 1.0, %v3537_v24 }
 0x575   : > { %v3498_v54 = vmul.f32 1.442695, %v3483_v49  ;;  %v2998_v6 = vmul.f32 %v4058_v33, %v2958_v15  ;;  %v3552_v13 = vmul.f32 %v3544_v43, %v3240_v14  ;;  %v3918_v56 = vadd.f32 -0.28449672, %v3434_v25 }
 0x576   : > { %v3435_v5 = vmul.f32 %v3427_v0, %v3394_v32  ;;  %v3044_v36 = vmul.f32 %v3036_v3, %v6219_v47  ;;  %v3553_v51 = vmul.f32 %v3545_v21, %v3241_v19  ;;  %4059 = vpow2.f32 %v3496_v52 }
 0x577   : > { %v3005_v34 = vsub.f32 1.0, %v2997_v2  ;;  %v3560_v48 = vadd.f32 %v3552_v13, %v3043_v18  ;;  %v3450_v23 = vmul.f32 %v3918_v56, %v6450_v1  ;;  %4061 = vpow2.f32 %v3498_v54 }
 0x578   : > { %v3919_v50 = vadd.f32 -0.28449672, %v3435_v5  ;;  %v3561_v11 = vadd.f32 %v3553_v51, %v3044_v36  ;;  %v3006_v58 = vsub.f32 1.0, %v2998_v6  ;;  %vm3013_vm1 = vcmp.ge.f32.partialorder %v6093_v9, 0.0 }
 0x579   : > { %3568 = vst [vmem:[%s6066_s14 + $0x20] sm:$0xff] %v3560_v48  ;;  %v3458_v28 = vadd.f32 0.2548296, %v3450_v23  ;;  %v3021_v29 = vsub.f32 0.0, %v3005_v34  ;;  %vm3014_vm11 = vcmp.ge.f32.partialorder %v6099_v39, 0.0  ;;  %vm3522_vm8 = vcmp.ge.f32.partialorder %v6365_v62, 0.0 }
 0x57a   : > { %v3451_v60 = vmul.f32 %v3919_v50, %v3394_v32  ;;  %3569 = vst [vmem:[%s6066_s14 + $0x28] sm:$0xff] %v3561_v11  ;;  %v3022_v47 = vsub.f32 0.0, %v3006_v58  ;;  %v3242_v9 = vmul.f32 0.5, %v6345_v4  ;;  %vm3523_vm15 = vcmp.ge.f32.partialorder %v6370_v38, 0.0 }
 0x57b   : > { %v3466_v35 = vmul.f32 %v3458_v28, %v6450_v1  ;;  %v3029_v7 = vsel %vm3013_vm1, %v3005_v34, %v3021_v29  ;;  %v2733_v1 = vmul.f32 0.5, %v6084_v42  ;;  %v2734_v39 = vmul.f32 0.5, %v6086_v46 }
 0x57c   : > { %v3459_v57 = vadd.f32 0.2548296, %v3451_v60  ;;  %v4060_v44 = vpop.eup %4059  ;;  %v3030_v55 = vsel %vm3014_vm11, %v3006_v58, %v3022_v47  ;;  %v3037_v45 = vadd.f32 1.0, %v3029_v7  ;;  %v3243_v12 = vmul.f32 0.5, %v6350_v53 }
 0x57d   : > { %v3506_v22 = vmul.f32 %v4060_v44, %v3466_v35  ;;  %v4062_v27 = vpop.eup %4061  ;;  %v3038_v17 = vadd.f32 1.0, %v3030_v55 }
 0x57e   : > { %v3467_v16 = vmul.f32 %v3459_v57, %v3394_v32  ;;  %v3045_v10 = vmul.f32 %v3037_v45, %v2733_v1 }
 0x57f   : > { %v3514_v26 = vsub.f32 1.0, %v3506_v22  ;;  %v3046_v2 = vmul.f32 %v3038_v17, %v2734_v39 }
 0x580   : > { %v3507_v59 = vmul.f32 %v4062_v27, %v3467_v16 }
 0x581   : > { %v3530_v41 = vsub.f32 0.0, %v3514_v26 }
 0x582   : > { %v3515_v40 = vsub.f32 1.0, %v3507_v59 }
 0x583   : > { %v3538_v32 = vsel %vm3522_vm8, %v3514_v26, %v3530_v41 }
 0x584   : > { %v3531_v31 = vsub.f32 0.0, %v3515_v40  ;;  %v3546_v3 = vadd.f32 1.0, %v3538_v32 }
 0x586   : > { %v3539_v30 = vsel %vm3523_vm15, %v3515_v40, %v3531_v31  ;;  %v3554_v62 = vmul.f32 %v3546_v3, %v3242_v9 }
 0x587   : > { %v3547_v15 = vadd.f32 1.0, %v3539_v30 }
 0x588   : > { %v3562_v8 = vadd.f32 %v3554_v62, %v3045_v10 }
 0x589   : > { %v3555_v42 = vmul.f32 %v3547_v15, %v3243_v12 }
 0x58a   : > { %3570 = vst [vmem:[%s6066_s14 + $0x30] sm:$0xff] %v3562_v8 }
 0x58b   : > { %v3563_v49 = vadd.f32 %v3555_v42, %v3046_v2 }
 0x58d   : > { %3571 = vst [vmem:[%s6066_s14 + $0x38] sm:$0xff] %v3563_v49 }
 0x58e PF: > { %s14_s15 = sadd.s32 1, %s4069_s15  }
 0x58f   : > { %p11_p4 = scmp.ge.s32.totalorder %s14_s15, 4  }
 0x591   :  { %13 = sbr.rel (!%p11_p4) target bundleno = 1 (0x1), region = 82 }

</bundles_post_ra>
